<compile_context>
chip_gen: v5e
topology: v5e:2x2
jax: 0.10.0
libtpu: 0.0.40
codegen_flags: <defaults>
</compile_context>

<pallas_src>
import functools

import jax
import jax.numpy as jnp
from jax.experimental import pallas as pl
from jax.experimental.pallas import tpu as pltpu

LANE = 128


def _round_up(x, m):
    return ((x + m - 1) // m) * m


# -----------------------------------------------------------------------------
# Pallas kernel: fused (M,Kp)bf16 @ (Kp,Cp)bf16 -> f32 accum, + bias (+ ReLU).
# -----------------------------------------------------------------------------
def _matmul_bias_act_kernel(a_ref, b_ref, bias_ref, o_ref, *, relu):
    acc = jnp.dot(a_ref[...], b_ref[...], preferred_element_type=jnp.float32)
    acc = acc + bias_ref[...]                  # (1, Cp) broadcasts over rows, f32
    if relu:
        acc = jnp.maximum(acc, 0.0)
    o_ref[...] = acc.astype(o_ref.dtype)


def matmul_bias_act(a, b, bias, *, relu=False):
    """a: (M, Kp) bf16, b: (Kp, Cp) bf16, bias: (1, Cp) f32 -> (M, Cp) f32.
    Kp and Cp are multiples of 128 (enforced by the weight packer)."""
    M, Kp = a.shape
    Kb, Cp = b.shape
    assert Kp == Kb and Kp % LANE == 0 and Cp % LANE == 0

    # Whole working set fits VMEM trivially at these shapes -> 1 grid step,
    # or 2 even steps when M allows (lets v7x's second TensorCore participate).
    m_pad = _round_up(M, LANE)
    if m_pad <= LANE:
        tile_m = m_pad
    elif m_pad <= 1024:
        tile_m = m_pad // 2
    else:
        tile_m = 512
        m_pad = _round_up(M, tile_m)
    grid_m = m_pad // tile_m

    if m_pad != M:                             # only pad when actually ragged
        a = jnp.pad(a, ((0, m_pad - M), (0, 0)))

    out = pl.pallas_call(
        functools.partial(_matmul_bias_act_kernel, relu=relu),
        out_shape=jax.ShapeDtypeStruct((m_pad, Cp), jnp.float32),
        grid=(grid_m,),
        in_specs=[
            pl.BlockSpec((tile_m, Kp), lambda i: (i, 0)),
            pl.BlockSpec((Kp, Cp), lambda i: (0, 0)),
            pl.BlockSpec((1, Cp), lambda i: (0, 0)),
        ],
        out_specs=pl.BlockSpec((tile_m, Cp), lambda i: (i, 0)),
        compiler_params=pltpu.CompilerParams(
            dimension_semantics=("parallel",)),
    )(a, b, bias)
    return out[:M] if m_pad != M else out


# -----------------------------------------------------------------------------
# Convolution wrapper: im2col (glue) + Pallas GEMM (compute).
# -----------------------------------------------------------------------------
def _im2col(x, kh, kw, stride):
    """x: (N,H,W,Cin) -> (N*Ho*Wo, kh*kw*Cin) with 'same' taps; stride-s picks
    output pixels at rows/cols 0, s, 2s, ... (tap-identical to stride-1 conv
    followed by [::s, ::s] decimation)."""
    N, H, W, Cin = x.shape
    Ho = -(-H // stride)
    Wo = -(-W // stride)
    if kh == 1 and kw == 1 and stride == 1:
        return x.reshape(N * H * W, Cin), Ho, Wo
    ph, pw = kh // 2, kw // 2
    xp = jnp.pad(x, ((0, 0), (ph, ph), (pw, pw), (0, 0)))
    cols = []
    for dy in range(kh):
        for dx in range(kw):
            cols.append(xp[:, dy:dy + stride * (Ho - 1) + 1:stride,
                               dx:dx + stride * (Wo - 1) + 1:stride, :])
    a = jnp.concatenate(cols, axis=-1).reshape(N * Ho * Wo, kh * kw * Cin)
    return a, Ho, Wo


def conv_gemm(x, packed, *, kh, kw, cout, relu=False, stride=1):
    """'same'-padded conv (stride 1 or 2) via im2col + fused Pallas GEMM.
    packed = (w_pad, b_pad) from _pack_conv(). Returns (N,Ho,Wo,cout) f32."""
    w_pad, b_pad = packed
    N, H, W, Cin = x.shape
    K = kh * kw * Cin
    Kp, _ = w_pad.shape
    # TODO(synk): the 3x3 im2col still materializes a 9x-wide patch matrix in
    # HBM; moving the 9-tap accumulation inside the kernel is the next step.
    a, Ho, Wo = _im2col(x.astype(jnp.bfloat16), kh, kw, stride)
    if Kp != K:
        a = jnp.pad(a, ((0, 0), (0, Kp - K)))  # zero K-cols: numerically free
    out = matmul_bias_act(a, w_pad, b_pad, relu=relu)
    return out[:, :cout].reshape(N, Ho, Wo, cout)


# -----------------------------------------------------------------------------
# Synthetic config + deterministic parameter init (GEMM-ready, lane-dense).
# -----------------------------------------------------------------------------
class Cfg:
    INPUT_MAX_SIZE_TRAIN = 64
    SEG_FPN_STRIDES = 4
    BACKBONE_OUT_CHANNELS = 32
    NUM_CLASSES = 5          # FCOS cls logits channels
    NUM_SEG_CLASSES = 4      # seg head output channels
    VISEMB_DIM = 16          # visual embedding dim
    IN_CHANNELS = 4


def _conv_wb(key, kh, kw, cin, cout, scale=0.1):
    wk, bk = jax.random.split(key)
    w = scale * jax.random.normal(wk, (kh, kw, cin, cout), jnp.float32)
    b = scale * jax.random.normal(bk, (cout,), jnp.float32)
    return w, b


def _concat_convs(*wbs):
    """Fuse several convs with identical (kh,kw,cin) along Cout."""
    ws = [w for w, _ in wbs]
    bs = [b for _, b in wbs]
    return jnp.concatenate(ws, axis=3), jnp.concatenate(bs, axis=0)


def _pack_conv(w, b):
    """HWIO weight + bias -> lane-dense GEMM operands:
    ((Kp, Cp) bf16, (1, Cp) f32), Kp/Cp padded to multiples of 128."""
    kh, kw, cin, cout = w.shape
    K = kh * kw * cin
    Kp = _round_up(K, LANE)
    Cp = _round_up(cout, LANE)
    wm = jnp.pad(w.reshape(K, cout), ((0, Kp - K), (0, Cp - cout)))
    bm = jnp.pad(b, (0, Cp - cout)).reshape(1, Cp)
    return wm.astype(jnp.bfloat16), bm.astype(jnp.float32)


def init_params(cfg, key):
    keys = jax.random.split(key, 11)
    C = cfg.BACKBONE_OUT_CHANNELS
    p = {}
    # backbone (tiny FPN-ish stack: stride 1, 2, 4 levels)
    p["backbone_stem"]  = _pack_conv(*_conv_wb(keys[0], 3, 3, cfg.IN_CHANNELS, C))
    p["backbone_down1"] = _pack_conv(*_conv_wb(keys[1], 3, 3, C, C))
    p["backbone_down2"] = _pack_conv(*_conv_wb(keys[2], 3, 3, C, C))
    # FCOS rpn: shared 3x3 tower + fused (cls|reg|ctr) head (5+4+1=10 -> pad 128)
    p["rpn_tower"] = _pack_conv(*_conv_wb(keys[3], 3, 3, C, C))
    p["rpn_head"]  = _pack_conv(*_concat_convs(
        _conv_wb(keys[4], 3, 3, C, cfg.NUM_CLASSES),
        _conv_wb(keys[5], 3, 3, C, 4),
        _conv_wb(keys[6], 3, 3, C, 1)))
    # seg_tower + visemb_tower share features_share -> fuse (C|C) along Cout
    p["share_tower"] = _pack_conv(*_concat_convs(
        _conv_wb(keys[7], 3, 3, C + 2, C),
        _conv_wb(keys[8], 3, 3, C + 2, C)))
    p["seg_pred"]    = _pack_conv(*_conv_wb(keys[9], 3, 3, C, cfg.NUM_SEG_CLASSES))
    p["visemb_proj"] = _pack_conv(*_conv_wb(keys[10], 1, 1, C, cfg.VISEMB_DIM))
    # location map exactly as in __init__: linspace grid (h,w) = max/stride + 50
    wh = int(cfg.INPUT_MAX_SIZE_TRAIN / cfg.SEG_FPN_STRIDES) + 50
    xs = jnp.linspace(0.0, 1.0, wh)
    xm = jnp.broadcast_to(xs[None, :], (wh, wh))      # varies along width
    ym = jnp.broadcast_to(xs[:, None], (wh, wh))      # varies along height
    p["location_map"] = jnp.stack([xm, ym], axis=-1)  # (h, w, 2), channels [x, y]
    return p


# -----------------------------------------------------------------------------
# Forward pass (inference mode), mirroring GeneralizedRCNN.forward.
# -----------------------------------------------------------------------------
def generalized_rcnn_forward(cfg, params, images_nchw):
    C = cfg.BACKBONE_OUT_CHANNELS
    ncls = cfg.NUM_CLASSES

    # to_image_list + NCHW -> NHWC (channels in the TPU lane dim)
    x = jnp.transpose(images_nchw, (0, 2, 3, 1)).astype(jnp.float32)

    # ---- backbone: multi-scale features (stride-2 im2col, no decimation) ----
    f0 = conv_gemm(x, params["backbone_stem"], kh=3, kw=3, cout=C, relu=True)
    f1 = conv_gemm(f0, params["backbone_down1"], kh=3, kw=3, cout=C,
                   relu=True, stride=2)
    f2 = conv_gemm(f1, params["backbone_down2"], kh=3, kw=3, cout=C,
                   relu=True, stride=2)
    features = [f0, f1, f2]

    # ---- rpn (FCOS head) on features[1:]: tower + ONE fused head GEMM -------
    proposals_det = []
    for feat in features[1:]:
        t = conv_gemm(feat, params["rpn_tower"], kh=3, kw=3, cout=C, relu=True)
        head = conv_gemm(t, params["rpn_head"], kh=3, kw=3, cout=ncls + 4 + 1)
        proposals_det.append({
            "cls_logits": head[..., :ncls],
            "bbox_reg":   head[..., ncls:ncls + 4],
            "centerness": head[..., ncls + 4:ncls + 5],
        })
    # TODO(synk): FCOS post-processing (box decode + NMS into BoxList proposals)
    # is data-dependent list logic with no clean Pallas equivalent.

    # ---- location map crop + channel concat ----------------------------------
    N, H, W, _ = f0.shape
    loc = params["location_map"][:H, :W, :]
    loc = jnp.broadcast_to(loc[None], (N, H, W, 2))
    features_share = jnp.concatenate([f0, loc], axis=-1)           # (N,H,W,C+2)

    # ---- seg + visemb towers: one shared im2col + one fused GEMM ------------
    towers = conv_gemm(features_share, params["share_tower"],
                       kh=3, kw=3, cout=2 * C, relu=True)
    seg_t, ve_t = towers[..., :C], towers[..., C:]

    proposals_seg = conv_gemm(seg_t, params["seg_pred"],
                              kh=3, kw=3, cout=cfg.NUM_SEG_CLASSES)  # seg logits
    visemb_features = conv_gemm(ve_t, params["visemb_proj"],
                                kh=1, kw=1, cout=cfg.VISEMB_DIM)     # (N,H,W,E)

    # ---- rel ------------------------------------------------------------------
    # TODO(synk): the rel module does graph reasoning over variable-length
    # decoded det/seg proposal sets; no clean Pallas equivalent — expose the
    # visual-embedding map it would consume instead.
    proposals_rel = visemb_features

    # inference-mode result: list of per-image dicts {'det','seg','rel'}
    result = []
    for n in range(N):
        result.append({
            "det": [{k: v[n] for k, v in lvl.items()} for lvl in proposals_det],
            "seg": proposals_seg[n],
            "rel": proposals_rel[n],
        })
    return result


if __name__ == "__main__":
    cfg = Cfg()
    key = jax.random.PRNGKey(0)
    pkey, xkey = jax.random.split(key)
    params = init_params(cfg, pkey)

    # small deterministic input: batch=2, channels=4, spatial=16 (NCHW, like PyTorch)
    images = jax.random.normal(xkey, (2, cfg.IN_CHANNELS, 16, 16), jnp.float32)

    fwd = jax.jit(functools.partial(generalized_rcnn_forward, cfg))
    result = fwd(params, images)
    result = jax.block_until_ready(result)

    # light sanity checks on shapes
    assert result[0]["seg"].shape == (16, 16, cfg.NUM_SEG_CLASSES)
    assert result[0]["rel"].shape == (16, 16, cfg.VISEMB_DIM)
    assert result[0]["det"][0]["cls_logits"].shape == (8, 8, cfg.NUM_CLASSES)
    assert result[0]["det"][1]["bbox_reg"].shape == (4, 4, 4)
    print("KERNEL_OK")
</pallas_src>

<mosaic_0001>
module attributes {stable_mosaic.version = 11 : i64} {
  func.func @_matmul_bias_act_kernel(%arg0: i32, %arg1: memref<256x128xbf16, #tpu.memory_space<vmem>>, %arg2: memref<128x128xbf16, #tpu.memory_space<vmem>>, %arg3: memref<1x128xf32, #tpu.memory_space<vmem>>, %arg4: memref<256x128xf32, #tpu.memory_space<vmem>>) attributes {dimension_semantics = [#tpu.dimension_semantics<parallel>], iteration_bounds = array<i64: 2>, scalar_prefetch = 0 : i64, scratch_operands = 0 : i64, tpu.core_type = #tpu.core_type<tc>, window_params = [{transform_indices = @transform_0, window_bounds = array<i64: 256, 128>}, {pipeline_mode = #tpu.pipeline_mode<synchronous>, transform_indices = @transform_1, window_bounds = array<i64: 128, 128>}, {pipeline_mode = #tpu.pipeline_mode<synchronous>, transform_indices = @transform_2, window_bounds = array<i64: 1, 128>}, {transform_indices = @transform_3, window_bounds = array<i64: 256, 128>}]} {
    %c0 = arith.constant 0 : index
    %c0_0 = arith.constant 0 : index
    %0 = vector.load %arg1[%c0, %c0_0] : memref<256x128xbf16, #tpu.memory_space<vmem>>, vector<256x128xbf16>
    %c0_1 = arith.constant 0 : index
    %c0_2 = arith.constant 0 : index
    %1 = vector.load %arg2[%c0_1, %c0_2] : memref<128x128xbf16, #tpu.memory_space<vmem>>, vector<128x128xbf16>
    %cst = arith.constant dense<0.000000e+00> : vector<256x128xf32>
    %2 = tpu.matmul %0, %1, %cst {dimension_numbers = #tpu.dot_dimension_numbers<[1], [0], [0], [1], [0, 0, 1, 1], [], []>} : vector<256x128xbf16>, vector<128x128xbf16>, vector<256x128xf32> -> vector<256x128xf32>
    %c0_3 = arith.constant 0 : index
    %c0_4 = arith.constant 0 : index
    %3 = vector.load %arg3[%c0_3, %c0_4] : memref<1x128xf32, #tpu.memory_space<vmem>>, vector<1x128xf32>
    %4 = vector.broadcast %3 : vector<1x128xf32> to vector<256x128xf32>
    %5 = arith.addf %2, %4 : vector<256x128xf32>
    %cst_5 = arith.constant 0.000000e+00 : f32
    %6 = vector.broadcast %cst_5 : f32 to vector<256x128xf32>
    %7 = arith.maximumf %5, %6 : vector<256x128xf32>
    %c0_6 = arith.constant 0 : index
    %c0_7 = arith.constant 0 : index
    %8 = vector.load %arg4[%c0_6, %c0_7] : memref<256x128xf32, #tpu.memory_space<vmem>>, vector<256x128xf32>
    tpu.vector_store %arg4[%c0_6, %c0_7], %7 {strides = array<i32>} : memref<256x128xf32, #tpu.memory_space<vmem>>, vector<256x128xf32>,
    return
  }
  func.func @transform_0(%arg0: i32) -> (i32, i32) {
    %c0_i32 = arith.constant 0 : i32
    %c0_i32_0 = arith.constant 0 : i32
    return %arg0, %c0_i32 : i32, i32
  }
  func.func @transform_1(%arg0: i32) -> (i32, i32) {
    %c0_i32 = arith.constant 0 : i32
    %c0_i32_0 = arith.constant 0 : i32
    %c0_i32_1 = arith.constant 0 : i32
    return %c0_i32, %c0_i32_0 : i32, i32
  }
  func.func @transform_2(%arg0: i32) -> (i32, i32) {
    %c0_i32 = arith.constant 0 : i32
    %c0_i32_0 = arith.constant 0 : i32
    %c0_i32_1 = arith.constant 0 : i32
    return %c0_i32, %c0_i32_0 : i32, i32
  }
  func.func @transform_3(%arg0: i32) -> (i32, i32) {
    %c0_i32 = arith.constant 0 : i32
    %c0_i32_0 = arith.constant 0 : i32
    return %arg0, %c0_i32 : i32, i32
  }
}

module attributes {stable_mosaic.version = 11 : i64} {
  func.func @_matmul_bias_act_kernel(%arg0: i32, %arg1: memref<256x384xbf16, #tpu.memory_space<vmem>>, %arg2: memref<384x128xbf16, #tpu.memory_space<vmem>>, %arg3: memref<1x128xf32, #tpu.memory_space<vmem>>, %arg4: memref<256x128xf32, #tpu.memory_space<vmem>>) attributes {dimension_semantics = [#tpu.dimension_semantics<parallel>], iteration_bounds = array<i64: 2>, scalar_prefetch = 0 : i64, scratch_operands = 0 : i64, tpu.core_type = #tpu.core_type<tc>, window_params = [{transform_indices = @transform_0, window_bounds = array<i64: 256, 384>}, {pipeline_mode = #tpu.pipeline_mode<synchronous>, transform_indices = @transform_1, window_bounds = array<i64: 384, 128>}, {pipeline_mode = #tpu.pipeline_mode<synchronous>, transform_indices = @transform_2, window_bounds = array<i64: 1, 128>}, {transform_indices = @transform_3, window_bounds = array<i64: 256, 128>}]} {
    %c0 = arith.constant 0 : index
    %c0_0 = arith.constant 0 : index
    %0 = vector.load %arg1[%c0, %c0_0] : memref<256x384xbf16, #tpu.memory_space<vmem>>, vector<256x384xbf16>
    %c0_1 = arith.constant 0 : index
    %c0_2 = arith.constant 0 : index
    %1 = vector.load %arg2[%c0_1, %c0_2] : memref<384x128xbf16, #tpu.memory_space<vmem>>, vector<384x128xbf16>
    %cst = arith.constant dense<0.000000e+00> : vector<256x128xf32>
    %2 = tpu.matmul %0, %1, %cst {dimension_numbers = #tpu.dot_dimension_numbers<[1], [0], [0], [1], [0, 0, 1, 1], [], []>} : vector<256x384xbf16>, vector<384x128xbf16>, vector<256x128xf32> -> vector<256x128xf32>
    %c0_3 = arith.constant 0 : index
    %c0_4 = arith.constant 0 : index
    %3 = vector.load %arg3[%c0_3, %c0_4] : memref<1x128xf32, #tpu.memory_space<vmem>>, vector<1x128xf32>
    %4 = vector.broadcast %3 : vector<1x128xf32> to vector<256x128xf32>
    %5 = arith.addf %2, %4 : vector<256x128xf32>
    %cst_5 = arith.constant 0.000000e+00 : f32
    %6 = vector.broadcast %cst_5 : f32 to vector<256x128xf32>
    %7 = arith.maximumf %5, %6 : vector<256x128xf32>
    %c0_6 = arith.constant 0 : index
    %c0_7 = arith.constant 0 : index
    %8 = vector.load %arg4[%c0_6, %c0_7] : memref<256x128xf32, #tpu.memory_space<vmem>>, vector<256x128xf32>
    tpu.vector_store %arg4[%c0_6, %c0_7], %7 {strides = array<i32>} : memref<256x128xf32, #tpu.memory_space<vmem>>, vector<256x128xf32>,
    return
  }
  func.func @transform_0(%arg0: i32) -> (i32, i32) {
    %c0_i32 = arith.constant 0 : i32
    %c0_i32_0 = arith.constant 0 : i32
    return %arg0, %c0_i32 : i32, i32
  }
  func.func @transform_1(%arg0: i32) -> (i32, i32) {
    %c0_i32 = arith.constant 0 : i32
    %c0_i32_0 = arith.constant 0 : i32
    %c0_i32_1 = arith.constant 0 : i32
    return %c0_i32, %c0_i32_0 : i32, i32
  }
  func.func @transform_2(%arg0: i32) -> (i32, i32) {
    %c0_i32 = arith.constant 0 : i32
    %c0_i32_0 = arith.constant 0 : i32
    %c0_i32_1 = arith.constant 0 : i32
    return %c0_i32, %c0_i32_0 : i32, i32
  }
  func.func @transform_3(%arg0: i32) -> (i32, i32) {
    %c0_i32 = arith.constant 0 : i32
    %c0_i32_0 = arith.constant 0 : i32
    return %arg0, %c0_i32 : i32, i32
  }
}

module attributes {stable_mosaic.version = 11 : i64} {
  func.func @_matmul_bias_act_kernel(%arg0: i32, %arg1: memref<256x384xbf16, #tpu.memory_space<vmem>>, %arg2: memref<384x128xbf16, #tpu.memory_space<vmem>>, %arg3: memref<1x128xf32, #tpu.memory_space<vmem>>, %arg4: memref<256x128xf32, #tpu.memory_space<vmem>>) attributes {dimension_semantics = [#tpu.dimension_semantics<parallel>], iteration_bounds = array<i64: 2>, scalar_prefetch = 0 : i64, scratch_operands = 0 : i64, tpu.core_type = #tpu.core_type<tc>, window_params = [{transform_indices = @transform_0, window_bounds = array<i64: 256, 384>}, {pipeline_mode = #tpu.pipeline_mode<synchronous>, transform_indices = @transform_1, window_bounds = array<i64: 384, 128>}, {pipeline_mode = #tpu.pipeline_mode<synchronous>, transform_indices = @transform_2, window_bounds = array<i64: 1, 128>}, {transform_indices = @transform_3, window_bounds = array<i64: 256, 128>}]} {
    %c0 = arith.constant 0 : index
    %c0_0 = arith.constant 0 : index
    %0 = vector.load %arg1[%c0, %c0_0] : memref<256x384xbf16, #tpu.memory_space<vmem>>, vector<256x384xbf16>
    %c0_1 = arith.constant 0 : index
    %c0_2 = arith.constant 0 : index
    %1 = vector.load %arg2[%c0_1, %c0_2] : memref<384x128xbf16, #tpu.memory_space<vmem>>, vector<384x128xbf16>
    %cst = arith.constant dense<0.000000e+00> : vector<256x128xf32>
    %2 = tpu.matmul %0, %1, %cst {dimension_numbers = #tpu.dot_dimension_numbers<[1], [0], [0], [1], [0, 0, 1, 1], [], []>} : vector<256x384xbf16>, vector<384x128xbf16>, vector<256x128xf32> -> vector<256x128xf32>
    %c0_3 = arith.constant 0 : index
    %c0_4 = arith.constant 0 : index
    %3 = vector.load %arg3[%c0_3, %c0_4] : memref<1x128xf32, #tpu.memory_space<vmem>>, vector<1x128xf32>
    %4 = vector.broadcast %3 : vector<1x128xf32> to vector<256x128xf32>
    %5 = arith.addf %2, %4 : vector<256x128xf32>
    %c0_5 = arith.constant 0 : index
    %c0_6 = arith.constant 0 : index
    %6 = vector.load %arg4[%c0_5, %c0_6] : memref<256x128xf32, #tpu.memory_space<vmem>>, vector<256x128xf32>
    tpu.vector_store %arg4[%c0_5, %c0_6], %5 {strides = array<i32>} : memref<256x128xf32, #tpu.memory_space<vmem>>, vector<256x128xf32>,
    return
  }
  func.func @transform_0(%arg0: i32) -> (i32, i32) {
    %c0_i32 = arith.constant 0 : i32
    %c0_i32_0 = arith.constant 0 : i32
    return %arg0, %c0_i32 : i32, i32
  }
  func.func @transform_1(%arg0: i32) -> (i32, i32) {
    %c0_i32 = arith.constant 0 : i32
    %c0_i32_0 = arith.constant 0 : i32
    %c0_i32_1 = arith.constant 0 : i32
    return %c0_i32, %c0_i32_0 : i32, i32
  }
  func.func @transform_2(%arg0: i32) -> (i32, i32) {
    %c0_i32 = arith.constant 0 : i32
    %c0_i32_0 = arith.constant 0 : i32
    %c0_i32_1 = arith.constant 0 : i32
    return %c0_i32, %c0_i32_0 : i32, i32
  }
  func.func @transform_3(%arg0: i32) -> (i32, i32) {
    %c0_i32 = arith.constant 0 : i32
    %c0_i32_0 = arith.constant 0 : i32
    return %arg0, %c0_i32 : i32, i32
  }
}

module attributes {stable_mosaic.version = 11 : i64} {
  func.func @_matmul_bias_act_kernel(%arg0: i32, %arg1: memref<256x128xbf16, #tpu.memory_space<vmem>>, %arg2: memref<128x128xbf16, #tpu.memory_space<vmem>>, %arg3: memref<1x128xf32, #tpu.memory_space<vmem>>, %arg4: memref<256x128xf32, #tpu.memory_space<vmem>>) attributes {dimension_semantics = [#tpu.dimension_semantics<parallel>], iteration_bounds = array<i64: 2>, scalar_prefetch = 0 : i64, scratch_operands = 0 : i64, tpu.core_type = #tpu.core_type<tc>, window_params = [{transform_indices = @transform_0, window_bounds = array<i64: 256, 128>}, {pipeline_mode = #tpu.pipeline_mode<synchronous>, transform_indices = @transform_1, window_bounds = array<i64: 128, 128>}, {pipeline_mode = #tpu.pipeline_mode<synchronous>, transform_indices = @transform_2, window_bounds = array<i64: 1, 128>}, {transform_indices = @transform_3, window_bounds = array<i64: 256, 128>}]} {
    %c0 = arith.constant 0 : index
    %c0_0 = arith.constant 0 : index
    %0 = vector.load %arg1[%c0, %c0_0] : memref<256x128xbf16, #tpu.memory_space<vmem>>, vector<256x128xbf16>
    %c0_1 = arith.constant 0 : index
    %c0_2 = arith.constant 0 : index
    %1 = vector.load %arg2[%c0_1, %c0_2] : memref<128x128xbf16, #tpu.memory_space<vmem>>, vector<128x128xbf16>
    %cst = arith.constant dense<0.000000e+00> : vector<256x128xf32>
    %2 = tpu.matmul %0, %1, %cst {dimension_numbers = #tpu.dot_dimension_numbers<[1], [0], [0], [1], [0, 0, 1, 1], [], []>} : vector<256x128xbf16>, vector<128x128xbf16>, vector<256x128xf32> -> vector<256x128xf32>
    %c0_3 = arith.constant 0 : index
    %c0_4 = arith.constant 0 : index
    %3 = vector.load %arg3[%c0_3, %c0_4] : memref<1x128xf32, #tpu.memory_space<vmem>>, vector<1x128xf32>
    %4 = vector.broadcast %3 : vector<1x128xf32> to vector<256x128xf32>
    %5 = arith.addf %2, %4 : vector<256x128xf32>
    %c0_5 = arith.constant 0 : index
    %c0_6 = arith.constant 0 : index
    %6 = vector.load %arg4[%c0_5, %c0_6] : memref<256x128xf32, #tpu.memory_space<vmem>>, vector<256x128xf32>
    tpu.vector_store %arg4[%c0_5, %c0_6], %5 {strides = array<i32>} : memref<256x128xf32, #tpu.memory_space<vmem>>, vector<256x128xf32>,
    return
  }
  func.func @transform_0(%arg0: i32) -> (i32, i32) {
    %c0_i32 = arith.constant 0 : i32
    %c0_i32_0 = arith.constant 0 : i32
    return %arg0, %c0_i32 : i32, i32
  }
  func.func @transform_1(%arg0: i32) -> (i32, i32) {
    %c0_i32 = arith.constant 0 : i32
    %c0_i32_0 = arith.constant 0 : i32
    %c0_i32_1 = arith.constant 0 : i32
    return %c0_i32, %c0_i32_0 : i32, i32
  }
  func.func @transform_2(%arg0: i32) -> (i32, i32) {
    %c0_i32 = arith.constant 0 : i32
    %c0_i32_0 = arith.constant 0 : i32
    %c0_i32_1 = arith.constant 0 : i32
    return %c0_i32, %c0_i32_0 : i32, i32
  }
  func.func @transform_3(%arg0: i32) -> (i32, i32) {
    %c0_i32 = arith.constant 0 : i32
    %c0_i32_0 = arith.constant 0 : i32
    return %arg0, %c0_i32 : i32, i32
  }
}

module attributes {stable_mosaic.version = 11 : i64} {
  func.func @_matmul_bias_act_kernel(%arg0: i32, %arg1: memref<128x384xbf16, #tpu.memory_space<vmem>>, %arg2: memref<384x128xbf16, #tpu.memory_space<vmem>>, %arg3: memref<1x128xf32, #tpu.memory_space<vmem>>, %arg4: memref<128x128xf32, #tpu.memory_space<vmem>>) attributes {dimension_semantics = [#tpu.dimension_semantics<parallel>], iteration_bounds = array<i64: 1>, scalar_prefetch = 0 : i64, scratch_operands = 0 : i64, tpu.core_type = #tpu.core_type<tc>, window_params = [{transform_indices = @transform_0, window_bounds = array<i64: 128, 384>}, {pipeline_mode = #tpu.pipeline_mode<synchronous>, transform_indices = @transform_1, window_bounds = array<i64: 384, 128>}, {pipeline_mode = #tpu.pipeline_mode<synchronous>, transform_indices = @transform_2, window_bounds = array<i64: 1, 128>}, {transform_indices = @transform_3, window_bounds = array<i64: 128, 128>}]} {
    %c0 = arith.constant 0 : index
    %c0_0 = arith.constant 0 : index
    %0 = vector.load %arg1[%c0, %c0_0] : memref<128x384xbf16, #tpu.memory_space<vmem>>, vector<128x384xbf16>
    %c0_1 = arith.constant 0 : index
    %c0_2 = arith.constant 0 : index
    %1 = vector.load %arg2[%c0_1, %c0_2] : memref<384x128xbf16, #tpu.memory_space<vmem>>, vector<384x128xbf16>
    %cst = arith.constant dense<0.000000e+00> : vector<128x128xf32>
    %2 = tpu.matmul %0, %1, %cst {dimension_numbers = #tpu.dot_dimension_numbers<[1], [0], [0], [1], [0, 0, 1, 1], [], []>} : vector<128x384xbf16>, vector<384x128xbf16>, vector<128x128xf32> -> vector<128x128xf32>
    %c0_3 = arith.constant 0 : index
    %c0_4 = arith.constant 0 : index
    %3 = vector.load %arg3[%c0_3, %c0_4] : memref<1x128xf32, #tpu.memory_space<vmem>>, vector<1x128xf32>
    %4 = vector.broadcast %3 : vector<1x128xf32> to vector<128x128xf32>
    %5 = arith.addf %2, %4 : vector<128x128xf32>
    %cst_5 = arith.constant 0.000000e+00 : f32
    %6 = vector.broadcast %cst_5 : f32 to vector<128x128xf32>
    %7 = arith.maximumf %5, %6 : vector<128x128xf32>
    %c0_6 = arith.constant 0 : index
    %c0_7 = arith.constant 0 : index
    %8 = vector.load %arg4[%c0_6, %c0_7] : memref<128x128xf32, #tpu.memory_space<vmem>>, vector<128x128xf32>
    tpu.vector_store %arg4[%c0_6, %c0_7], %7 {strides = array<i32>} : memref<128x128xf32, #tpu.memory_space<vmem>>, vector<128x128xf32>,
    return
  }
  func.func @transform_0(%arg0: i32) -> (i32, i32) {
    %c0_i32 = arith.constant 0 : i32
    %c0_i32_0 = arith.constant 0 : i32
    return %arg0, %c0_i32 : i32, i32
  }
  func.func @transform_1(%arg0: i32) -> (i32, i32) {
    %c0_i32 = arith.constant 0 : i32
    %c0_i32_0 = arith.constant 0 : i32
    %c0_i32_1 = arith.constant 0 : i32
    return %c0_i32, %c0_i32_0 : i32, i32
  }
  func.func @transform_2(%arg0: i32) -> (i32, i32) {
    %c0_i32 = arith.constant 0 : i32
    %c0_i32_0 = arith.constant 0 : i32
    %c0_i32_1 = arith.constant 0 : i32
    return %c0_i32, %c0_i32_0 : i32, i32
  }
  func.func @transform_3(%arg0: i32) -> (i32, i32) {
    %c0_i32 = arith.constant 0 : i32
    %c0_i32_0 = arith.constant 0 : i32
    return %arg0, %c0_i32 : i32, i32
  }
}

module attributes {stable_mosaic.version = 11 : i64} {
  func.func @_matmul_bias_act_kernel(%arg0: i32, %arg1: memref<128x384xbf16, #tpu.memory_space<vmem>>, %arg2: memref<384x128xbf16, #tpu.memory_space<vmem>>, %arg3: memref<1x128xf32, #tpu.memory_space<vmem>>, %arg4: memref<128x128xf32, #tpu.memory_space<vmem>>) attributes {dimension_semantics = [#tpu.dimension_semantics<parallel>], iteration_bounds = array<i64: 1>, scalar_prefetch = 0 : i64, scratch_operands = 0 : i64, tpu.core_type = #tpu.core_type<tc>, window_params = [{transform_indices = @transform_0, window_bounds = array<i64: 128, 384>}, {pipeline_mode = #tpu.pipeline_mode<synchronous>, transform_indices = @transform_1, window_bounds = array<i64: 384, 128>}, {pipeline_mode = #tpu.pipeline_mode<synchronous>, transform_indices = @transform_2, window_bounds = array<i64: 1, 128>}, {transform_indices = @transform_3, window_bounds = array<i64: 128, 128>}]} {
    %c0 = arith.constant 0 : index
    %c0_0 = arith.constant 0 : index
    %0 = vector.load %arg1[%c0, %c0_0] : memref<128x384xbf16, #tpu.memory_space<vmem>>, vector<128x384xbf16>
    %c0_1 = arith.constant 0 : index
    %c0_2 = arith.constant 0 : index
    %1 = vector.load %arg2[%c0_1, %c0_2] : memref<384x128xbf16, #tpu.memory_space<vmem>>, vector<384x128xbf16>
    %cst = arith.constant dense<0.000000e+00> : vector<128x128xf32>
    %2 = tpu.matmul %0, %1, %cst {dimension_numbers = #tpu.dot_dimension_numbers<[1], [0], [0], [1], [0, 0, 1, 1], [], []>} : vector<128x384xbf16>, vector<384x128xbf16>, vector<128x128xf32> -> vector<128x128xf32>
    %c0_3 = arith.constant 0 : index
    %c0_4 = arith.constant 0 : index
    %3 = vector.load %arg3[%c0_3, %c0_4] : memref<1x128xf32, #tpu.memory_space<vmem>>, vector<1x128xf32>
    %4 = vector.broadcast %3 : vector<1x128xf32> to vector<128x128xf32>
    %5 = arith.addf %2, %4 : vector<128x128xf32>
    %c0_5 = arith.constant 0 : index
    %c0_6 = arith.constant 0 : index
    %6 = vector.load %arg4[%c0_5, %c0_6] : memref<128x128xf32, #tpu.memory_space<vmem>>, vector<128x128xf32>
    tpu.vector_store %arg4[%c0_5, %c0_6], %5 {strides = array<i32>} : memref<128x128xf32, #tpu.memory_space<vmem>>, vector<128x128xf32>,
    return
  }
  func.func @transform_0(%arg0: i32) -> (i32, i32) {
    %c0_i32 = arith.constant 0 : i32
    %c0_i32_0 = arith.constant 0 : i32
    return %arg0, %c0_i32 : i32, i32
  }
  func.func @transform_1(%arg0: i32) -> (i32, i32) {
    %c0_i32 = arith.constant 0 : i32
    %c0_i32_0 = arith.constant 0 : i32
    %c0_i32_1 = arith.constant 0 : i32
    return %c0_i32, %c0_i32_0 : i32, i32
  }
  func.func @transform_2(%arg0: i32) -> (i32, i32) {
    %c0_i32 = arith.constant 0 : i32
    %c0_i32_0 = arith.constant 0 : i32
    %c0_i32_1 = arith.constant 0 : i32
    return %c0_i32, %c0_i32_0 : i32, i32
  }
  func.func @transform_3(%arg0: i32) -> (i32, i32) {
    %c0_i32 = arith.constant 0 : i32
    %c0_i32_0 = arith.constant 0 : i32
    return %arg0, %c0_i32 : i32, i32
  }
}

</mosaic_0001>

<bundles_post_ra>
// kernel: generalized_rcnn_forward.10
= control target key start
LH: loop header
LB: loop body
LE: loop exit
PB: predicated region body
PF: predicated region fallthrough
CT: control target
= control target key end

     0   :  { %s771_s12 = smov 0   ;;  %s905_s0 = inlined_call_operand.vmem [shape: bf16[512,128], index: 0, kind: input, shape index: {}]   ;;  %s906_s1 = inlined_call_operand.vmem [shape: bf16[128,128], index: 1, kind: input, shape index: {}]   ;;  %s907_s2 = inlined_call_operand.vmem [shape: f32[1,128], index: 2, kind: input, shape index: {}]   ;;  %s908_s3 = inlined_call_operand.vmem [shape: f32[512,128], index: 3, kind: output, shape index: {}]  }
   0x1 LB: > { %s579_s13 = sadd.s32 4294967295, %s749_s12   ;;  %p583_p0 = scmp.ge.s32.totalorder %s749_s12, 1  ;;  %s749_s12 = sphi %s771_s12, %s13_s12  }
   0x2   : > { %p138_p1 = scmp.lt.s32.totalorder %s749_s12, 3 }
   0x4   : > { %p139_p2 = pnand %p583_p0, %p138_p1 }
   0x5   : > { %s584_s22 = sshll.u32 (!%p139_p2), %s579_s13, 5 }
   0x6   : > { %142 = sbr.rel (%p139_p2) target bundleno = 238 (0xee), region = 32  ;;  %p163_p3 = scmp.lt.s32.totalorder (!%p139_p2), %s584_s22, 63 }
   0xb   : > { %v709_v0 = vld [vmem:[%s906_s1 + $0x38] sm:$0xff]  ;;  %v708_v1 = vld [vmem:[%s906_s1 + $0x30] sm:$0xff]  ;;  %v707_v2 = vld [vmem:[%s906_s1 + $0x28] sm:$0xff]  ;;  %s910_s22 = smov (!%p163_p3, %s584_s22), 63 }
   0xc   : > { %370 = vmatpush.bf16.msra.mxu0 %v709_v0  ;;  %710 = vmatpush.bf16.msra.mxu1 %v709_v0  ;;  %v706_v3 = vld [vmem:[%s906_s1 + $0x20] sm:$0xff]  ;;  %v705_v4 = vld [vmem:[%s906_s1 + $0x18] sm:$0xff]  ;;  %v704_v5 = vld [vmem:[%s906_s1 + $0x10] sm:$0xff]  ;;  %s585_s29 = sshll.u32 %s910_s22, 2  ;;  %s587_s10 = sshll.u32 %s910_s22, 3 }
   0xd   : > { %711 = vmatpush.bf16.msra.mxu2 %v709_v0  ;;  %712 = vmatpush.bf16.msra.mxu3 %v709_v0  ;;  %v703_v6 = vld [vmem:[%s906_s1 + $0x8] sm:$0xff]  ;;  %v702_v7 = vld [vmem:[%s906_s1] sm:$0xff]  ;;  %s809_s7 = scalar_lea.vmem %s905_s0, %s585_s29  ;;  %s838_s14 = scalar_lea.vmem %s908_s3, %s587_s10 }
   0xe   : > { %v686_v8 = vld [vmem:[%s809_s7] sm:$0xff]  ;;  %v687_v12 = vld [vmem:[%s809_s7 + $0x8] sm:$0xff]  ;;  %v688_v16 = vld [vmem:[%s809_s7 + $0x10] sm:$0xff] }
   0xf   : > { %v690_v9 = vld [vmem:[%s809_s7 + $0x20] sm:$0xff]  ;;  %v691_v13 = vld [vmem:[%s809_s7 + $0x28] sm:$0xff]  ;;  %v692_v17 = vld [vmem:[%s809_s7 + $0x30] sm:$0xff] }
  0x10   : > { %371 = vmatpush.bf16.msra.mxu0 %v708_v1  ;;  %713 = vmatpush.bf16.msra.mxu1 %v708_v1  ;;  %v694_v10 = vld [vmem:[%s809_s7 + $0x40] sm:$0xff]  ;;  %v695_v14 = vld [vmem:[%s809_s7 + $0x48] sm:$0xff]  ;;  %v696_v18 = vld [vmem:[%s809_s7 + $0x50] sm:$0xff] }
  0x11   : > { %714 = vmatpush.bf16.msra.mxu2 %v708_v1  ;;  %715 = vmatpush.bf16.msra.mxu3 %v708_v1  ;;  %v698_v11 = vld [vmem:[%s809_s7 + $0x60] sm:$0xff]  ;;  %v699_v15 = vld [vmem:[%s809_s7 + $0x68] sm:$0xff]  ;;  %v700_v19 = vld [vmem:[%s809_s7 + $0x70] sm:$0xff] }
  0x12   : > { %v689_v20 = vld [vmem:[%s809_s7 + $0x18] sm:$0xff]  ;;  %v830_v24 = vld [vmem:[%s907_s2] ss:$0 sm:$0xff] }
  0x13   : > { %v693_v21 = vld [vmem:[%s809_s7 + $0x38] sm:$0xff] }
  0x14   : > { %372 = vmatpush.bf16.msra.mxu0 %v707_v2  ;;  %716 = vmatpush.bf16.msra.mxu1 %v707_v2  ;;  %v697_v22 = vld [vmem:[%s809_s7 + $0x58] sm:$0xff] }
  0x15   : > { %717 = vmatpush.bf16.msra.mxu2 %v707_v2  ;;  %718 = vmatpush.bf16.msra.mxu3 %v707_v2  ;;  %v701_v23 = vld [vmem:[%s809_s7 + $0x78] sm:$0xff] }
  0x18   : > { %373 = vmatpush.bf16.msra.mxu0 %v706_v3  ;;  %719 = vmatpush.bf16.msra.mxu1 %v706_v3 }
  0x19   : > { %720 = vmatpush.bf16.msra.mxu2 %v706_v3  ;;  %721 = vmatpush.bf16.msra.mxu3 %v706_v3 }
  0x1c   : > { %374 = vmatpush.bf16.msra.mxu0 %v705_v4  ;;  %722 = vmatpush.bf16.msra.mxu1 %v705_v4 }
  0x1d   : > { %723 = vmatpush.bf16.msra.mxu2 %v705_v4  ;;  %724 = vmatpush.bf16.msra.mxu3 %v705_v4 }
  0x20   : > { %375 = vmatpush.bf16.msra.mxu0 %v704_v5  ;;  %725 = vmatpush.bf16.msra.mxu1 %v704_v5 }
  0x21   : > { %726 = vmatpush.bf16.msra.mxu2 %v704_v5  ;;  %727 = vmatpush.bf16.msra.mxu3 %v704_v5 }
  0x24   : > { %376 = vmatpush.bf16.msra.mxu0 %v703_v6  ;;  %728 = vmatpush.bf16.msra.mxu1 %v703_v6 }
  0x25   : > { %729 = vmatpush.bf16.msra.mxu2 %v703_v6  ;;  %730 = vmatpush.bf16.msra.mxu3 %v703_v6 }
  0x28   : > { %377 = vmatpush.bf16.msra.mxu0 %v702_v7  ;;  %731 = vmatpush.bf16.msra.mxu1 %v702_v7 }
  0x29   : > { %732 = vmatpush.bf16.msra.mxu2 %v702_v7  ;;  %733 = vmatpush.bf16.msra.mxu3 %v702_v7 }
  0x2b   : > { %378 = vmatmul.bf16.vlgmr.msra.gmra.mxu0 %v686_v8  ;;  %398 = vmatmul.bf16.vlgmr.msra.gmra.mxu1 %v690_v9 }
  0x2c   : > { %418 = vmatmul.bf16.vlgmr.msra.gmra.mxu2 %v694_v10  ;;  %438 = vmatmul.bf16.vlgmr.msra.gmra.mxu3 %v698_v11 }
  0x3b   : > { %383 = vmatmul.bf16.gmra.mxu0 %v687_v12  ;;  %403 = vmatmul.bf16.gmra.mxu1 %v691_v13 }
  0x3c   : > { %423 = vmatmul.bf16.gmra.mxu2 %v695_v14  ;;  %443 = vmatmul.bf16.gmra.mxu3 %v699_v15 }
  0x4b   : > { %388 = vmatmul.bf16.gmra.mxu0 %v688_v16  ;;  %408 = vmatmul.bf16.gmra.mxu1 %v692_v17 }
  0x4c   : > { %428 = vmatmul.bf16.gmra.mxu2 %v696_v18  ;;  %448 = vmatmul.bf16.gmra.mxu3 %v700_v19 }
  0x5b   : > { %393 = vmatmul.bf16.gmra.mxu0 %v689_v20  ;;  %413 = vmatmul.bf16.gmra.mxu1 %v693_v21 }
  0x5c   : > { %433 = vmatmul.bf16.gmra.mxu2 %v697_v22  ;;  %453 = vmatmul.bf16.gmra.mxu3 %v701_v23 }
  0xa8   : > { %v379_v25 = vpop.f32.mrf.mxu0  ;;  %v399_v26 = vpop.f32.mrf.mxu1 }
  0xa9   : > { %v380_v27 = vadd.f32 %v830_v24, %v379_v25  ;;  %v400_v28 = vadd.f32 %v830_v24, %v399_v26 }
  0xab   : > { %v459_v29 = vmax.f32 %v380_v27, 0.0  ;;  %v467_v30 = vmax.f32 %v400_v28, 0.0 }
  0xad   : > { %491 = vst [vmem:[%s838_s14] sm:$0xff] %v459_v29 }
  0xae   : > { %499 = vst [vmem:[%s838_s14 + $0x40] sm:$0xff] %v467_v30 }
  0xaf   : > { %v419_v31 = vpop.f32.mrf.mxu2  ;;  %v439_v32 = vpop.f32.mrf.mxu3 }
  0xb0   : > { %v420_v33 = vadd.f32 %v830_v24, %v419_v31  ;;  %v440_v34 = vadd.f32 %v830_v24, %v439_v32  ;;  %v381_v35 = vpop.f32.mrf.mxu0  ;;  %v401_v36 = vpop.f32.mrf.mxu1 }
  0xb1   : > { %v382_v37 = vadd.f32 %v830_v24, %v381_v35  ;;  %v402_v38 = vadd.f32 %v830_v24, %v401_v36 }
  0xb2   : > { %v475_v39 = vmax.f32 %v420_v33, 0.0  ;;  %v483_v40 = vmax.f32 %v440_v34, 0.0 }
  0xb3   : > { %v460_v41 = vmax.f32 %v382_v37, 0.0  ;;  %v468_v42 = vmax.f32 %v402_v38, 0.0 }
  0xb4   : > { %507 = vst [vmem:[%s838_s14 + $0x80] sm:$0xff] %v475_v39 }
  0xb5   : > { %515 = vst [vmem:[%s838_s14 + $0xc0] sm:$0xff] %v483_v40 }
  0xb6   : > { %492 = vst [vmem:[%s838_s14 + $0x8] sm:$0xff] %v460_v41 }
  0xb7   : > { %500 = vst [vmem:[%s838_s14 + $0x48] sm:$0xff] %v468_v42  ;;  %v421_v43 = vpop.f32.mrf.mxu2  ;;  %v441_v44 = vpop.f32.mrf.mxu3 }
  0xb8   : > { %v422_v45 = vadd.f32 %v830_v24, %v421_v43  ;;  %v442_v46 = vadd.f32 %v830_v24, %v441_v44  ;;  %v384_v47 = vpop.f32.mrf.mxu0  ;;  %v404_v48 = vpop.f32.mrf.mxu1 }
  0xb9   : > { %v385_v49 = vadd.f32 %v830_v24, %v384_v47  ;;  %v405_v50 = vadd.f32 %v830_v24, %v404_v48 }
  0xba   : > { %v476_v51 = vmax.f32 %v422_v45, 0.0  ;;  %v484_v52 = vmax.f32 %v442_v46, 0.0 }
  0xbb   : > { %v461_v53 = vmax.f32 %v385_v49, 0.0  ;;  %v469_v54 = vmax.f32 %v405_v50, 0.0 }
  0xbc   : > { %508 = vst [vmem:[%s838_s14 + $0x88] sm:$0xff] %v476_v51 }
  0xbd   : > { %516 = vst [vmem:[%s838_s14 + $0xc8] sm:$0xff] %v484_v52 }
  0xbe   : > { %493 = vst [vmem:[%s838_s14 + $0x10] sm:$0xff] %v461_v53 }
  0xbf   : > { %501 = vst [vmem:[%s838_s14 + $0x50] sm:$0xff] %v469_v54  ;;  %v424_v55 = vpop.f32.mrf.mxu2  ;;  %v444_v56 = vpop.f32.mrf.mxu3 }
  0xc0   : > { %v425_v57 = vadd.f32 %v830_v24, %v424_v55  ;;  %v445_v58 = vadd.f32 %v830_v24, %v444_v56  ;;  %v386_v59 = vpop.f32.mrf.mxu0  ;;  %v406_v60 = vpop.f32.mrf.mxu1 }
  0xc1   : > { %v387_v61 = vadd.f32 %v830_v24, %v386_v59  ;;  %v407_v62 = vadd.f32 %v830_v24, %v406_v60 }
  0xc2   : > { %v477_v63 = vmax.f32 %v425_v57, 0.0  ;;  %v485_v0 = vmax.f32 %v445_v58, 0.0 }
  0xc3   : > { %v462_v1 = vmax.f32 %v387_v61, 0.0  ;;  %v470_v2 = vmax.f32 %v407_v62, 0.0 }
  0xc4   : > { %509 = vst [vmem:[%s838_s14 + $0x90] sm:$0xff] %v477_v63 }
  0xc5   : > { %517 = vst [vmem:[%s838_s14 + $0xd0] sm:$0xff] %v485_v0 }
  0xc6   : > { %494 = vst [vmem:[%s838_s14 + $0x18] sm:$0xff] %v462_v1 }
  0xc7   : > { %502 = vst [vmem:[%s838_s14 + $0x58] sm:$0xff] %v470_v2  ;;  %v426_v3 = vpop.f32.mrf.mxu2  ;;  %v446_v4 = vpop.f32.mrf.mxu3 }
  0xc8   : > { %v427_v5 = vadd.f32 %v830_v24, %v426_v3  ;;  %v447_v6 = vadd.f32 %v830_v24, %v446_v4  ;;  %v389_v7 = vpop.f32.mrf.mxu0  ;;  %v409_v8 = vpop.f32.mrf.mxu1 }
  0xc9   : > { %v390_v9 = vadd.f32 %v830_v24, %v389_v7  ;;  %v410_v10 = vadd.f32 %v830_v24, %v409_v8 }
  0xca   : > { %v478_v11 = vmax.f32 %v427_v5, 0.0  ;;  %v486_v12 = vmax.f32 %v447_v6, 0.0 }
  0xcb   : > { %v463_v13 = vmax.f32 %v390_v9, 0.0  ;;  %v471_v14 = vmax.f32 %v410_v10, 0.0 }
  0xcc   : > { %510 = vst [vmem:[%s838_s14 + $0x98] sm:$0xff] %v478_v11 }
  0xcd   : > { %518 = vst [vmem:[%s838_s14 + $0xd8] sm:$0xff] %v486_v12 }
  0xce   : > { %495 = vst [vmem:[%s838_s14 + $0x20] sm:$0xff] %v463_v13 }
  0xcf   : > { %503 = vst [vmem:[%s838_s14 + $0x60] sm:$0xff] %v471_v14  ;;  %v429_v15 = vpop.f32.mrf.mxu2  ;;  %v449_v16 = vpop.f32.mrf.mxu3 }
  0xd0   : > { %v430_v17 = vadd.f32 %v830_v24, %v429_v15  ;;  %v450_v18 = vadd.f32 %v830_v24, %v449_v16  ;;  %v391_v19 = vpop.f32.mrf.mxu0  ;;  %v411_v20 = vpop.f32.mrf.mxu1 }
  0xd1   : > { %v392_v21 = vadd.f32 %v830_v24, %v391_v19  ;;  %v412_v22 = vadd.f32 %v830_v24, %v411_v20 }
  0xd2   : > { %v479_v23 = vmax.f32 %v430_v17, 0.0  ;;  %v487_v25 = vmax.f32 %v450_v18, 0.0 }
  0xd3   : > { %v464_v26 = vmax.f32 %v392_v21, 0.0  ;;  %v472_v27 = vmax.f32 %v412_v22, 0.0 }
  0xd4   : > { %511 = vst [vmem:[%s838_s14 + $0xa0] sm:$0xff] %v479_v23 }
  0xd5   : > { %519 = vst [vmem:[%s838_s14 + $0xe0] sm:$0xff] %v487_v25 }
  0xd6   : > { %496 = vst [vmem:[%s838_s14 + $0x28] sm:$0xff] %v464_v26 }
  0xd7   : > { %504 = vst [vmem:[%s838_s14 + $0x68] sm:$0xff] %v472_v27  ;;  %v431_v28 = vpop.f32.mrf.mxu2  ;;  %v451_v29 = vpop.f32.mrf.mxu3 }
  0xd8   : > { %v432_v30 = vadd.f32 %v830_v24, %v431_v28  ;;  %v452_v31 = vadd.f32 %v830_v24, %v451_v29  ;;  %v394_v32 = vpop.f32.mrf.mxu0  ;;  %v414_v33 = vpop.f32.mrf.mxu1 }
  0xd9   : > { %v395_v34 = vadd.f32 %v830_v24, %v394_v32  ;;  %v415_v35 = vadd.f32 %v830_v24, %v414_v33 }
  0xda   : > { %v480_v36 = vmax.f32 %v432_v30, 0.0  ;;  %v488_v37 = vmax.f32 %v452_v31, 0.0 }
  0xdb   : > { %v465_v38 = vmax.f32 %v395_v34, 0.0  ;;  %v473_v39 = vmax.f32 %v415_v35, 0.0 }
  0xdc   : > { %512 = vst [vmem:[%s838_s14 + $0xa8] sm:$0xff] %v480_v36 }
  0xdd   : > { %520 = vst [vmem:[%s838_s14 + $0xe8] sm:$0xff] %v488_v37 }
  0xde   : > { %497 = vst [vmem:[%s838_s14 + $0x30] sm:$0xff] %v465_v38 }
  0xdf   : > { %505 = vst [vmem:[%s838_s14 + $0x70] sm:$0xff] %v473_v39  ;;  %v434_v40 = vpop.f32.mrf.mxu2  ;;  %v454_v41 = vpop.f32.mrf.mxu3 }
  0xe0   : > { %v435_v42 = vadd.f32 %v830_v24, %v434_v40  ;;  %v455_v43 = vadd.f32 %v830_v24, %v454_v41  ;;  %v396_v44 = vpop.f32.mrf.mxu0  ;;  %v416_v45 = vpop.f32.mrf.mxu1 }
  0xe1   : > { %v397_v46 = vadd.f32 %v830_v24, %v396_v44  ;;  %v417_v47 = vadd.f32 %v830_v24, %v416_v45 }
  0xe2   : > { %v481_v48 = vmax.f32 %v435_v42, 0.0  ;;  %v489_v49 = vmax.f32 %v455_v43, 0.0 }
  0xe3   : > { %v466_v50 = vmax.f32 %v397_v46, 0.0  ;;  %v474_v51 = vmax.f32 %v417_v47, 0.0 }
  0xe4   : > { %513 = vst [vmem:[%s838_s14 + $0xb0] sm:$0xff] %v481_v48 }
  0xe5   : > { %521 = vst [vmem:[%s838_s14 + $0xf0] sm:$0xff] %v489_v49 }
  0xe6   : > { %498 = vst [vmem:[%s838_s14 + $0x38] sm:$0xff] %v466_v50 }
  0xe7   : > { %506 = vst [vmem:[%s838_s14 + $0x78] sm:$0xff] %v474_v51  ;;  %v436_v52 = vpop.f32.mrf.mxu2  ;;  %v456_v53 = vpop.f32.mrf.mxu3 }
  0xe8   : > { %v437_v54 = vadd.f32 %v830_v24, %v436_v52  ;;  %v457_v55 = vadd.f32 %v830_v24, %v456_v53 }
  0xea   : > { %v482_v56 = vmax.f32 %v437_v54, 0.0  ;;  %v490_v57 = vmax.f32 %v457_v55, 0.0 }
  0xec   : > { %514 = vst [vmem:[%s838_s14 + $0xb8] sm:$0xff] %v482_v56 }
  0xed   : > { %522 = vst [vmem:[%s838_s14 + $0xf8] sm:$0xff] %v490_v57 }
  0xee PF: > { %s13_s12 = sadd.s32 1, %s749_s12  }
  0xef   : > { %p10_p4 = scmp.ge.s32.totalorder %s13_s12, 4  }
  0xf1   :  { %12 = sbr.rel (!%p10_p4) target bundleno = 1 (0x1), region = 62 }

// kernel: generalized_rcnn_forward.17
= control target key start
LH: loop header
LB: loop body
LE: loop exit
PB: predicated region body
PF: predicated region fallthrough
CT: control target
= control target key end

     0   :  { %s1513_s12 = smov 0   ;;  %s1871_s0 = inlined_call_operand.vmem [shape: bf16[512,384], index: 0, kind: input, shape index: {}]   ;;  %s1872_s1 = inlined_call_operand.vmem [shape: bf16[384,128], index: 1, kind: input, shape index: {}]   ;;  %s1873_s2 = inlined_call_operand.vmem [shape: f32[1,128], index: 2, kind: input, shape index: {}]   ;;  %s1874_s3 = inlined_call_operand.vmem [shape: f32[512,128], index: 3, kind: output, shape index: {}]  }
   0x1 LB: > { %s1080_s13 = sadd.s32 4294967295, %s1491_s12   ;;  %p1084_p0 = scmp.ge.s32.totalorder %s1491_s12, 1  ;;  %s1491_s12 = sphi %s1513_s12, %s13_s12  }
   0x2   : > { %p139_p1 = scmp.lt.s32.totalorder %s1491_s12, 3 }
   0x4   : > { %p140_p2 = pnand %p1084_p0, %p139_p1 }
   0x5   : > { %s1085_s5 = sshll.u32 (!%p140_p2), %s1080_s13, 5 }
   0x6   : > { %143 = sbr.rel (%p140_p2) target bundleno = 366 (0x16e), region = 32  ;;  %p165_p3 = scmp.lt.s32.totalorder (!%p140_p2), %s1085_s5, 63 }
   0xb   : > { %v1434_v0 = vld [vmem:[%s1872_s1 + $0x38] sm:$0xff]  ;;  %v1433_v3 = vld [vmem:[%s1872_s1 + $0x30] sm:$0xff]  ;;  %v1432_v6 = vld [vmem:[%s1872_s1 + $0x28] sm:$0xff]  ;;  %s1876_s5 = smov (!%p165_p3, %s1085_s5), 63 }
   0xc   : > { %v1527_v1 = vld [vmem:[%s1872_s1 + $0x78] sm:$0xff]  ;;  %693 = vmatpush.bf16.msra.mxu0 %v1434_v0  ;;  %1451 = vmatpush.bf16.msra.mxu3 %v1434_v0  ;;  %v1542_v4 = vld [vmem:[%s1872_s1 + $0x70] sm:$0xff]  ;;  %v1557_v7 = vld [vmem:[%s1872_s1 + $0x68] sm:$0xff]  ;;  %s1475_s21 = smul.u32 12, %s1876_s5  ;;  %s1088_s18 = sshll.u32 %s1876_s5, 3 }
   0xd   : > { %v1532_v2 = vld [vmem:[%s1872_s1 + $0xb8] sm:$0xff]  ;;  %782 = vmatpush.bf16.msra.mxu1 %v1527_v1  ;;  %v1547_v5 = vld [vmem:[%s1872_s1 + $0xb0] sm:$0xff]  ;;  %v1562_v8 = vld [vmem:[%s1872_s1 + $0xa8] sm:$0xff] }
   0xe   : > { %871 = vmatpush.bf16.msra.mxu2 %v1532_v2  ;;  %v1431_v9 = vld [vmem:[%s1872_s1 + $0x20] sm:$0xff]  ;;  %v1430_v12 = vld [vmem:[%s1872_s1 + $0x18] sm:$0xff]  ;;  %v1429_v15 = vld [vmem:[%s1872_s1 + $0x10] sm:$0xff]  ;;  %s1613_s30 = scalar_lea.vmem %s1871_s0, %s1475_s21  ;;  %s1733_s21 = scalar_lea.vmem %s1874_s3, %s1088_s18 }
   0xf   : > { %v1572_v10 = vld [vmem:[%s1872_s1 + $0x60] sm:$0xff]  ;;  %v1438_v13 = vld [vmem:[%s1872_s1 + $0x58] sm:$0xff]  ;;  %v1437_v16 = vld [vmem:[%s1872_s1 + $0x50] sm:$0xff] }
  0x10   : > { %694 = vmatpush.bf16.msra.mxu0 %v1433_v3  ;;  %1452 = vmatpush.bf16.msra.mxu3 %v1433_v3  ;;  %v1577_v11 = vld [vmem:[%s1872_s1 + $0xa0] sm:$0xff]  ;;  %v1592_v14 = vld [vmem:[%s1872_s1 + $0x98] sm:$0xff]  ;;  %v1605_v17 = vld [vmem:[%s1872_s1 + $0x90] sm:$0xff] }
  0x11   : > { %783 = vmatpush.bf16.msra.mxu1 %v1542_v4  ;;  %v1428_v18 = vld [vmem:[%s1872_s1 + $0x8] sm:$0xff]  ;;  %v1427_v21 = vld [vmem:[%s1872_s1] sm:$0xff]  ;;  %v1093_v29 = vld [vmem:[%s1613_s30 + $0xc] sm:$0xf0] }
  0x12   : > { %872 = vmatpush.bf16.msra.mxu2 %v1547_v5  ;;  %v1436_v19 = vld [vmem:[%s1872_s1 + $0x48] sm:$0xff]  ;;  %v1435_v22 = vld [vmem:[%s1872_s1 + $0x40] sm:$0xff]  ;;  %v1381_v31 = vld [vmem:[%s1613_s30 + $0x10] sm:$0xf0] }
  0x13   : > { %v1622_v20 = vld [vmem:[%s1872_s1 + $0x88] sm:$0xff]  ;;  %v1633_v23 = vld [vmem:[%s1872_s1 + $0x80] sm:$0xff]  ;;  %v1103_v36 = vld [vmem:[%s1613_s30 + $0x18] sm:$0xf] }
  0x14   : > { %695 = vmatpush.bf16.msra.mxu0 %v1432_v6  ;;  %1453 = vmatpush.bf16.msra.mxu3 %v1432_v6  ;;  %v1091_v24 = vld [vmem:[%s1613_s30] sm:$0xf]  ;;  %v1380_v25 = vld [vmem:[%s1613_s30 + $0x8] sm:$0xf0]  ;;  %v1379_v28 = vld [vmem:[%s1613_s30 + $0x4] sm:$0xf] }
  0x15   : > { %784 = vmatpush.bf16.msra.mxu1 %v1557_v7  ;;  %v1235_v26 = vld [vmem:[%s1613_s30 + $0x120] sm:$0xf]  ;;  %v1416_v27 = vld [vmem:[%s1613_s30 + $0x128] sm:$0xf0]  ;;  %v1099_v30 = vld [vmem:[%s1613_s30 + $0x8] sm:$0xf]  ;;  %v1092_v32 = vor.u32 %v1380_v25, %v1091_v24  ;;  %v1096_v34 = vor.u32 %v1379_v28, %v1093_v29 }
  0x16   : > { %873 = vmatpush.bf16.msra.mxu2 %v1562_v8  ;;  %v1236_v33 = vor.u32 %v1416_v27, %v1235_v26  ;;  %v1100_v35 = vor.u32 %v1381_v31, %v1099_v30  ;;  %v1383_v37 = vld [vmem:[%s1613_s30 + $0x20] sm:$0xf0]  ;;  %v1247_v38 = vld [vmem:[%s1613_s30 + $0x138] sm:$0xf]  ;;  %v1382_v40 = vld [vmem:[%s1613_s30 + $0x1c] sm:$0xf] }
  0x17   : > { %v1419_v39 = vld [vmem:[%s1613_s30 + $0x140] sm:$0xf0]  ;;  %v1105_v41 = vld [vmem:[%s1613_s30 + $0x24] sm:$0xf0]  ;;  %v1111_v42 = vld [vmem:[%s1613_s30 + $0x20] sm:$0xf]  ;;  %v1104_v44 = vor.u32 %v1383_v37, %v1103_v36 }
  0x18   : > { %696 = vmatpush.bf16.msra.mxu0 %v1431_v9  ;;  %1454 = vmatpush.bf16.msra.mxu3 %v1431_v9  ;;  %v1384_v43 = vld [vmem:[%s1613_s30 + $0x28] sm:$0xf0]  ;;  %v1248_v45 = vor.u32 %v1419_v39, %v1247_v38  ;;  %v1108_v46 = vor.u32 %v1382_v40, %v1105_v41  ;;  %v1115_v48 = vld [vmem:[%s1613_s30 + $0x30] sm:$0xf]  ;;  %v1386_v49 = vld [vmem:[%s1613_s30 + $0x38] sm:$0xf0] }
  0x19   : > { %785 = vmatpush.bf16.msra.mxu1 %v1572_v10  ;;  %v1112_v47 = vor.u32 %v1384_v43, %v1111_v42  ;;  %v1259_v50 = vld [vmem:[%s1613_s30 + $0x150] sm:$0xf]  ;;  %v1422_v51 = vld [vmem:[%s1613_s30 + $0x158] sm:$0xf0]  ;;  %v1385_v52 = vld [vmem:[%s1613_s30 + $0x34] sm:$0xf]  ;;  %v1116_v56 = vor.u32 %v1386_v49, %v1115_v48 }
  0x1a   : > { %874 = vmatpush.bf16.msra.mxu2 %v1577_v11  ;;  %v1117_v53 = vld [vmem:[%s1613_s30 + $0x3c] sm:$0xf0]  ;;  %v1123_v54 = vld [vmem:[%s1613_s30 + $0x38] sm:$0xf]  ;;  %v1387_v55 = vld [vmem:[%s1613_s30 + $0x40] sm:$0xf0]  ;;  %v1260_v57 = vor.u32 %v1422_v51, %v1259_v50 }
  0x1b   : > { %v1120_v58 = vor.u32 %v1385_v52, %v1117_v53  ;;  %v1124_v59 = vor.u32 %v1387_v55, %v1123_v54  ;;  %v1127_v60 = vld [vmem:[%s1613_s30 + $0x48] sm:$0xf]  ;;  %v1389_v61 = vld [vmem:[%s1613_s30 + $0x50] sm:$0xf0]  ;;  %v1388_v0 = vld [vmem:[%s1613_s30 + $0x4c] sm:$0xf] }
  0x1c   : > { %697 = vmatpush.bf16.msra.mxu0 %v1430_v12  ;;  %1455 = vmatpush.bf16.msra.mxu3 %v1430_v12  ;;  %v1271_v62 = vld [vmem:[%s1613_s30 + $0x168] sm:$0xf]  ;;  %v1425_v63 = vld [vmem:[%s1613_s30 + $0x170] sm:$0xf0]  ;;  %v1390_v3 = vld [vmem:[%s1613_s30 + $0x58] sm:$0xf0] }
  0x1d   : > { %786 = vmatpush.bf16.msra.mxu1 %v1438_v13  ;;  %v1392_v9 = vld [vmem:[%s1613_s30 + $0x68] sm:$0xf0]  ;;  %v1237_v12 = vld [vmem:[%s1613_s30 + $0x12c] sm:$0xf0]  ;;  %v1418_v24 = vld [vmem:[%s1613_s30 + $0x13c] sm:$0xf] }
  0x1e   : > { %875 = vmatpush.bf16.msra.mxu2 %v1592_v14  ;;  %v1249_v25 = vld [vmem:[%s1613_s30 + $0x144] sm:$0xf0]  ;;  %v1159_v26 = vld [vmem:[%s1613_s30 + $0x80] sm:$0xf]  ;;  %v1396_v27 = vld [vmem:[%s1613_s30 + $0x88] sm:$0xf0] }
  0x1f   : > { %v1252_v29 = vor.u32 %v1418_v24, %v1249_v25  ;;  %v1160_v31 = vor.u32 %v1396_v27, %v1159_v26  ;;  %v1261_v36 = vld [vmem:[%s1613_s30 + $0x15c] sm:$0xf0]  ;;  %v1171_v38 = vld [vmem:[%s1613_s30 + $0x98] sm:$0xf]  ;;  %v1399_v39 = vld [vmem:[%s1613_s30 + $0xa0] sm:$0xf0] }
  0x20   : > { %698 = vmatpush.bf16.msra.mxu0 %v1429_v15  ;;  %1456 = vmatpush.bf16.msra.mxu3 %v1429_v15  ;;  %v1393_v15 = vld [vmem:[%s1613_s30 + $0x70] sm:$0xf0]  ;;  %v1165_v37 = vld [vmem:[%s1613_s30 + $0x9c] sm:$0xf0]  ;;  %v1172_v43 = vor.u32 %v1399_v39, %v1171_v38  ;;  %v1273_v48 = vld [vmem:[%s1613_s30 + $0x174] sm:$0xf0] }
  0x21   : > { %787 = vmatpush.bf16.msra.mxu1 %v1437_v16  ;;  %v1177_v49 = vld [vmem:[%s1613_s30 + $0xb4] sm:$0xf0]  ;;  %v1183_v50 = vld [vmem:[%s1613_s30 + $0xb0] sm:$0xf]  ;;  %v1402_v51 = vld [vmem:[%s1613_s30 + $0xb8] sm:$0xf0] }
  0x22   : > { %876 = vmatpush.bf16.msra.mxu2 %v1605_v17  ;;  %v1184_v55 = vor.u32 %v1402_v51, %v1183_v50  ;;  %v1408_v24 = vld [vmem:[%s1613_s30 + $0xe8] sm:$0xf0]  ;;  %v1219_v50 = vld [vmem:[%s1613_s30 + $0xf8] sm:$0xf]  ;;  %v1411_v51 = vld [vmem:[%s1613_s30 + $0x100] sm:$0xf0] }
  0x24   : > { %699 = vmatpush.bf16.msra.mxu0 %v1428_v18  ;;  %1457 = vmatpush.bf16.msra.mxu3 %v1428_v18 }
  0x25   : > { %788 = vmatpush.bf16.msra.mxu1 %v1436_v19 }
  0x26   : > { %877 = vmatpush.bf16.msra.mxu2 %v1622_v20 }
  0x28   : > { %700 = vmatpush.bf16.msra.mxu0 %v1427_v21  ;;  %1458 = vmatpush.bf16.msra.mxu3 %v1427_v21  ;;  %v1395_v21 = vld [vmem:[%s1613_s30 + $0x80] sm:$0xf0] }
  0x29   : > { %789 = vmatpush.bf16.msra.mxu1 %v1435_v22 }
  0x2a   : > { %878 = vmatpush.bf16.msra.mxu2 %v1633_v23 }
  0x2b   : > { %701 = vmatmul.bf16.vlgmr.msra.gmra.mxu0 %v1092_v32  ;;  %761 = vmatmul.bf16.vlgmr.msra.gmra.mxu3 %v1236_v33  ;;  %v1163_v32 = vld [vmem:[%s1613_s30 + $0x90] sm:$0xf]  ;;  %v1398_v33 = vld [vmem:[%s1613_s30 + $0x98] sm:$0xf0] }
  0x2c   : > { %1459 = vmatpush.bf16.msrb.mxu3 %v1527_v1  ;;  %790 = vmatmul.bf16.vlgmr.msra.gmra.mxu1 %v1096_v34  ;;  %v1129_v1 = vld [vmem:[%s1613_s30 + $0x54] sm:$0xf0]  ;;  %v1397_v34 = vld [vmem:[%s1613_s30 + $0x94] sm:$0xf]  ;;  %v1164_v40 = vor.u32 %v1398_v33, %v1163_v32 }
  0x2d   : > { %879 = vmatmul.bf16.vlgmr.msra.gmra.mxu2 %v1100_v35  ;;  %v1132_v6 = vor.u32 %v1388_v0, %v1129_v1  ;;  %v1421_v35 = vld [vmem:[%s1613_s30 + $0x154] sm:$0xf]  ;;  %v1168_v42 = vor.u32 %v1397_v34, %v1165_v37 }
  0x2e   : > { %v1264_v41 = vor.u32 %v1421_v35, %v1261_v36  ;;  %v1405_v0 = vld [vmem:[%s1613_s30 + $0xd0] sm:$0xf0] }
  0x30   : > { %1460 = vmatpush.bf16.msrb.mxu3 %v1542_v4  ;;  %v1128_v4 = vor.u32 %v1389_v61, %v1127_v60  ;;  %v1243_v60 = vld [vmem:[%s1613_s30 + $0x128] sm:$0xf]  ;;  %v1417_v61 = vld [vmem:[%s1613_s30 + $0x130] sm:$0xf0] }
  0x34   : > { %1461 = vmatpush.bf16.msrb.mxu3 %v1557_v7 }
  0x38   : > { %1462 = vmatpush.bf16.msrb.mxu3 %v1572_v10  ;;  %v1391_v10 = vld [vmem:[%s1613_s30 + $0x64] sm:$0xf] }
  0x3b   : > { %706 = vmatmul.bf16.gmra.mxu0 %v1104_v44  ;;  %766 = vmatmul.bf16.gmra.mxu3 %v1248_v45  ;;  %v1175_v44 = vld [vmem:[%s1613_s30 + $0xa8] sm:$0xf]  ;;  %v1401_v45 = vld [vmem:[%s1613_s30 + $0xb0] sm:$0xf0] }
  0x3c   : > { %1463 = vmatpush.bf16.msrb.mxu3 %v1438_v13  ;;  %795 = vmatmul.bf16.gmra.mxu1 %v1108_v46  ;;  %v1141_v13 = vld [vmem:[%s1613_s30 + $0x6c] sm:$0xf0]  ;;  %v1400_v46 = vld [vmem:[%s1613_s30 + $0xac] sm:$0xf]  ;;  %v1176_v52 = vor.u32 %v1401_v45, %v1175_v44  ;;  %v1410_v45 = vld [vmem:[%s1613_s30 + $0xf8] sm:$0xf0] }
  0x3d   : > { %884 = vmatmul.bf16.gmra.mxu2 %v1112_v47  ;;  %v1144_v18 = vor.u32 %v1391_v10, %v1141_v13  ;;  %v1424_v47 = vld [vmem:[%s1613_s30 + $0x16c] sm:$0xf]  ;;  %v1180_v54 = vor.u32 %v1400_v46, %v1177_v49  ;;  %v1211_v44 = vld [vmem:[%s1613_s30 + $0xf0] sm:$0xf]  ;;  %v1409_v46 = vld [vmem:[%s1613_s30 + $0xf4] sm:$0xf] }
  0x3e   : > { %v1276_v53 = vor.u32 %v1424_v47, %v1273_v48  ;;  %v1267_v47 = vld [vmem:[%s1613_s30 + $0x158] sm:$0xf]  ;;  %v1423_v48 = vld [vmem:[%s1613_s30 + $0x160] sm:$0xf0]  ;;  %v1213_v49 = vld [vmem:[%s1613_s30 + $0xfc] sm:$0xf0] }
  0x40   : > { %1464 = vmatpush.bf16.msrb.mxu3 %v1437_v16 }
  0x44   : > { %1465 = vmatpush.bf16.msrb.mxu3 %v1436_v19 }
  0x48   : > { %1466 = vmatpush.bf16.msrb.mxu3 %v1435_v22  ;;  %v1394_v22 = vld [vmem:[%s1613_s30 + $0x7c] sm:$0xf] }
  0x4b   : > { %711 = vmatmul.bf16.gmra.mxu0 %v1116_v56  ;;  %771 = vmatmul.bf16.gmra.mxu3 %v1260_v57  ;;  %v1716_v56 = vld [vmem:[%s1873_s2] ss:$0 sm:$0xff] }
  0x4c   : > { %1467 = vmatpush.bf16.msra.mxu3 %v1532_v2  ;;  %800 = vmatmul.bf16.gmra.mxu1 %v1120_v58  ;;  %v1135_v2 = vld [vmem:[%s1613_s30 + $0x50] sm:$0xf]  ;;  %v1187_v57 = vld [vmem:[%s1613_s30 + $0xc0] sm:$0xf]  ;;  %v1404_v58 = vld [vmem:[%s1613_s30 + $0xc8] sm:$0xf0] }
  0x4d   : > { %889 = vmatmul.bf16.gmra.mxu2 %v1124_v59  ;;  %v1136_v7 = vor.u32 %v1390_v3, %v1135_v2  ;;  %v1403_v59 = vld [vmem:[%s1613_s30 + $0xc4] sm:$0xf]  ;;  %v1188_v1 = vor.u32 %v1404_v58, %v1187_v57  ;;  %v1244_v2 = vor.u32 %v1417_v61, %v1243_v60  ;;  %v1268_v57 = vor.u32 %v1423_v48, %v1267_v47 }
  0x4e   : > { %v1216_v60 = vor.u32 %v1409_v46, %v1213_v49  ;;  %v1220_v61 = vor.u32 %v1411_v51, %v1219_v50 }
  0x50   : > { %1468 = vmatpush.bf16.msra.mxu3 %v1547_v5  ;;  %v1272_v5 = vor.u32 %v1425_v63, %v1271_v62  ;;  %v1189_v62 = vld [vmem:[%s1613_s30 + $0xcc] sm:$0xf0]  ;;  %v1195_v63 = vld [vmem:[%s1613_s30 + $0xc8] sm:$0xf] }
  0x54   : > { %1469 = vmatpush.bf16.msra.mxu3 %v1562_v8  ;;  %v1139_v8 = vld [vmem:[%s1613_s30 + $0x60] sm:$0xf] }
  0x55   : > { %v1140_v16 = vor.u32 %v1392_v9, %v1139_v8 }
  0x58   : > { %1470 = vmatpush.bf16.msra.mxu3 %v1577_v11  ;;  %v1415_v11 = vld [vmem:[%s1613_s30 + $0x124] sm:$0xf] }
  0x5b   : > { %716 = vmatmul.bf16.gmra.mxu0 %v1128_v4  ;;  %776 = vmatmul.bf16.gmra.mxu3 %v1272_v5  ;;  %v1192_v4 = vor.u32 %v1403_v59, %v1189_v62  ;;  %v1196_v5 = vor.u32 %v1405_v0, %v1195_v63 }
  0x5c   : > { %1471 = vmatpush.bf16.msra.mxu3 %v1592_v14  ;;  %805 = vmatmul.bf16.gmra.mxu1 %v1132_v6  ;;  %v1147_v14 = vld [vmem:[%s1613_s30 + $0x68] sm:$0xf] }
  0x5d   : > { %894 = vmatmul.bf16.gmra.mxu2 %v1136_v7  ;;  %v1148_v19 = vor.u32 %v1393_v15, %v1147_v14 }
  0x60   : > { %1472 = vmatpush.bf16.msra.mxu3 %v1605_v17  ;;  %v1240_v17 = vor.u32 %v1415_v11, %v1237_v12 }
  0x64   : > { %1473 = vmatpush.bf16.msra.mxu3 %v1622_v20  ;;  %v1151_v20 = vld [vmem:[%s1613_s30 + $0x78] sm:$0xf] }
  0x65   : > { %v1152_v28 = vor.u32 %v1395_v21, %v1151_v20  ;;  %v1420_v20 = vld [vmem:[%s1613_s30 + $0x148] sm:$0xf0]  ;;  %v1201_v21 = vld [vmem:[%s1613_s30 + $0xe4] sm:$0xf0] }
  0x68   : > { %1474 = vmatpush.bf16.msra.mxu3 %v1633_v23  ;;  %v1153_v23 = vld [vmem:[%s1613_s30 + $0x84] sm:$0xf0] }
  0x69   : > { %v1156_v30 = vor.u32 %v1394_v22, %v1153_v23  ;;  %v1207_v22 = vld [vmem:[%s1613_s30 + $0xe0] sm:$0xf] }
  0x6a   : > { %v1208_v32 = vor.u32 %v1408_v24, %v1207_v22 }
  0x6b   : > { %721 = vmatmul.bf16.gmra.mxu0 %v1140_v16  ;;  %850 = vmatmul.bf16.vlgmr.msrb.gmra.mxu3 %v1240_v17  ;;  %v1199_v16 = vld [vmem:[%s1613_s30 + $0xd8] sm:$0xf]  ;;  %v1407_v17 = vld [vmem:[%s1613_s30 + $0xe0] sm:$0xf0] }
  0x6c   : > { %810 = vmatmul.bf16.gmra.mxu1 %v1144_v18  ;;  %v1406_v18 = vld [vmem:[%s1613_s30 + $0xdc] sm:$0xf]  ;;  %v1200_v27 = vor.u32 %v1407_v17, %v1199_v16  ;;  %v1231_v16 = vld [vmem:[%s1613_s30 + $0x110] sm:$0xf] }
  0x6d   : > { %899 = vmatmul.bf16.gmra.mxu2 %v1148_v19  ;;  %v1255_v19 = vld [vmem:[%s1613_s30 + $0x140] sm:$0xf]  ;;  %v1414_v17 = vld [vmem:[%s1613_s30 + $0x118] sm:$0xf0] }
  0x7b   : > { %726 = vmatmul.bf16.gmra.mxu0 %v1152_v28  ;;  %855 = vmatmul.bf16.gmra.mxu3 %v1252_v29  ;;  %v1256_v28 = vor.u32 %v1420_v20, %v1255_v19 }
  0x7c   : > { %815 = vmatmul.bf16.gmra.mxu1 %v1156_v30 }
  0x7d   : > { %904 = vmatmul.bf16.gmra.mxu2 %v1160_v31  ;;  %v1204_v31 = vor.u32 %v1406_v18, %v1201_v21 }
  0x8b   : > { %731 = vmatmul.bf16.gmra.mxu0 %v1164_v40  ;;  %860 = vmatmul.bf16.gmra.mxu3 %v1264_v41 }
  0x8c   : > { %820 = vmatmul.bf16.gmra.mxu1 %v1168_v42 }
  0x8d   : > { %909 = vmatmul.bf16.gmra.mxu2 %v1172_v43 }
  0x9b   : > { %736 = vmatmul.bf16.gmra.mxu0 %v1176_v52  ;;  %865 = vmatmul.bf16.gmra.mxu3 %v1276_v53 }
  0x9c   : > { %825 = vmatmul.bf16.gmra.mxu1 %v1180_v54 }
  0x9d   : > { %914 = vmatmul.bf16.gmra.mxu2 %v1184_v55  ;;  %v1212_v55 = vor.u32 %v1410_v45, %v1211_v44 }
  0xa8   : > { %v702_v3 = vpop.f32.mrf.mxu0 }
  0xa9   : > { %v703_v6 = vadd.f32 %v1716_v56, %v702_v3  ;;  %v791_v7 = vpop.f32.mrf.mxu1 }
  0xab   : > { %741 = vmatmul.bf16.gmra.mxu0 %v1188_v1  ;;  %939 = vmatmul.bf16.vlgmr.msra.gmra.mxu3 %v1244_v2  ;;  %v792_v8 = vadd.f32 %v791_v7, %v703_v6 }
  0xac   : > { %830 = vmatmul.bf16.gmra.mxu1 %v1192_v4 }
  0xad   : > { %919 = vmatmul.bf16.gmra.mxu2 %v1196_v5 }
  0xae   : > { %v1727_v9 = vpop.f32.mrf.mxu3 }
  0xb0   : > { %v880_v10 = vpop.f32.mrf.mxu2  ;;  %v704_v12 = vpop.f32.mrf.mxu0 }
  0xb1   : > { %v881_v11 = vadd.f32 %v880_v10, %v792_v8  ;;  %v793_v13 = vpop.f32.mrf.mxu1  ;;  %v705_v15 = vadd.f32 %v1716_v56, %v704_v12  ;;  %v1223_v10 = vld [vmem:[%s1613_s30 + $0x108] sm:$0xf]  ;;  %v1412_v12 = vld [vmem:[%s1613_s30 + $0x10c] sm:$0xf] }
  0xb3   : > { %v960_v14 = vmax.f32 %v881_v11, 0.0  ;;  %v794_v25 = vadd.f32 %v793_v13, %v705_v15  ;;  %v1413_v11 = vld [vmem:[%s1613_s30 + $0x110] sm:$0xf0]  ;;  %v1279_v13 = vld [vmem:[%s1613_s30 + $0x170] sm:$0xf] }
  0xb4   : > { %v1225_v15 = vld [vmem:[%s1613_s30 + $0x114] sm:$0xf0]  ;;  %v1224_v21 = vor.u32 %v1413_v11, %v1223_v10 }
  0xb5   : > { %992 = vst [vmem:[%s1733_s21] sm:$0xff] %v960_v14  ;;  %v1426_v14 = vld [vmem:[%s1613_s30 + $0x178] sm:$0xf0] }
  0xb6   : > { %v1745_v23 = vpop.f32.mrf.mxu3  ;;  %v1280_v22 = vor.u32 %v1426_v14, %v1279_v13 }
  0xb8   : > { %v882_v26 = vpop.f32.mrf.mxu2  ;;  %v707_v30 = vpop.f32.mrf.mxu0 }
  0xb9   : > { %v883_v29 = vadd.f32 %v882_v26, %v794_v25  ;;  %v708_v33 = vadd.f32 %v1716_v56, %v707_v30  ;;  %v796_v34 = vpop.f32.mrf.mxu1  ;;  %v1228_v26 = vor.u32 %v1412_v12, %v1225_v15 }
  0xbb   : > { %v961_v35 = vmax.f32 %v883_v29, 0.0  ;;  %746 = vmatmul.bf16.gmra.mxu0 %v1200_v27  ;;  %944 = vmatmul.bf16.gmra.mxu3 %v1256_v28  ;;  %v797_v36 = vadd.f32 %v796_v34, %v708_v33  ;;  %v1232_v27 = vor.u32 %v1414_v17, %v1231_v16 }
  0xbc   : > { %835 = vmatmul.bf16.gmra.mxu1 %v1204_v31 }
  0xbd   : > { %993 = vst [vmem:[%s1733_s21 + $0x8] sm:$0xff] %v961_v35  ;;  %924 = vmatmul.bf16.gmra.mxu2 %v1208_v32 }
  0xbe   : > { %v1749_v37 = vpop.f32.mrf.mxu3 }
  0xc0   : > { %v885_v38 = vpop.f32.mrf.mxu2  ;;  %v709_v40 = vpop.f32.mrf.mxu0 }
  0xc1   : > { %v886_v39 = vadd.f32 %v885_v38, %v797_v36  ;;  %v798_v41 = vpop.f32.mrf.mxu1  ;;  %v710_v43 = vadd.f32 %v1716_v56, %v709_v40 }
  0xc3   : > { %v962_v42 = vmax.f32 %v886_v39, 0.0  ;;  %v799_v52 = vadd.f32 %v798_v41, %v710_v43 }
  0xc5   : > { %994 = vst [vmem:[%s1733_s21 + $0x10] sm:$0xff] %v962_v42 }
  0xc6   : > { %v1761_v53 = vpop.f32.mrf.mxu3 }
  0xc8   : > { %v887_v54 = vpop.f32.mrf.mxu2  ;;  %v712_v59 = vpop.f32.mrf.mxu0 }
  0xc9   : > { %v888_v58 = vadd.f32 %v887_v54, %v799_v52  ;;  %v713_v62 = vadd.f32 %v1716_v56, %v712_v59  ;;  %v801_v63 = vpop.f32.mrf.mxu1 }
  0xcb   : > { %v963_v0 = vmax.f32 %v888_v58, 0.0  ;;  %751 = vmatmul.bf16.gmra.mxu0 %v1212_v55  ;;  %949 = vmatmul.bf16.gmra.mxu3 %v1268_v57  ;;  %v802_v1 = vadd.f32 %v801_v63, %v713_v62 }
  0xcc   : > { %840 = vmatmul.bf16.gmra.mxu1 %v1216_v60 }
  0xcd   : > { %995 = vst [vmem:[%s1733_s21 + $0x18] sm:$0xff] %v963_v0  ;;  %929 = vmatmul.bf16.gmra.mxu2 %v1220_v61 }
  0xce   : > { %v1765_v2 = vpop.f32.mrf.mxu3 }
  0xd0   : > { %v890_v3 = vpop.f32.mrf.mxu2  ;;  %v714_v5 = vpop.f32.mrf.mxu0 }
  0xd1   : > { %v891_v4 = vadd.f32 %v890_v3, %v802_v1  ;;  %v803_v6 = vpop.f32.mrf.mxu1  ;;  %v715_v8 = vadd.f32 %v1716_v56, %v714_v5 }
  0xd3   : > { %v964_v7 = vmax.f32 %v891_v4, 0.0  ;;  %v804_v18 = vadd.f32 %v803_v6, %v715_v8 }
  0xd5   : > { %996 = vst [vmem:[%s1733_s21 + $0x20] sm:$0xff] %v964_v7 }
  0xd6   : > { %v1777_v19 = vpop.f32.mrf.mxu3 }
  0xd8   : > { %v892_v20 = vpop.f32.mrf.mxu2  ;;  %v717_v25 = vpop.f32.mrf.mxu0 }
  0xd9   : > { %v893_v24 = vadd.f32 %v892_v20, %v804_v18  ;;  %v718_v28 = vadd.f32 %v1716_v56, %v717_v25  ;;  %v806_v29 = vpop.f32.mrf.mxu1 }
  0xdb   : > { %v965_v30 = vmax.f32 %v893_v24, 0.0  ;;  %756 = vmatmul.bf16.gmra.mxu0 %v1224_v21  ;;  %954 = vmatmul.bf16.gmra.mxu3 %v1280_v22  ;;  %v807_v31 = vadd.f32 %v806_v29, %v718_v28 }
  0xdc   : > { %845 = vmatmul.bf16.gmra.mxu1 %v1228_v26 }
  0xdd   : > { %997 = vst [vmem:[%s1733_s21 + $0x28] sm:$0xff] %v965_v30  ;;  %934 = vmatmul.bf16.gmra.mxu2 %v1232_v27 }
  0xde   : > { %v1781_v32 = vpop.f32.mrf.mxu3 }
  0xe0   : > { %v895_v33 = vpop.f32.mrf.mxu2  ;;  %v719_v35 = vpop.f32.mrf.mxu0 }
  0xe1   : > { %v896_v34 = vadd.f32 %v895_v33, %v807_v31  ;;  %v808_v36 = vpop.f32.mrf.mxu1  ;;  %v720_v39 = vadd.f32 %v1716_v56, %v719_v35 }
  0xe3   : > { %v966_v38 = vmax.f32 %v896_v34, 0.0  ;;  %v809_v40 = vadd.f32 %v808_v36, %v720_v39 }
  0xe5   : > { %998 = vst [vmem:[%s1733_s21 + $0x30] sm:$0xff] %v966_v38 }
  0xe6   : > { %v1785_v41 = vpop.f32.mrf.mxu3 }
  0xe8   : > { %v897_v42 = vpop.f32.mrf.mxu2  ;;  %v722_v44 = vpop.f32.mrf.mxu0 }
  0xe9   : > { %v898_v43 = vadd.f32 %v897_v42, %v809_v40  ;;  %v723_v45 = vadd.f32 %v1716_v56, %v722_v44  ;;  %v811_v46 = vpop.f32.mrf.mxu1 }
  0xeb   : > { %v967_v47 = vmax.f32 %v898_v43, 0.0  ;;  %v812_v48 = vadd.f32 %v811_v46, %v723_v45 }
  0xed   : > { %999 = vst [vmem:[%s1733_s21 + $0x38] sm:$0xff] %v967_v47 }
  0xee   : > { %v1789_v49 = vpop.f32.mrf.mxu3 }
  0xf0   : > { %v900_v50 = vpop.f32.mrf.mxu2  ;;  %v724_v52 = vpop.f32.mrf.mxu0 }
  0xf1   : > { %v901_v51 = vadd.f32 %v900_v50, %v812_v48  ;;  %v813_v54 = vpop.f32.mrf.mxu1  ;;  %v725_v57 = vadd.f32 %v1716_v56, %v724_v52 }
  0xf3   : > { %v968_v55 = vmax.f32 %v901_v51, 0.0  ;;  %v814_v58 = vadd.f32 %v813_v54, %v725_v57 }
  0xf5   : > { %1000 = vst [vmem:[%s1733_s21 + $0x40] sm:$0xff] %v968_v55 }
  0xf6   : > { %v1793_v59 = vpop.f32.mrf.mxu3 }
  0xf8   : > { %v902_v60 = vpop.f32.mrf.mxu2  ;;  %v727_v62 = vpop.f32.mrf.mxu0 }
  0xf9   : > { %v903_v61 = vadd.f32 %v902_v60, %v814_v58  ;;  %v728_v63 = vadd.f32 %v1716_v56, %v727_v62  ;;  %v816_v0 = vpop.f32.mrf.mxu1 }
  0xfb   : > { %v969_v1 = vmax.f32 %v903_v61, 0.0  ;;  %v817_v3 = vadd.f32 %v816_v0, %v728_v63  ;;  %v763_v61 = vadd.f32 %v1716_v56, %v1727_v9 }
  0xfd   : > { %1001 = vst [vmem:[%s1733_s21 + $0x48] sm:$0xff] %v969_v1  ;;  %v852_v63 = vadd.f32 %v1789_v49, %v763_v61 }
  0xfe   : > { %v1797_v4 = vpop.f32.mrf.mxu3 }
 0x100   : > { %v905_v5 = vpop.f32.mrf.mxu2  ;;  %v729_v7 = vpop.f32.mrf.mxu0 }
 0x101   : > { %v906_v6 = vadd.f32 %v905_v5, %v817_v3  ;;  %v818_v8 = vpop.f32.mrf.mxu1  ;;  %v730_v11 = vadd.f32 %v1716_v56, %v729_v7 }
 0x103   : > { %v970_v10 = vmax.f32 %v906_v6, 0.0  ;;  %v819_v12 = vadd.f32 %v818_v8, %v730_v11 }
 0x105   : > { %1002 = vst [vmem:[%s1733_s21 + $0x50] sm:$0xff] %v970_v10 }
 0x106   : > { %v1801_v13 = vpop.f32.mrf.mxu3 }
 0x108   : > { %v907_v14 = vpop.f32.mrf.mxu2  ;;  %v732_v16 = vpop.f32.mrf.mxu0 }
 0x109   : > { %v908_v15 = vadd.f32 %v907_v14, %v819_v12  ;;  %v733_v17 = vadd.f32 %v1716_v56, %v732_v16  ;;  %v821_v18 = vpop.f32.mrf.mxu1  ;;  %v765_v12 = vadd.f32 %v1716_v56, %v1745_v23  ;;  %v768_v23 = vadd.f32 %v1716_v56, %v1749_v37 }
 0x10a   : > { %v770_v37 = vadd.f32 %v1716_v56, %v1761_v53  ;;  %v773_v53 = vadd.f32 %v1716_v56, %v1765_v2  ;;  %v775_v2 = vadd.f32 %v1716_v56, %v1777_v19 }
 0x10b   : > { %v971_v20 = vmax.f32 %v908_v15, 0.0  ;;  %v822_v21 = vadd.f32 %v821_v18, %v733_v17  ;;  %v854_v9 = vadd.f32 %v1793_v59, %v765_v12  ;;  %v857_v59 = vadd.f32 %v1797_v4, %v768_v23 }
 0x10d   : > { %1003 = vst [vmem:[%s1733_s21 + $0x58] sm:$0xff] %v971_v20 }
 0x10e   : > { %v1805_v22 = vpop.f32.mrf.mxu3 }
 0x110   : > { %v910_v24 = vpop.f32.mrf.mxu2  ;;  %v734_v26 = vpop.f32.mrf.mxu0 }
 0x111   : > { %v911_v25 = vadd.f32 %v910_v24, %v822_v21  ;;  %v823_v27 = vpop.f32.mrf.mxu1  ;;  %v735_v29 = vadd.f32 %v1716_v56, %v734_v26 }
 0x113   : > { %v972_v28 = vmax.f32 %v911_v25, 0.0  ;;  %v824_v30 = vadd.f32 %v823_v27, %v735_v29 }
 0x115   : > { %1004 = vst [vmem:[%s1733_s21 + $0x60] sm:$0xff] %v972_v28 }
 0x116   : > { %v1809_v31 = vpop.f32.mrf.mxu3 }
 0x118   : > { %v912_v33 = vpop.f32.mrf.mxu2  ;;  %v737_v35 = vpop.f32.mrf.mxu0 }
 0x119   : > { %v913_v34 = vadd.f32 %v912_v33, %v824_v30  ;;  %v738_v36 = vadd.f32 %v1716_v56, %v737_v35  ;;  %v826_v38 = vpop.f32.mrf.mxu1 }
 0x11b   : > { %v973_v39 = vmax.f32 %v913_v34, 0.0  ;;  %v827_v40 = vadd.f32 %v826_v38, %v738_v36 }
 0x11d   : > { %1005 = vst [vmem:[%s1733_s21 + $0x68] sm:$0xff] %v973_v39  ;;  %v859_v39 = vadd.f32 %v1801_v13, %v770_v37  ;;  %v862_v13 = vadd.f32 %v1805_v22, %v773_v53 }
 0x11e   : > { %v1813_v42 = vpop.f32.mrf.mxu3 }
 0x120   : > { %v915_v43 = vpop.f32.mrf.mxu2  ;;  %v739_v45 = vpop.f32.mrf.mxu0 }
 0x121   : > { %v916_v44 = vadd.f32 %v915_v43, %v827_v40  ;;  %v828_v46 = vpop.f32.mrf.mxu1  ;;  %v740_v48 = vadd.f32 %v1716_v56, %v739_v45 }
 0x123   : > { %v974_v47 = vmax.f32 %v916_v44, 0.0  ;;  %v829_v50 = vadd.f32 %v828_v46, %v740_v48 }
 0x125   : > { %1006 = vst [vmem:[%s1733_s21 + $0x70] sm:$0xff] %v974_v47 }
 0x126   : > { %v1817_v51 = vpop.f32.mrf.mxu3 }
 0x128   : > { %v917_v52 = vpop.f32.mrf.mxu2  ;;  %v742_v55 = vpop.f32.mrf.mxu0 }
 0x129   : > { %v918_v54 = vadd.f32 %v917_v52, %v829_v50  ;;  %v743_v57 = vadd.f32 %v1716_v56, %v742_v55  ;;  %v831_v58 = vpop.f32.mrf.mxu1 }
 0x12b   : > { %v975_v60 = vmax.f32 %v918_v54, 0.0  ;;  %v832_v62 = vadd.f32 %v831_v58, %v743_v57 }
 0x12d   : > { %1007 = vst [vmem:[%s1733_s21 + $0x78] sm:$0xff] %v975_v60 }
 0x12e   : > { %v940_v0 = vpop.f32.mrf.mxu3 }
 0x12f   : > { %v941_v3 = vadd.f32 %v940_v0, %v852_v63 }
 0x130   : > { %v920_v1 = vpop.f32.mrf.mxu2  ;;  %v744_v6 = vpop.f32.mrf.mxu0 }
 0x131   : > { %v921_v5 = vadd.f32 %v920_v1, %v832_v62  ;;  %v984_v7 = vmax.f32 %v941_v3, 0.0  ;;  %v833_v8 = vpop.f32.mrf.mxu1  ;;  %v745_v11 = vadd.f32 %v1716_v56, %v744_v6  ;;  %v864_v3 = vadd.f32 %v1809_v31, %v775_v2 }
 0x133   : > { %v976_v10 = vmax.f32 %v921_v5, 0.0  ;;  %1016 = vst [vmem:[%s1733_s21 + $0xc0] sm:$0xff] %v984_v7  ;;  %v834_v49 = vadd.f32 %v833_v8, %v745_v11 }
 0x135   : > { %1008 = vst [vmem:[%s1733_s21 + $0x80] sm:$0xff] %v976_v10 }
 0x136   : > { %v942_v14 = vpop.f32.mrf.mxu3 }
 0x137   : > { %v943_v16 = vadd.f32 %v942_v14, %v854_v9 }
 0x138   : > { %v922_v15 = vpop.f32.mrf.mxu2  ;;  %v747_v18 = vpop.f32.mrf.mxu0 }
 0x139   : > { %v923_v17 = vadd.f32 %v922_v15, %v834_v49  ;;  %v985_v20 = vmax.f32 %v943_v16, 0.0  ;;  %v748_v21 = vadd.f32 %v1716_v56, %v747_v18  ;;  %v836_v24 = vpop.f32.mrf.mxu1  ;;  %v778_v49 = vadd.f32 %v1716_v56, %v1781_v32 }
 0x13a   : > { %v780_v32 = vadd.f32 %v1716_v56, %v1785_v41 }
 0x13b   : > { %v977_v25 = vmax.f32 %v923_v17, 0.0  ;;  %1017 = vst [vmem:[%s1733_s21 + $0xc8] sm:$0xff] %v985_v20  ;;  %v837_v26 = vadd.f32 %v836_v24, %v748_v21  ;;  %v867_v31 = vadd.f32 %v1813_v42, %v778_v49 }
 0x13c   : > { %v869_v23 = vadd.f32 %v1817_v51, %v780_v32 }
 0x13d   : > { %1009 = vst [vmem:[%s1733_s21 + $0x88] sm:$0xff] %v977_v25 }
 0x13e   : > { %v945_v27 = vpop.f32.mrf.mxu3 }
 0x13f   : > { %v946_v29 = vadd.f32 %v945_v27, %v857_v59 }
 0x140   : > { %v925_v28 = vpop.f32.mrf.mxu2  ;;  %v749_v33 = vpop.f32.mrf.mxu0 }
 0x141   : > { %v926_v30 = vadd.f32 %v925_v28, %v837_v26  ;;  %v986_v34 = vmax.f32 %v946_v29, 0.0  ;;  %v838_v35 = vpop.f32.mrf.mxu1  ;;  %v750_v38 = vadd.f32 %v1716_v56, %v749_v33 }
 0x143   : > { %v978_v36 = vmax.f32 %v926_v30, 0.0  ;;  %1018 = vst [vmem:[%s1733_s21 + $0xd0] sm:$0xff] %v986_v34  ;;  %v839_v4 = vadd.f32 %v838_v35, %v750_v38 }
 0x145   : > { %1010 = vst [vmem:[%s1733_s21 + $0x90] sm:$0xff] %v978_v36 }
 0x146   : > { %v947_v40 = vpop.f32.mrf.mxu3 }
 0x147   : > { %v948_v44 = vadd.f32 %v947_v40, %v859_v39 }
 0x148   : > { %v927_v43 = vpop.f32.mrf.mxu2  ;;  %v752_v46 = vpop.f32.mrf.mxu0 }
 0x149   : > { %v928_v45 = vadd.f32 %v927_v43, %v839_v4  ;;  %v987_v47 = vmax.f32 %v948_v44, 0.0  ;;  %v753_v48 = vadd.f32 %v1716_v56, %v752_v46  ;;  %v841_v50 = vpop.f32.mrf.mxu1 }
 0x14b   : > { %v979_v52 = vmax.f32 %v928_v45, 0.0  ;;  %1019 = vst [vmem:[%s1733_s21 + $0xd8] sm:$0xff] %v987_v47  ;;  %v842_v54 = vadd.f32 %v841_v50, %v753_v48 }
 0x14d   : > { %1011 = vst [vmem:[%s1733_s21 + $0x98] sm:$0xff] %v979_v52 }
 0x14e   : > { %v950_v55 = vpop.f32.mrf.mxu3 }
 0x14f   : > { %v951_v58 = vadd.f32 %v950_v55, %v862_v13 }
 0x150   : > { %v930_v57 = vpop.f32.mrf.mxu2  ;;  %v754_v61 = vpop.f32.mrf.mxu0 }
 0x151   : > { %v931_v60 = vadd.f32 %v930_v57, %v842_v54  ;;  %v988_v62 = vmax.f32 %v951_v58, 0.0  ;;  %v843_v63 = vpop.f32.mrf.mxu1  ;;  %v755_v1 = vadd.f32 %v1716_v56, %v754_v61 }
 0x153   : > { %v980_v0 = vmax.f32 %v931_v60, 0.0  ;;  %1020 = vst [vmem:[%s1733_s21 + $0xe0] sm:$0xff] %v988_v62  ;;  %v844_v22 = vadd.f32 %v843_v63, %v755_v1 }
 0x155   : > { %1012 = vst [vmem:[%s1733_s21 + $0xa0] sm:$0xff] %v980_v0 }
 0x156   : > { %v952_v5 = vpop.f32.mrf.mxu3 }
 0x157   : > { %v953_v7 = vadd.f32 %v952_v5, %v864_v3 }
 0x158   : > { %v932_v6 = vpop.f32.mrf.mxu2  ;;  %v757_v10 = vpop.f32.mrf.mxu0 }
 0x159   : > { %v933_v8 = vadd.f32 %v932_v6, %v844_v22  ;;  %v989_v11 = vmax.f32 %v953_v7, 0.0  ;;  %v758_v12 = vadd.f32 %v1716_v56, %v757_v10  ;;  %v846_v19 = vpop.f32.mrf.mxu1 }
 0x15b   : > { %v981_v9 = vmax.f32 %v933_v8, 0.0  ;;  %1021 = vst [vmem:[%s1733_s21 + $0xe8] sm:$0xff] %v989_v11  ;;  %v847_v14 = vadd.f32 %v846_v19, %v758_v12 }
 0x15d   : > { %1013 = vst [vmem:[%s1733_s21 + $0xa8] sm:$0xff] %v981_v9 }
 0x15e   : > { %v955_v15 = vpop.f32.mrf.mxu3 }
 0x15f   : > { %v956_v17 = vadd.f32 %v955_v15, %v867_v31 }
 0x160   : > { %v935_v16 = vpop.f32.mrf.mxu2  ;;  %v759_v20 = vpop.f32.mrf.mxu0 }
 0x161   : > { %v936_v18 = vadd.f32 %v935_v16, %v847_v14  ;;  %v990_v21 = vmax.f32 %v956_v17, 0.0  ;;  %v760_v25 = vadd.f32 %v1716_v56, %v759_v20  ;;  %v848_v26 = vpop.f32.mrf.mxu1 }
 0x163   : > { %v982_v24 = vmax.f32 %v936_v18, 0.0  ;;  %1022 = vst [vmem:[%s1733_s21 + $0xf0] sm:$0xff] %v990_v21  ;;  %v849_v42 = vadd.f32 %v848_v26, %v760_v25 }
 0x165   : > { %1014 = vst [vmem:[%s1733_s21 + $0xb0] sm:$0xff] %v982_v24 }
 0x166   : > { %v957_v59 = vpop.f32.mrf.mxu3 }
 0x167   : > { %v958_v28 = vadd.f32 %v957_v59, %v869_v23 }
 0x168   : > { %v937_v27 = vpop.f32.mrf.mxu2 }
 0x169   : > { %v938_v29 = vadd.f32 %v937_v27, %v849_v42  ;;  %v991_v30 = vmax.f32 %v958_v28, 0.0 }
 0x16b   : > { %v983_v33 = vmax.f32 %v938_v29, 0.0  ;;  %1023 = vst [vmem:[%s1733_s21 + $0xf8] sm:$0xff] %v991_v30 }
 0x16d   : > { %1015 = vst [vmem:[%s1733_s21 + $0xb8] sm:$0xff] %v983_v33 }
 0x16e PF: > { %s13_s12 = sadd.s32 1, %s1491_s12  }
 0x16f   : > { %p10_p4 = scmp.ge.s32.totalorder %s13_s12, 4  }
 0x171   :  { %12 = sbr.rel (!%p10_p4) target bundleno = 1 (0x1), region = 62 }

// kernel: generalized_rcnn_forward.18
= control target key start
LH: loop header
LB: loop body
LE: loop exit
PB: predicated region body
PF: predicated region fallthrough
CT: control target
= control target key end

     0   :  { %s1481_s12 = smov 0   ;;  %s1839_s0 = inlined_call_operand.vmem [shape: bf16[512,384], index: 0, kind: input, shape index: {}]   ;;  %s1840_s1 = inlined_call_operand.vmem [shape: bf16[384,128], index: 1, kind: input, shape index: {}]   ;;  %s1841_s2 = inlined_call_operand.vmem [shape: f32[1,128], index: 2, kind: input, shape index: {}]   ;;  %s1842_s3 = inlined_call_operand.vmem [shape: f32[512,128], index: 3, kind: output, shape index: {}]  }
   0x1 LB: > { %s1048_s13 = sadd.s32 4294967295, %s1459_s12   ;;  %p1052_p0 = scmp.ge.s32.totalorder %s1459_s12, 1  ;;  %s1459_s12 = sphi %s1481_s12, %s13_s12  }
   0x2   : > { %p139_p1 = scmp.lt.s32.totalorder %s1459_s12, 3 }
   0x4   : > { %p140_p2 = pnand %p1052_p0, %p139_p1 }
   0x5   : > { %s1053_s5 = sshll.u32 (!%p140_p2), %s1048_s13, 5 }
   0x6   : > { %143 = sbr.rel (%p140_p2) target bundleno = 364 (0x16c), region = 32  ;;  %p165_p3 = scmp.lt.s32.totalorder (!%p140_p2), %s1053_s5, 63 }
   0xb   : > { %v1402_v0 = vld [vmem:[%s1840_s1 + $0x38] sm:$0xff]  ;;  %v1401_v3 = vld [vmem:[%s1840_s1 + $0x30] sm:$0xff]  ;;  %v1400_v6 = vld [vmem:[%s1840_s1 + $0x28] sm:$0xff]  ;;  %s1844_s5 = smov (!%p165_p3, %s1053_s5), 63 }
   0xc   : > { %v1495_v1 = vld [vmem:[%s1840_s1 + $0x78] sm:$0xff]  ;;  %693 = vmatpush.bf16.msra.mxu0 %v1402_v0  ;;  %1419 = vmatpush.bf16.msra.mxu3 %v1402_v0  ;;  %v1510_v4 = vld [vmem:[%s1840_s1 + $0x70] sm:$0xff]  ;;  %v1525_v7 = vld [vmem:[%s1840_s1 + $0x68] sm:$0xff]  ;;  %s1443_s21 = smul.u32 12, %s1844_s5  ;;  %s1056_s18 = sshll.u32 %s1844_s5, 3 }
   0xd   : > { %v1500_v2 = vld [vmem:[%s1840_s1 + $0xb8] sm:$0xff]  ;;  %782 = vmatpush.bf16.msra.mxu1 %v1495_v1  ;;  %v1515_v5 = vld [vmem:[%s1840_s1 + $0xb0] sm:$0xff]  ;;  %v1530_v8 = vld [vmem:[%s1840_s1 + $0xa8] sm:$0xff] }
   0xe   : > { %871 = vmatpush.bf16.msra.mxu2 %v1500_v2  ;;  %v1399_v9 = vld [vmem:[%s1840_s1 + $0x20] sm:$0xff]  ;;  %v1398_v12 = vld [vmem:[%s1840_s1 + $0x18] sm:$0xff]  ;;  %v1397_v15 = vld [vmem:[%s1840_s1 + $0x10] sm:$0xff]  ;;  %s1581_s30 = scalar_lea.vmem %s1839_s0, %s1443_s21  ;;  %s1701_s21 = scalar_lea.vmem %s1842_s3, %s1056_s18 }
   0xf   : > { %v1540_v10 = vld [vmem:[%s1840_s1 + $0x60] sm:$0xff]  ;;  %v1406_v13 = vld [vmem:[%s1840_s1 + $0x58] sm:$0xff]  ;;  %v1405_v16 = vld [vmem:[%s1840_s1 + $0x50] sm:$0xff] }
  0x10   : > { %694 = vmatpush.bf16.msra.mxu0 %v1401_v3  ;;  %1420 = vmatpush.bf16.msra.mxu3 %v1401_v3  ;;  %v1545_v11 = vld [vmem:[%s1840_s1 + $0xa0] sm:$0xff]  ;;  %v1560_v14 = vld [vmem:[%s1840_s1 + $0x98] sm:$0xff]  ;;  %v1573_v17 = vld [vmem:[%s1840_s1 + $0x90] sm:$0xff] }
  0x11   : > { %783 = vmatpush.bf16.msra.mxu1 %v1510_v4  ;;  %v1396_v18 = vld [vmem:[%s1840_s1 + $0x8] sm:$0xff]  ;;  %v1395_v21 = vld [vmem:[%s1840_s1] sm:$0xff]  ;;  %v1061_v29 = vld [vmem:[%s1581_s30 + $0xc] sm:$0xf0] }
  0x12   : > { %872 = vmatpush.bf16.msra.mxu2 %v1515_v5  ;;  %v1404_v19 = vld [vmem:[%s1840_s1 + $0x48] sm:$0xff]  ;;  %v1403_v22 = vld [vmem:[%s1840_s1 + $0x40] sm:$0xff]  ;;  %v1349_v31 = vld [vmem:[%s1581_s30 + $0x10] sm:$0xf0] }
  0x13   : > { %v1590_v20 = vld [vmem:[%s1840_s1 + $0x88] sm:$0xff]  ;;  %v1601_v23 = vld [vmem:[%s1840_s1 + $0x80] sm:$0xff]  ;;  %v1071_v36 = vld [vmem:[%s1581_s30 + $0x18] sm:$0xf] }
  0x14   : > { %695 = vmatpush.bf16.msra.mxu0 %v1400_v6  ;;  %1421 = vmatpush.bf16.msra.mxu3 %v1400_v6  ;;  %v1059_v24 = vld [vmem:[%s1581_s30] sm:$0xf]  ;;  %v1348_v25 = vld [vmem:[%s1581_s30 + $0x8] sm:$0xf0]  ;;  %v1347_v28 = vld [vmem:[%s1581_s30 + $0x4] sm:$0xf] }
  0x15   : > { %784 = vmatpush.bf16.msra.mxu1 %v1525_v7  ;;  %v1203_v26 = vld [vmem:[%s1581_s30 + $0x120] sm:$0xf]  ;;  %v1384_v27 = vld [vmem:[%s1581_s30 + $0x128] sm:$0xf0]  ;;  %v1067_v30 = vld [vmem:[%s1581_s30 + $0x8] sm:$0xf]  ;;  %v1060_v32 = vor.u32 %v1348_v25, %v1059_v24  ;;  %v1064_v34 = vor.u32 %v1347_v28, %v1061_v29 }
  0x16   : > { %873 = vmatpush.bf16.msra.mxu2 %v1530_v8  ;;  %v1204_v33 = vor.u32 %v1384_v27, %v1203_v26  ;;  %v1068_v35 = vor.u32 %v1349_v31, %v1067_v30  ;;  %v1351_v37 = vld [vmem:[%s1581_s30 + $0x20] sm:$0xf0]  ;;  %v1215_v38 = vld [vmem:[%s1581_s30 + $0x138] sm:$0xf]  ;;  %v1350_v40 = vld [vmem:[%s1581_s30 + $0x1c] sm:$0xf] }
  0x17   : > { %v1387_v39 = vld [vmem:[%s1581_s30 + $0x140] sm:$0xf0]  ;;  %v1073_v41 = vld [vmem:[%s1581_s30 + $0x24] sm:$0xf0]  ;;  %v1079_v42 = vld [vmem:[%s1581_s30 + $0x20] sm:$0xf]  ;;  %v1072_v44 = vor.u32 %v1351_v37, %v1071_v36 }
  0x18   : > { %696 = vmatpush.bf16.msra.mxu0 %v1399_v9  ;;  %1422 = vmatpush.bf16.msra.mxu3 %v1399_v9  ;;  %v1352_v43 = vld [vmem:[%s1581_s30 + $0x28] sm:$0xf0]  ;;  %v1216_v45 = vor.u32 %v1387_v39, %v1215_v38  ;;  %v1076_v46 = vor.u32 %v1350_v40, %v1073_v41  ;;  %v1083_v48 = vld [vmem:[%s1581_s30 + $0x30] sm:$0xf]  ;;  %v1354_v49 = vld [vmem:[%s1581_s30 + $0x38] sm:$0xf0] }
  0x19   : > { %785 = vmatpush.bf16.msra.mxu1 %v1540_v10  ;;  %v1080_v47 = vor.u32 %v1352_v43, %v1079_v42  ;;  %v1227_v50 = vld [vmem:[%s1581_s30 + $0x150] sm:$0xf]  ;;  %v1390_v51 = vld [vmem:[%s1581_s30 + $0x158] sm:$0xf0]  ;;  %v1353_v52 = vld [vmem:[%s1581_s30 + $0x34] sm:$0xf]  ;;  %v1084_v56 = vor.u32 %v1354_v49, %v1083_v48 }
  0x1a   : > { %874 = vmatpush.bf16.msra.mxu2 %v1545_v11  ;;  %v1085_v53 = vld [vmem:[%s1581_s30 + $0x3c] sm:$0xf0]  ;;  %v1091_v54 = vld [vmem:[%s1581_s30 + $0x38] sm:$0xf]  ;;  %v1355_v55 = vld [vmem:[%s1581_s30 + $0x40] sm:$0xf0]  ;;  %v1228_v57 = vor.u32 %v1390_v51, %v1227_v50 }
  0x1b   : > { %v1088_v58 = vor.u32 %v1353_v52, %v1085_v53  ;;  %v1092_v59 = vor.u32 %v1355_v55, %v1091_v54  ;;  %v1095_v60 = vld [vmem:[%s1581_s30 + $0x48] sm:$0xf]  ;;  %v1357_v61 = vld [vmem:[%s1581_s30 + $0x50] sm:$0xf0]  ;;  %v1356_v0 = vld [vmem:[%s1581_s30 + $0x4c] sm:$0xf] }
  0x1c   : > { %697 = vmatpush.bf16.msra.mxu0 %v1398_v12  ;;  %1423 = vmatpush.bf16.msra.mxu3 %v1398_v12  ;;  %v1239_v62 = vld [vmem:[%s1581_s30 + $0x168] sm:$0xf]  ;;  %v1393_v63 = vld [vmem:[%s1581_s30 + $0x170] sm:$0xf0]  ;;  %v1358_v3 = vld [vmem:[%s1581_s30 + $0x58] sm:$0xf0] }
  0x1d   : > { %786 = vmatpush.bf16.msra.mxu1 %v1406_v13  ;;  %v1360_v9 = vld [vmem:[%s1581_s30 + $0x68] sm:$0xf0]  ;;  %v1205_v12 = vld [vmem:[%s1581_s30 + $0x12c] sm:$0xf0]  ;;  %v1386_v24 = vld [vmem:[%s1581_s30 + $0x13c] sm:$0xf] }
  0x1e   : > { %875 = vmatpush.bf16.msra.mxu2 %v1560_v14  ;;  %v1217_v25 = vld [vmem:[%s1581_s30 + $0x144] sm:$0xf0]  ;;  %v1127_v26 = vld [vmem:[%s1581_s30 + $0x80] sm:$0xf]  ;;  %v1364_v27 = vld [vmem:[%s1581_s30 + $0x88] sm:$0xf0] }
  0x1f   : > { %v1220_v29 = vor.u32 %v1386_v24, %v1217_v25  ;;  %v1128_v31 = vor.u32 %v1364_v27, %v1127_v26  ;;  %v1229_v36 = vld [vmem:[%s1581_s30 + $0x15c] sm:$0xf0]  ;;  %v1139_v38 = vld [vmem:[%s1581_s30 + $0x98] sm:$0xf]  ;;  %v1367_v39 = vld [vmem:[%s1581_s30 + $0xa0] sm:$0xf0] }
  0x20   : > { %698 = vmatpush.bf16.msra.mxu0 %v1397_v15  ;;  %1424 = vmatpush.bf16.msra.mxu3 %v1397_v15  ;;  %v1361_v15 = vld [vmem:[%s1581_s30 + $0x70] sm:$0xf0]  ;;  %v1133_v37 = vld [vmem:[%s1581_s30 + $0x9c] sm:$0xf0]  ;;  %v1140_v43 = vor.u32 %v1367_v39, %v1139_v38  ;;  %v1241_v48 = vld [vmem:[%s1581_s30 + $0x174] sm:$0xf0] }
  0x21   : > { %787 = vmatpush.bf16.msra.mxu1 %v1405_v16  ;;  %v1145_v49 = vld [vmem:[%s1581_s30 + $0xb4] sm:$0xf0]  ;;  %v1151_v50 = vld [vmem:[%s1581_s30 + $0xb0] sm:$0xf]  ;;  %v1370_v51 = vld [vmem:[%s1581_s30 + $0xb8] sm:$0xf0] }
  0x22   : > { %876 = vmatpush.bf16.msra.mxu2 %v1573_v17  ;;  %v1152_v55 = vor.u32 %v1370_v51, %v1151_v50 }
  0x24   : > { %699 = vmatpush.bf16.msra.mxu0 %v1396_v18  ;;  %1425 = vmatpush.bf16.msra.mxu3 %v1396_v18 }
  0x25   : > { %788 = vmatpush.bf16.msra.mxu1 %v1404_v19 }
  0x26   : > { %877 = vmatpush.bf16.msra.mxu2 %v1590_v20 }
  0x28   : > { %700 = vmatpush.bf16.msra.mxu0 %v1395_v21  ;;  %1426 = vmatpush.bf16.msra.mxu3 %v1395_v21  ;;  %v1363_v21 = vld [vmem:[%s1581_s30 + $0x80] sm:$0xf0] }
  0x29   : > { %789 = vmatpush.bf16.msra.mxu1 %v1403_v22 }
  0x2a   : > { %878 = vmatpush.bf16.msra.mxu2 %v1601_v23 }
  0x2b   : > { %701 = vmatmul.bf16.vlgmr.msra.gmra.mxu0 %v1060_v32  ;;  %761 = vmatmul.bf16.vlgmr.msra.gmra.mxu3 %v1204_v33  ;;  %v1131_v32 = vld [vmem:[%s1581_s30 + $0x90] sm:$0xf]  ;;  %v1366_v33 = vld [vmem:[%s1581_s30 + $0x98] sm:$0xf0] }
  0x2c   : > { %1427 = vmatpush.bf16.msrb.mxu3 %v1495_v1  ;;  %790 = vmatmul.bf16.vlgmr.msra.gmra.mxu1 %v1064_v34  ;;  %v1097_v1 = vld [vmem:[%s1581_s30 + $0x54] sm:$0xf0]  ;;  %v1365_v34 = vld [vmem:[%s1581_s30 + $0x94] sm:$0xf]  ;;  %v1132_v40 = vor.u32 %v1366_v33, %v1131_v32 }
  0x2d   : > { %879 = vmatmul.bf16.vlgmr.msra.gmra.mxu2 %v1068_v35  ;;  %v1100_v6 = vor.u32 %v1356_v0, %v1097_v1  ;;  %v1389_v35 = vld [vmem:[%s1581_s30 + $0x154] sm:$0xf]  ;;  %v1136_v42 = vor.u32 %v1365_v34, %v1133_v37 }
  0x2e   : > { %v1232_v41 = vor.u32 %v1389_v35, %v1229_v36  ;;  %v1373_v0 = vld [vmem:[%s1581_s30 + $0xd0] sm:$0xf0] }
  0x30   : > { %1428 = vmatpush.bf16.msrb.mxu3 %v1510_v4  ;;  %v1096_v4 = vor.u32 %v1357_v61, %v1095_v60  ;;  %v1211_v60 = vld [vmem:[%s1581_s30 + $0x128] sm:$0xf]  ;;  %v1385_v61 = vld [vmem:[%s1581_s30 + $0x130] sm:$0xf0] }
  0x34   : > { %1429 = vmatpush.bf16.msrb.mxu3 %v1525_v7 }
  0x38   : > { %1430 = vmatpush.bf16.msrb.mxu3 %v1540_v10  ;;  %v1359_v10 = vld [vmem:[%s1581_s30 + $0x64] sm:$0xf] }
  0x3b   : > { %706 = vmatmul.bf16.gmra.mxu0 %v1072_v44  ;;  %766 = vmatmul.bf16.gmra.mxu3 %v1216_v45  ;;  %v1143_v44 = vld [vmem:[%s1581_s30 + $0xa8] sm:$0xf]  ;;  %v1369_v45 = vld [vmem:[%s1581_s30 + $0xb0] sm:$0xf0] }
  0x3c   : > { %1431 = vmatpush.bf16.msrb.mxu3 %v1406_v13  ;;  %795 = vmatmul.bf16.gmra.mxu1 %v1076_v46  ;;  %v1109_v13 = vld [vmem:[%s1581_s30 + $0x6c] sm:$0xf0]  ;;  %v1368_v46 = vld [vmem:[%s1581_s30 + $0xac] sm:$0xf]  ;;  %v1144_v52 = vor.u32 %v1369_v45, %v1143_v44  ;;  %v1235_v44 = vld [vmem:[%s1581_s30 + $0x158] sm:$0xf] }
  0x3d   : > { %884 = vmatmul.bf16.gmra.mxu2 %v1080_v47  ;;  %v1112_v18 = vor.u32 %v1359_v10, %v1109_v13  ;;  %v1392_v47 = vld [vmem:[%s1581_s30 + $0x16c] sm:$0xf]  ;;  %v1148_v54 = vor.u32 %v1368_v46, %v1145_v49  ;;  %v1391_v45 = vld [vmem:[%s1581_s30 + $0x160] sm:$0xf0]  ;;  %v1181_v46 = vld [vmem:[%s1581_s30 + $0xfc] sm:$0xf0] }
  0x3e   : > { %v1244_v53 = vor.u32 %v1392_v47, %v1241_v48  ;;  %v1187_v47 = vld [vmem:[%s1581_s30 + $0xf8] sm:$0xf]  ;;  %v1379_v48 = vld [vmem:[%s1581_s30 + $0x100] sm:$0xf0] }
  0x40   : > { %1432 = vmatpush.bf16.msrb.mxu3 %v1405_v16 }
  0x44   : > { %1433 = vmatpush.bf16.msrb.mxu3 %v1404_v19 }
  0x48   : > { %1434 = vmatpush.bf16.msrb.mxu3 %v1403_v22  ;;  %v1362_v22 = vld [vmem:[%s1581_s30 + $0x7c] sm:$0xf] }
  0x4b   : > { %711 = vmatmul.bf16.gmra.mxu0 %v1084_v56  ;;  %771 = vmatmul.bf16.gmra.mxu3 %v1228_v57  ;;  %v1684_v56 = vld [vmem:[%s1841_s2] ss:$0 sm:$0xff] }
  0x4c   : > { %1435 = vmatpush.bf16.msra.mxu3 %v1500_v2  ;;  %800 = vmatmul.bf16.gmra.mxu1 %v1088_v58  ;;  %v1103_v2 = vld [vmem:[%s1581_s30 + $0x50] sm:$0xf]  ;;  %v1155_v57 = vld [vmem:[%s1581_s30 + $0xc0] sm:$0xf]  ;;  %v1372_v58 = vld [vmem:[%s1581_s30 + $0xc8] sm:$0xf0] }
  0x4d   : > { %889 = vmatmul.bf16.gmra.mxu2 %v1092_v59  ;;  %v1104_v7 = vor.u32 %v1358_v3, %v1103_v2  ;;  %v1371_v59 = vld [vmem:[%s1581_s30 + $0xc4] sm:$0xf]  ;;  %v1156_v1 = vor.u32 %v1372_v58, %v1155_v57  ;;  %v1212_v2 = vor.u32 %v1385_v61, %v1211_v60  ;;  %v1188_v58 = vor.u32 %v1379_v48, %v1187_v47 }
  0x50   : > { %1436 = vmatpush.bf16.msra.mxu3 %v1515_v5  ;;  %v1240_v5 = vor.u32 %v1393_v63, %v1239_v62  ;;  %v1157_v62 = vld [vmem:[%s1581_s30 + $0xcc] sm:$0xf0]  ;;  %v1163_v63 = vld [vmem:[%s1581_s30 + $0xc8] sm:$0xf] }
  0x54   : > { %1437 = vmatpush.bf16.msra.mxu3 %v1530_v8  ;;  %v1107_v8 = vld [vmem:[%s1581_s30 + $0x60] sm:$0xf] }
  0x55   : > { %v1108_v16 = vor.u32 %v1360_v9, %v1107_v8 }
  0x58   : > { %1438 = vmatpush.bf16.msra.mxu3 %v1545_v11  ;;  %v1383_v11 = vld [vmem:[%s1581_s30 + $0x124] sm:$0xf] }
  0x5b   : > { %716 = vmatmul.bf16.gmra.mxu0 %v1096_v4  ;;  %776 = vmatmul.bf16.gmra.mxu3 %v1240_v5  ;;  %v1160_v4 = vor.u32 %v1371_v59, %v1157_v62  ;;  %v1164_v5 = vor.u32 %v1373_v0, %v1163_v63 }
  0x5c   : > { %1439 = vmatpush.bf16.msra.mxu3 %v1560_v14  ;;  %805 = vmatmul.bf16.gmra.mxu1 %v1100_v6  ;;  %v1115_v14 = vld [vmem:[%s1581_s30 + $0x68] sm:$0xf] }
  0x5d   : > { %894 = vmatmul.bf16.gmra.mxu2 %v1104_v7  ;;  %v1116_v19 = vor.u32 %v1361_v15, %v1115_v14  ;;  %v1167_v15 = vld [vmem:[%s1581_s30 + $0xd8] sm:$0xf] }
  0x60   : > { %1440 = vmatpush.bf16.msra.mxu3 %v1573_v17  ;;  %v1208_v17 = vor.u32 %v1383_v11, %v1205_v12 }
  0x64   : > { %1441 = vmatpush.bf16.msra.mxu3 %v1590_v20  ;;  %v1119_v20 = vld [vmem:[%s1581_s30 + $0x78] sm:$0xf] }
  0x65   : > { %v1120_v28 = vor.u32 %v1363_v21, %v1119_v20  ;;  %v1169_v20 = vld [vmem:[%s1581_s30 + $0xe4] sm:$0xf0]  ;;  %v1175_v21 = vld [vmem:[%s1581_s30 + $0xe0] sm:$0xf] }
  0x68   : > { %1442 = vmatpush.bf16.msra.mxu3 %v1601_v23  ;;  %v1121_v23 = vld [vmem:[%s1581_s30 + $0x84] sm:$0xf0] }
  0x69   : > { %v1124_v30 = vor.u32 %v1362_v22, %v1121_v23  ;;  %v1376_v22 = vld [vmem:[%s1581_s30 + $0xe8] sm:$0xf0] }
  0x6b   : > { %721 = vmatmul.bf16.gmra.mxu0 %v1108_v16  ;;  %850 = vmatmul.bf16.vlgmr.msrb.gmra.mxu3 %v1208_v17  ;;  %v1375_v16 = vld [vmem:[%s1581_s30 + $0xe0] sm:$0xf0]  ;;  %v1374_v17 = vld [vmem:[%s1581_s30 + $0xdc] sm:$0xf] }
  0x6c   : > { %810 = vmatmul.bf16.gmra.mxu1 %v1112_v18  ;;  %v1223_v18 = vld [vmem:[%s1581_s30 + $0x140] sm:$0xf]  ;;  %v1168_v26 = vor.u32 %v1375_v16, %v1167_v15 }
  0x6d   : > { %899 = vmatmul.bf16.gmra.mxu2 %v1116_v19  ;;  %v1388_v19 = vld [vmem:[%s1581_s30 + $0x148] sm:$0xf0] }
  0x6e   : > { %v1224_v27 = vor.u32 %v1388_v19, %v1223_v18 }
  0x7b   : > { %726 = vmatmul.bf16.gmra.mxu0 %v1120_v28  ;;  %855 = vmatmul.bf16.gmra.mxu3 %v1220_v29 }
  0x7c   : > { %815 = vmatmul.bf16.gmra.mxu1 %v1124_v30  ;;  %v1172_v30 = vor.u32 %v1374_v17, %v1169_v20 }
  0x7d   : > { %904 = vmatmul.bf16.gmra.mxu2 %v1128_v31  ;;  %v1176_v31 = vor.u32 %v1376_v22, %v1175_v21 }
  0x8b   : > { %731 = vmatmul.bf16.gmra.mxu0 %v1132_v40  ;;  %860 = vmatmul.bf16.gmra.mxu3 %v1232_v41  ;;  %v1179_v41 = vld [vmem:[%s1581_s30 + $0xf0] sm:$0xf] }
  0x8c   : > { %820 = vmatmul.bf16.gmra.mxu1 %v1136_v42  ;;  %v1378_v42 = vld [vmem:[%s1581_s30 + $0xf8] sm:$0xf0] }
  0x8d   : > { %909 = vmatmul.bf16.gmra.mxu2 %v1140_v43  ;;  %v1377_v43 = vld [vmem:[%s1581_s30 + $0xf4] sm:$0xf] }
  0x8e   : > { %v1184_v57 = vor.u32 %v1377_v43, %v1181_v46 }
  0x9b   : > { %736 = vmatmul.bf16.gmra.mxu0 %v1144_v52  ;;  %865 = vmatmul.bf16.gmra.mxu3 %v1244_v53  ;;  %v1180_v52 = vor.u32 %v1378_v42, %v1179_v41  ;;  %v1236_v53 = vor.u32 %v1391_v45, %v1235_v44 }
  0x9c   : > { %825 = vmatmul.bf16.gmra.mxu1 %v1148_v54 }
  0x9d   : > { %914 = vmatmul.bf16.gmra.mxu2 %v1152_v55 }
  0xa8   : > { %v702_v3 = vpop.f32.mrf.mxu0 }
  0xa9   : > { %v703_v6 = vadd.f32 %v1684_v56, %v702_v3  ;;  %v791_v7 = vpop.f32.mrf.mxu1 }
  0xab   : > { %741 = vmatmul.bf16.gmra.mxu0 %v1156_v1  ;;  %939 = vmatmul.bf16.vlgmr.msra.gmra.mxu3 %v1212_v2  ;;  %v792_v8 = vadd.f32 %v791_v7, %v703_v6  ;;  %v1380_v6 = vld [vmem:[%s1581_s30 + $0x10c] sm:$0xf]  ;;  %v1247_v7 = vld [vmem:[%s1581_s30 + $0x170] sm:$0xf] }
  0xac   : > { %830 = vmatmul.bf16.gmra.mxu1 %v1160_v4  ;;  %v1191_v4 = vld [vmem:[%s1581_s30 + $0x108] sm:$0xf] }
  0xad   : > { %919 = vmatmul.bf16.gmra.mxu2 %v1164_v5  ;;  %v1381_v5 = vld [vmem:[%s1581_s30 + $0x110] sm:$0xf0] }
  0xae   : > { %v1696_v9 = vpop.f32.mrf.mxu3  ;;  %v1192_v16 = vor.u32 %v1381_v5, %v1191_v4 }
  0xb0   : > { %v880_v10 = vpop.f32.mrf.mxu2  ;;  %v704_v12 = vpop.f32.mrf.mxu0 }
  0xb1   : > { %v881_v11 = vadd.f32 %v880_v10, %v792_v8  ;;  %v793_v13 = vpop.f32.mrf.mxu1  ;;  %v705_v14 = vadd.f32 %v1684_v56, %v704_v12  ;;  %v1394_v8 = vld [vmem:[%s1581_s30 + $0x178] sm:$0xf0]  ;;  %v1193_v10 = vld [vmem:[%s1581_s30 + $0x114] sm:$0xf0] }
  0xb2   : > { %v1382_v12 = vld [vmem:[%s1581_s30 + $0x118] sm:$0xf0]  ;;  %v1248_v17 = vor.u32 %v1394_v8, %v1247_v7  ;;  %v1196_v20 = vor.u32 %v1380_v6, %v1193_v10 }
  0xb3   : > { %960 = vst [vmem:[%s1701_s21] sm:$0xff] %v881_v11  ;;  %v794_v24 = vadd.f32 %v793_v13, %v705_v14  ;;  %v1199_v11 = vld [vmem:[%s1581_s30 + $0x110] sm:$0xf] }
  0xb4   : > { %v1200_v21 = vor.u32 %v1382_v12, %v1199_v11 }
  0xb6   : > { %v1713_v25 = vpop.f32.mrf.mxu3 }
  0xb8   : > { %v882_v23 = vpop.f32.mrf.mxu2  ;;  %v707_v29 = vpop.f32.mrf.mxu0 }
  0xb9   : > { %v883_v28 = vadd.f32 %v882_v23, %v794_v24  ;;  %v708_v32 = vadd.f32 %v1684_v56, %v707_v29  ;;  %v796_v33 = vpop.f32.mrf.mxu1 }
  0xbb   : > { %961 = vst [vmem:[%s1701_s21 + $0x8] sm:$0xff] %v883_v28  ;;  %746 = vmatmul.bf16.gmra.mxu0 %v1168_v26  ;;  %944 = vmatmul.bf16.gmra.mxu3 %v1224_v27  ;;  %v797_v34 = vadd.f32 %v796_v33, %v708_v32 }
  0xbc   : > { %835 = vmatmul.bf16.gmra.mxu1 %v1172_v30 }
  0xbd   : > { %924 = vmatmul.bf16.gmra.mxu2 %v1176_v31 }
  0xbe   : > { %v1717_v35 = vpop.f32.mrf.mxu3 }
  0xc0   : > { %v885_v36 = vpop.f32.mrf.mxu2  ;;  %v709_v38 = vpop.f32.mrf.mxu0 }
  0xc1   : > { %v886_v37 = vadd.f32 %v885_v36, %v797_v34  ;;  %v798_v39 = vpop.f32.mrf.mxu1  ;;  %v710_v40 = vadd.f32 %v1684_v56, %v709_v38 }
  0xc3   : > { %962 = vst [vmem:[%s1701_s21 + $0x10] sm:$0xff] %v886_v37  ;;  %v799_v49 = vadd.f32 %v798_v39, %v710_v40 }
  0xc6   : > { %v1729_v50 = vpop.f32.mrf.mxu3 }
  0xc8   : > { %v887_v51 = vpop.f32.mrf.mxu2  ;;  %v712_v55 = vpop.f32.mrf.mxu0 }
  0xc9   : > { %v888_v54 = vadd.f32 %v887_v51, %v799_v49  ;;  %v713_v59 = vadd.f32 %v1684_v56, %v712_v55  ;;  %v801_v60 = vpop.f32.mrf.mxu1 }
  0xcb   : > { %963 = vst [vmem:[%s1701_s21 + $0x18] sm:$0xff] %v888_v54  ;;  %751 = vmatmul.bf16.gmra.mxu0 %v1180_v52  ;;  %949 = vmatmul.bf16.gmra.mxu3 %v1236_v53  ;;  %v802_v61 = vadd.f32 %v801_v60, %v713_v59 }
  0xcc   : > { %840 = vmatmul.bf16.gmra.mxu1 %v1184_v57 }
  0xcd   : > { %929 = vmatmul.bf16.gmra.mxu2 %v1188_v58 }
  0xce   : > { %v1733_v62 = vpop.f32.mrf.mxu3 }
  0xd0   : > { %v890_v63 = vpop.f32.mrf.mxu2  ;;  %v714_v1 = vpop.f32.mrf.mxu0 }
  0xd1   : > { %v891_v0 = vadd.f32 %v890_v63, %v802_v61  ;;  %v803_v2 = vpop.f32.mrf.mxu1  ;;  %v715_v3 = vadd.f32 %v1684_v56, %v714_v1 }
  0xd3   : > { %964 = vst [vmem:[%s1701_s21 + $0x20] sm:$0xff] %v891_v0  ;;  %v804_v13 = vadd.f32 %v803_v2, %v715_v3 }
  0xd6   : > { %v1745_v14 = vpop.f32.mrf.mxu3 }
  0xd8   : > { %v892_v15 = vpop.f32.mrf.mxu2  ;;  %v717_v19 = vpop.f32.mrf.mxu0 }
  0xd9   : > { %v893_v18 = vadd.f32 %v892_v15, %v804_v13  ;;  %v718_v22 = vadd.f32 %v1684_v56, %v717_v19  ;;  %v806_v24 = vpop.f32.mrf.mxu1 }
  0xdb   : > { %965 = vst [vmem:[%s1701_s21 + $0x28] sm:$0xff] %v893_v18  ;;  %756 = vmatmul.bf16.gmra.mxu0 %v1192_v16  ;;  %954 = vmatmul.bf16.gmra.mxu3 %v1248_v17  ;;  %v807_v23 = vadd.f32 %v806_v24, %v718_v22 }
  0xdc   : > { %845 = vmatmul.bf16.gmra.mxu1 %v1196_v20 }
  0xdd   : > { %934 = vmatmul.bf16.gmra.mxu2 %v1200_v21 }
  0xde   : > { %v1749_v26 = vpop.f32.mrf.mxu3 }
  0xe0   : > { %v895_v27 = vpop.f32.mrf.mxu2  ;;  %v719_v29 = vpop.f32.mrf.mxu0 }
  0xe1   : > { %v896_v28 = vadd.f32 %v895_v27, %v807_v23  ;;  %v808_v30 = vpop.f32.mrf.mxu1  ;;  %v720_v31 = vadd.f32 %v1684_v56, %v719_v29 }
  0xe3   : > { %966 = vst [vmem:[%s1701_s21 + $0x30] sm:$0xff] %v896_v28  ;;  %v809_v32 = vadd.f32 %v808_v30, %v720_v31 }
  0xe6   : > { %v1753_v33 = vpop.f32.mrf.mxu3 }
  0xe8   : > { %v897_v34 = vpop.f32.mrf.mxu2  ;;  %v722_v37 = vpop.f32.mrf.mxu0 }
  0xe9   : > { %v898_v36 = vadd.f32 %v897_v34, %v809_v32  ;;  %v723_v38 = vadd.f32 %v1684_v56, %v722_v37  ;;  %v811_v39 = vpop.f32.mrf.mxu1 }
  0xeb   : > { %967 = vst [vmem:[%s1701_s21 + $0x38] sm:$0xff] %v898_v36  ;;  %v812_v40 = vadd.f32 %v811_v39, %v723_v38 }
  0xee   : > { %v1757_v41 = vpop.f32.mrf.mxu3 }
  0xf0   : > { %v900_v42 = vpop.f32.mrf.mxu2  ;;  %v724_v44 = vpop.f32.mrf.mxu0 }
  0xf1   : > { %v901_v43 = vadd.f32 %v900_v42, %v812_v40  ;;  %v813_v45 = vpop.f32.mrf.mxu1  ;;  %v725_v46 = vadd.f32 %v1684_v56, %v724_v44  ;;  %v763_v42 = vadd.f32 %v1684_v56, %v1696_v9 }
  0xf3   : > { %968 = vst [vmem:[%s1701_s21 + $0x40] sm:$0xff] %v901_v43  ;;  %v814_v47 = vadd.f32 %v813_v45, %v725_v46  ;;  %v852_v44 = vadd.f32 %v1757_v41, %v763_v42 }
  0xf6   : > { %v1761_v48 = vpop.f32.mrf.mxu3 }
  0xf8   : > { %v902_v49 = vpop.f32.mrf.mxu2  ;;  %v727_v52 = vpop.f32.mrf.mxu0 }
  0xf9   : > { %v903_v51 = vadd.f32 %v902_v49, %v814_v47  ;;  %v728_v53 = vadd.f32 %v1684_v56, %v727_v52  ;;  %v816_v54 = vpop.f32.mrf.mxu1 }
  0xfb   : > { %969 = vst [vmem:[%s1701_s21 + $0x48] sm:$0xff] %v903_v51  ;;  %v817_v55 = vadd.f32 %v816_v54, %v728_v53  ;;  %v765_v54 = vadd.f32 %v1684_v56, %v1713_v25 }
  0xfd   : > { %v854_v9 = vadd.f32 %v1761_v48, %v765_v54  ;;  %v780_v54 = vadd.f32 %v1684_v56, %v1753_v33 }
  0xfe   : > { %v1765_v57 = vpop.f32.mrf.mxu3 }
 0x100   : > { %v905_v58 = vpop.f32.mrf.mxu2  ;;  %v729_v60 = vpop.f32.mrf.mxu0 }
 0x101   : > { %v906_v59 = vadd.f32 %v905_v58, %v817_v55  ;;  %v818_v61 = vpop.f32.mrf.mxu1  ;;  %v730_v63 = vadd.f32 %v1684_v56, %v729_v60 }
 0x103   : > { %970 = vst [vmem:[%s1701_s21 + $0x50] sm:$0xff] %v906_v59  ;;  %v819_v0 = vadd.f32 %v818_v61, %v730_v63 }
 0x106   : > { %v1769_v1 = vpop.f32.mrf.mxu3 }
 0x108   : > { %v907_v2 = vpop.f32.mrf.mxu2  ;;  %v732_v4 = vpop.f32.mrf.mxu0 }
 0x109   : > { %v908_v3 = vadd.f32 %v907_v2, %v819_v0  ;;  %v733_v5 = vadd.f32 %v1684_v56, %v732_v4  ;;  %v821_v6 = vpop.f32.mrf.mxu1  ;;  %v768_v2 = vadd.f32 %v1684_v56, %v1717_v35 }
 0x10b   : > { %971 = vst [vmem:[%s1701_s21 + $0x58] sm:$0xff] %v908_v3  ;;  %v822_v7 = vadd.f32 %v821_v6, %v733_v5  ;;  %v857_v25 = vadd.f32 %v1765_v57, %v768_v2 }
 0x10e   : > { %v1773_v8 = vpop.f32.mrf.mxu3 }
 0x110   : > { %v910_v10 = vpop.f32.mrf.mxu2  ;;  %v734_v12 = vpop.f32.mrf.mxu0 }
 0x111   : > { %v911_v11 = vadd.f32 %v910_v10, %v822_v7  ;;  %v823_v13 = vpop.f32.mrf.mxu1  ;;  %v735_v15 = vadd.f32 %v1684_v56, %v734_v12  ;;  %v770_v12 = vadd.f32 %v1684_v56, %v1729_v50 }
 0x113   : > { %972 = vst [vmem:[%s1701_s21 + $0x60] sm:$0xff] %v911_v11  ;;  %v824_v16 = vadd.f32 %v823_v13, %v735_v15  ;;  %v859_v35 = vadd.f32 %v1769_v1, %v770_v12 }
 0x116   : > { %v1777_v17 = vpop.f32.mrf.mxu3 }
 0x118   : > { %v912_v18 = vpop.f32.mrf.mxu2  ;;  %v737_v20 = vpop.f32.mrf.mxu0 }
 0x119   : > { %v913_v19 = vadd.f32 %v912_v18, %v824_v16  ;;  %v738_v21 = vadd.f32 %v1684_v56, %v737_v20  ;;  %v826_v22 = vpop.f32.mrf.mxu1 }
 0x11b   : > { %973 = vst [vmem:[%s1701_s21 + $0x68] sm:$0xff] %v913_v19  ;;  %v827_v24 = vadd.f32 %v826_v22, %v738_v21  ;;  %v773_v22 = vadd.f32 %v1684_v56, %v1733_v62 }
 0x11d   : > { %v862_v50 = vadd.f32 %v1773_v8, %v773_v22 }
 0x11e   : > { %v1781_v23 = vpop.f32.mrf.mxu3 }
 0x120   : > { %v915_v27 = vpop.f32.mrf.mxu2  ;;  %v739_v29 = vpop.f32.mrf.mxu0 }
 0x121   : > { %v916_v28 = vadd.f32 %v915_v27, %v827_v24  ;;  %v828_v30 = vpop.f32.mrf.mxu1  ;;  %v740_v31 = vadd.f32 %v1684_v56, %v739_v29 }
 0x123   : > { %974 = vst [vmem:[%s1701_s21 + $0x70] sm:$0xff] %v916_v28  ;;  %v829_v32 = vadd.f32 %v828_v30, %v740_v31 }
 0x126   : > { %v1785_v34 = vpop.f32.mrf.mxu3 }
 0x128   : > { %v917_v36 = vpop.f32.mrf.mxu2  ;;  %v742_v38 = vpop.f32.mrf.mxu0 }
 0x129   : > { %v918_v37 = vadd.f32 %v917_v36, %v829_v32  ;;  %v743_v39 = vadd.f32 %v1684_v56, %v742_v38  ;;  %v831_v40 = vpop.f32.mrf.mxu1  ;;  %v775_v36 = vadd.f32 %v1684_v56, %v1745_v14 }
 0x12b   : > { %975 = vst [vmem:[%s1701_s21 + $0x78] sm:$0xff] %v918_v37  ;;  %v832_v43 = vadd.f32 %v831_v40, %v743_v39  ;;  %v864_v62 = vadd.f32 %v1777_v17, %v775_v36 }
 0x12e   : > { %v940_v45 = vpop.f32.mrf.mxu3 }
 0x12f   : > { %v941_v47 = vadd.f32 %v940_v45, %v852_v44  ;;  %v778_v44 = vadd.f32 %v1684_v56, %v1749_v26  ;;  %v869_v26 = vadd.f32 %v1785_v34, %v780_v54 }
 0x130   : > { %v920_v46 = vpop.f32.mrf.mxu2  ;;  %v744_v51 = vpop.f32.mrf.mxu0 }
 0x131   : > { %v921_v49 = vadd.f32 %v920_v46, %v832_v43  ;;  %984 = vst [vmem:[%s1701_s21 + $0xc0] sm:$0xff] %v941_v47  ;;  %v833_v52 = vpop.f32.mrf.mxu1  ;;  %v745_v53 = vadd.f32 %v1684_v56, %v744_v51  ;;  %v867_v14 = vadd.f32 %v1781_v23, %v778_v44 }
 0x133   : > { %976 = vst [vmem:[%s1701_s21 + $0x80] sm:$0xff] %v921_v49  ;;  %v834_v55 = vadd.f32 %v833_v52, %v745_v53 }
 0x136   : > { %v942_v58 = vpop.f32.mrf.mxu3 }
 0x137   : > { %v943_v59 = vadd.f32 %v942_v58, %v854_v9 }
 0x138   : > { %v922_v41 = vpop.f32.mrf.mxu2  ;;  %v747_v61 = vpop.f32.mrf.mxu0 }
 0x139   : > { %v923_v60 = vadd.f32 %v922_v41, %v834_v55  ;;  %985 = vst [vmem:[%s1701_s21 + $0xc8] sm:$0xff] %v943_v59  ;;  %v748_v63 = vadd.f32 %v1684_v56, %v747_v61  ;;  %v836_v0 = vpop.f32.mrf.mxu1 }
 0x13b   : > { %977 = vst [vmem:[%s1701_s21 + $0x88] sm:$0xff] %v923_v60  ;;  %v837_v3 = vadd.f32 %v836_v0, %v748_v63 }
 0x13e   : > { %v945_v48 = vpop.f32.mrf.mxu3 }
 0x13f   : > { %v946_v5 = vadd.f32 %v945_v48, %v857_v25 }
 0x140   : > { %v925_v4 = vpop.f32.mrf.mxu2  ;;  %v749_v7 = vpop.f32.mrf.mxu0 }
 0x141   : > { %v926_v6 = vadd.f32 %v925_v4, %v837_v3  ;;  %986 = vst [vmem:[%s1701_s21 + $0xd0] sm:$0xff] %v946_v5  ;;  %v838_v10 = vpop.f32.mrf.mxu1  ;;  %v750_v11 = vadd.f32 %v1684_v56, %v749_v7 }
 0x143   : > { %978 = vst [vmem:[%s1701_s21 + $0x90] sm:$0xff] %v926_v6  ;;  %v839_v13 = vadd.f32 %v838_v10, %v750_v11 }
 0x146   : > { %v947_v15 = vpop.f32.mrf.mxu3 }
 0x147   : > { %v948_v16 = vadd.f32 %v947_v15, %v859_v35 }
 0x148   : > { %v927_v57 = vpop.f32.mrf.mxu2  ;;  %v752_v19 = vpop.f32.mrf.mxu0 }
 0x149   : > { %v928_v18 = vadd.f32 %v927_v57, %v839_v13  ;;  %987 = vst [vmem:[%s1701_s21 + $0xd8] sm:$0xff] %v948_v16  ;;  %v753_v20 = vadd.f32 %v1684_v56, %v752_v19  ;;  %v841_v21 = vpop.f32.mrf.mxu1 }
 0x14b   : > { %979 = vst [vmem:[%s1701_s21 + $0x98] sm:$0xff] %v928_v18  ;;  %v842_v24 = vadd.f32 %v841_v21, %v753_v20 }
 0x14e   : > { %v950_v1 = vpop.f32.mrf.mxu3 }
 0x14f   : > { %v951_v28 = vadd.f32 %v950_v1, %v862_v50 }
 0x150   : > { %v930_v27 = vpop.f32.mrf.mxu2  ;;  %v754_v30 = vpop.f32.mrf.mxu0 }
 0x151   : > { %v931_v29 = vadd.f32 %v930_v27, %v842_v24  ;;  %988 = vst [vmem:[%s1701_s21 + $0xe0] sm:$0xff] %v951_v28  ;;  %v843_v31 = vpop.f32.mrf.mxu1  ;;  %v755_v32 = vadd.f32 %v1684_v56, %v754_v30 }
 0x153   : > { %980 = vst [vmem:[%s1701_s21 + $0xa0] sm:$0xff] %v931_v29  ;;  %v844_v37 = vadd.f32 %v843_v31, %v755_v32 }
 0x156   : > { %v952_v38 = vpop.f32.mrf.mxu3 }
 0x157   : > { %v953_v39 = vadd.f32 %v952_v38, %v864_v62 }
 0x158   : > { %v932_v8 = vpop.f32.mrf.mxu2  ;;  %v757_v42 = vpop.f32.mrf.mxu0 }
 0x159   : > { %v933_v40 = vadd.f32 %v932_v8, %v844_v37  ;;  %989 = vst [vmem:[%s1701_s21 + $0xe8] sm:$0xff] %v953_v39  ;;  %v758_v43 = vadd.f32 %v1684_v56, %v757_v42  ;;  %v846_v45 = vpop.f32.mrf.mxu1 }
 0x15b   : > { %981 = vst [vmem:[%s1701_s21 + $0xa8] sm:$0xff] %v933_v40  ;;  %v847_v46 = vadd.f32 %v846_v45, %v758_v43 }
 0x15e   : > { %v955_v17 = vpop.f32.mrf.mxu3 }
 0x15f   : > { %v956_v49 = vadd.f32 %v955_v17, %v867_v14 }
 0x160   : > { %v935_v47 = vpop.f32.mrf.mxu2  ;;  %v759_v52 = vpop.f32.mrf.mxu0 }
 0x161   : > { %v936_v51 = vadd.f32 %v935_v47, %v847_v46  ;;  %990 = vst [vmem:[%s1701_s21 + $0xf0] sm:$0xff] %v956_v49  ;;  %v760_v53 = vadd.f32 %v1684_v56, %v759_v52  ;;  %v848_v9 = vpop.f32.mrf.mxu1 }
 0x163   : > { %982 = vst [vmem:[%s1701_s21 + $0xb0] sm:$0xff] %v936_v51  ;;  %v849_v55 = vadd.f32 %v848_v9, %v760_v53 }
 0x166   : > { %v957_v58 = vpop.f32.mrf.mxu3 }
 0x167   : > { %v958_v41 = vadd.f32 %v957_v58, %v869_v26 }
 0x168   : > { %v937_v23 = vpop.f32.mrf.mxu2 }
 0x169   : > { %v938_v59 = vadd.f32 %v937_v23, %v849_v55  ;;  %991 = vst [vmem:[%s1701_s21 + $0xf8] sm:$0xff] %v958_v41 }
 0x16b   : > { %983 = vst [vmem:[%s1701_s21 + $0xb8] sm:$0xff] %v938_v59 }
 0x16c PF: > { %s13_s12 = sadd.s32 1, %s1459_s12  }
 0x16d   : > { %p10_p4 = scmp.ge.s32.totalorder %s13_s12, 4  }
 0x16f   :  { %12 = sbr.rel (!%p10_p4) target bundleno = 1 (0x1), region = 62 }

// kernel: generalized_rcnn_forward.19
= control target key start
LH: loop header
LB: loop body
LE: loop exit
PB: predicated region body
PF: predicated region fallthrough
CT: control target
= control target key end

     0   :  { %s739_s12 = smov 0   ;;  %s873_s0 = inlined_call_operand.vmem [shape: bf16[512,128], index: 0, kind: input, shape index: {}]   ;;  %s874_s1 = inlined_call_operand.vmem [shape: bf16[128,128], index: 1, kind: input, shape index: {}]   ;;  %s875_s2 = inlined_call_operand.vmem [shape: f32[1,128], index: 2, kind: input, shape index: {}]   ;;  %s876_s3 = inlined_call_operand.vmem [shape: f32[512,128], index: 3, kind: output, shape index: {}]  }
   0x1 LB: > { %s547_s13 = sadd.s32 4294967295, %s717_s12   ;;  %p551_p0 = scmp.ge.s32.totalorder %s717_s12, 1  ;;  %s717_s12 = sphi %s739_s12, %s13_s12  }
   0x2   : > { %p138_p1 = scmp.lt.s32.totalorder %s717_s12, 3 }
   0x4   : > { %p139_p2 = pnand %p551_p0, %p138_p1 }
   0x5   : > { %s552_s22 = sshll.u32 (!%p139_p2), %s547_s13, 5 }
   0x6   : > { %142 = sbr.rel (%p139_p2) target bundleno = 236 (0xec), region = 32  ;;  %p163_p3 = scmp.lt.s32.totalorder (!%p139_p2), %s552_s22, 63 }
   0xb   : > { %v677_v0 = vld [vmem:[%s874_s1 + $0x38] sm:$0xff]  ;;  %v676_v1 = vld [vmem:[%s874_s1 + $0x30] sm:$0xff]  ;;  %v675_v2 = vld [vmem:[%s874_s1 + $0x28] sm:$0xff]  ;;  %s878_s22 = smov (!%p163_p3, %s552_s22), 63 }
   0xc   : > { %370 = vmatpush.bf16.msra.mxu0 %v677_v0  ;;  %678 = vmatpush.bf16.msra.mxu1 %v677_v0  ;;  %v674_v3 = vld [vmem:[%s874_s1 + $0x20] sm:$0xff]  ;;  %v673_v4 = vld [vmem:[%s874_s1 + $0x18] sm:$0xff]  ;;  %v672_v5 = vld [vmem:[%s874_s1 + $0x10] sm:$0xff]  ;;  %s553_s29 = sshll.u32 %s878_s22, 2  ;;  %s555_s8 = sshll.u32 %s878_s22, 3 }
   0xd   : > { %679 = vmatpush.bf16.msra.mxu2 %v677_v0  ;;  %680 = vmatpush.bf16.msra.mxu3 %v677_v0  ;;  %v671_v6 = vld [vmem:[%s874_s1 + $0x8] sm:$0xff]  ;;  %v670_v7 = vld [vmem:[%s874_s1] sm:$0xff]  ;;  %s777_s7 = scalar_lea.vmem %s873_s0, %s553_s29  ;;  %s804_s14 = scalar_lea.vmem %s876_s3, %s555_s8 }
   0xe   : > { %v654_v8 = vld [vmem:[%s777_s7] sm:$0xff]  ;;  %v655_v12 = vld [vmem:[%s777_s7 + $0x8] sm:$0xff]  ;;  %v656_v16 = vld [vmem:[%s777_s7 + $0x10] sm:$0xff] }
   0xf   : > { %v658_v9 = vld [vmem:[%s777_s7 + $0x20] sm:$0xff]  ;;  %v659_v13 = vld [vmem:[%s777_s7 + $0x28] sm:$0xff]  ;;  %v660_v17 = vld [vmem:[%s777_s7 + $0x30] sm:$0xff] }
  0x10   : > { %371 = vmatpush.bf16.msra.mxu0 %v676_v1  ;;  %681 = vmatpush.bf16.msra.mxu1 %v676_v1  ;;  %v662_v10 = vld [vmem:[%s777_s7 + $0x40] sm:$0xff]  ;;  %v663_v14 = vld [vmem:[%s777_s7 + $0x48] sm:$0xff]  ;;  %v664_v18 = vld [vmem:[%s777_s7 + $0x50] sm:$0xff] }
  0x11   : > { %682 = vmatpush.bf16.msra.mxu2 %v676_v1  ;;  %683 = vmatpush.bf16.msra.mxu3 %v676_v1  ;;  %v666_v11 = vld [vmem:[%s777_s7 + $0x60] sm:$0xff]  ;;  %v667_v15 = vld [vmem:[%s777_s7 + $0x68] sm:$0xff]  ;;  %v668_v19 = vld [vmem:[%s777_s7 + $0x70] sm:$0xff] }
  0x12   : > { %v657_v20 = vld [vmem:[%s777_s7 + $0x18] sm:$0xff]  ;;  %v799_v24 = vld [vmem:[%s875_s2] ss:$0 sm:$0xff] }
  0x13   : > { %v661_v21 = vld [vmem:[%s777_s7 + $0x38] sm:$0xff] }
  0x14   : > { %372 = vmatpush.bf16.msra.mxu0 %v675_v2  ;;  %684 = vmatpush.bf16.msra.mxu1 %v675_v2  ;;  %v665_v22 = vld [vmem:[%s777_s7 + $0x58] sm:$0xff] }
  0x15   : > { %685 = vmatpush.bf16.msra.mxu2 %v675_v2  ;;  %686 = vmatpush.bf16.msra.mxu3 %v675_v2  ;;  %v669_v23 = vld [vmem:[%s777_s7 + $0x78] sm:$0xff] }
  0x18   : > { %373 = vmatpush.bf16.msra.mxu0 %v674_v3  ;;  %687 = vmatpush.bf16.msra.mxu1 %v674_v3 }
  0x19   : > { %688 = vmatpush.bf16.msra.mxu2 %v674_v3  ;;  %689 = vmatpush.bf16.msra.mxu3 %v674_v3 }
  0x1c   : > { %374 = vmatpush.bf16.msra.mxu0 %v673_v4  ;;  %690 = vmatpush.bf16.msra.mxu1 %v673_v4 }
  0x1d   : > { %691 = vmatpush.bf16.msra.mxu2 %v673_v4  ;;  %692 = vmatpush.bf16.msra.mxu3 %v673_v4 }
  0x20   : > { %375 = vmatpush.bf16.msra.mxu0 %v672_v5  ;;  %693 = vmatpush.bf16.msra.mxu1 %v672_v5 }
  0x21   : > { %694 = vmatpush.bf16.msra.mxu2 %v672_v5  ;;  %695 = vmatpush.bf16.msra.mxu3 %v672_v5 }
  0x24   : > { %376 = vmatpush.bf16.msra.mxu0 %v671_v6  ;;  %696 = vmatpush.bf16.msra.mxu1 %v671_v6 }
  0x25   : > { %697 = vmatpush.bf16.msra.mxu2 %v671_v6  ;;  %698 = vmatpush.bf16.msra.mxu3 %v671_v6 }
  0x28   : > { %377 = vmatpush.bf16.msra.mxu0 %v670_v7  ;;  %699 = vmatpush.bf16.msra.mxu1 %v670_v7 }
  0x29   : > { %700 = vmatpush.bf16.msra.mxu2 %v670_v7  ;;  %701 = vmatpush.bf16.msra.mxu3 %v670_v7 }
  0x2b   : > { %378 = vmatmul.bf16.vlgmr.msra.gmra.mxu0 %v654_v8  ;;  %398 = vmatmul.bf16.vlgmr.msra.gmra.mxu1 %v658_v9 }
  0x2c   : > { %418 = vmatmul.bf16.vlgmr.msra.gmra.mxu2 %v662_v10  ;;  %438 = vmatmul.bf16.vlgmr.msra.gmra.mxu3 %v666_v11 }
  0x3b   : > { %383 = vmatmul.bf16.gmra.mxu0 %v655_v12  ;;  %403 = vmatmul.bf16.gmra.mxu1 %v659_v13 }
  0x3c   : > { %423 = vmatmul.bf16.gmra.mxu2 %v663_v14  ;;  %443 = vmatmul.bf16.gmra.mxu3 %v667_v15 }
  0x4b   : > { %388 = vmatmul.bf16.gmra.mxu0 %v656_v16  ;;  %408 = vmatmul.bf16.gmra.mxu1 %v660_v17 }
  0x4c   : > { %428 = vmatmul.bf16.gmra.mxu2 %v664_v18  ;;  %448 = vmatmul.bf16.gmra.mxu3 %v668_v19 }
  0x5b   : > { %393 = vmatmul.bf16.gmra.mxu0 %v657_v20  ;;  %413 = vmatmul.bf16.gmra.mxu1 %v661_v21 }
  0x5c   : > { %433 = vmatmul.bf16.gmra.mxu2 %v665_v22  ;;  %453 = vmatmul.bf16.gmra.mxu3 %v669_v23 }
  0xa8   : > { %v379_v25 = vpop.f32.mrf.mxu0  ;;  %v399_v26 = vpop.f32.mrf.mxu1 }
  0xa9   : > { %v380_v27 = vadd.f32 %v799_v24, %v379_v25  ;;  %v400_v28 = vadd.f32 %v799_v24, %v399_v26 }
  0xab   : > { %459 = vst [vmem:[%s804_s14] sm:$0xff] %v380_v27 }
  0xac   : > { %467 = vst [vmem:[%s804_s14 + $0x40] sm:$0xff] %v400_v28 }
  0xaf   : > { %v419_v29 = vpop.f32.mrf.mxu2  ;;  %v439_v30 = vpop.f32.mrf.mxu3 }
  0xb0   : > { %v420_v31 = vadd.f32 %v799_v24, %v419_v29  ;;  %v440_v32 = vadd.f32 %v799_v24, %v439_v30  ;;  %v381_v33 = vpop.f32.mrf.mxu0  ;;  %v401_v34 = vpop.f32.mrf.mxu1 }
  0xb1   : > { %v382_v35 = vadd.f32 %v799_v24, %v381_v33  ;;  %v402_v36 = vadd.f32 %v799_v24, %v401_v34 }
  0xb2   : > { %475 = vst [vmem:[%s804_s14 + $0x80] sm:$0xff] %v420_v31 }
  0xb3   : > { %483 = vst [vmem:[%s804_s14 + $0xc0] sm:$0xff] %v440_v32 }
  0xb4   : > { %460 = vst [vmem:[%s804_s14 + $0x8] sm:$0xff] %v382_v35 }
  0xb5   : > { %468 = vst [vmem:[%s804_s14 + $0x48] sm:$0xff] %v402_v36 }
  0xb7   : > { %v421_v37 = vpop.f32.mrf.mxu2  ;;  %v441_v38 = vpop.f32.mrf.mxu3 }
  0xb8   : > { %v422_v39 = vadd.f32 %v799_v24, %v421_v37  ;;  %v442_v40 = vadd.f32 %v799_v24, %v441_v38  ;;  %v384_v41 = vpop.f32.mrf.mxu0  ;;  %v404_v42 = vpop.f32.mrf.mxu1 }
  0xb9   : > { %v385_v43 = vadd.f32 %v799_v24, %v384_v41  ;;  %v405_v44 = vadd.f32 %v799_v24, %v404_v42 }
  0xba   : > { %476 = vst [vmem:[%s804_s14 + $0x88] sm:$0xff] %v422_v39 }
  0xbb   : > { %484 = vst [vmem:[%s804_s14 + $0xc8] sm:$0xff] %v442_v40 }
  0xbc   : > { %461 = vst [vmem:[%s804_s14 + $0x10] sm:$0xff] %v385_v43 }
  0xbd   : > { %469 = vst [vmem:[%s804_s14 + $0x50] sm:$0xff] %v405_v44 }
  0xbf   : > { %v424_v45 = vpop.f32.mrf.mxu2  ;;  %v444_v46 = vpop.f32.mrf.mxu3 }
  0xc0   : > { %v425_v47 = vadd.f32 %v799_v24, %v424_v45  ;;  %v445_v48 = vadd.f32 %v799_v24, %v444_v46  ;;  %v386_v49 = vpop.f32.mrf.mxu0  ;;  %v406_v50 = vpop.f32.mrf.mxu1 }
  0xc1   : > { %v387_v51 = vadd.f32 %v799_v24, %v386_v49  ;;  %v407_v52 = vadd.f32 %v799_v24, %v406_v50 }
  0xc2   : > { %477 = vst [vmem:[%s804_s14 + $0x90] sm:$0xff] %v425_v47 }
  0xc3   : > { %485 = vst [vmem:[%s804_s14 + $0xd0] sm:$0xff] %v445_v48 }
  0xc4   : > { %462 = vst [vmem:[%s804_s14 + $0x18] sm:$0xff] %v387_v51 }
  0xc5   : > { %470 = vst [vmem:[%s804_s14 + $0x58] sm:$0xff] %v407_v52 }
  0xc7   : > { %v426_v53 = vpop.f32.mrf.mxu2  ;;  %v446_v54 = vpop.f32.mrf.mxu3 }
  0xc8   : > { %v427_v55 = vadd.f32 %v799_v24, %v426_v53  ;;  %v447_v56 = vadd.f32 %v799_v24, %v446_v54  ;;  %v389_v57 = vpop.f32.mrf.mxu0  ;;  %v409_v58 = vpop.f32.mrf.mxu1 }
  0xc9   : > { %v390_v59 = vadd.f32 %v799_v24, %v389_v57  ;;  %v410_v60 = vadd.f32 %v799_v24, %v409_v58 }
  0xca   : > { %478 = vst [vmem:[%s804_s14 + $0x98] sm:$0xff] %v427_v55 }
  0xcb   : > { %486 = vst [vmem:[%s804_s14 + $0xd8] sm:$0xff] %v447_v56 }
  0xcc   : > { %463 = vst [vmem:[%s804_s14 + $0x20] sm:$0xff] %v390_v59 }
  0xcd   : > { %471 = vst [vmem:[%s804_s14 + $0x60] sm:$0xff] %v410_v60 }
  0xcf   : > { %v429_v61 = vpop.f32.mrf.mxu2  ;;  %v449_v62 = vpop.f32.mrf.mxu3 }
  0xd0   : > { %v430_v63 = vadd.f32 %v799_v24, %v429_v61  ;;  %v450_v0 = vadd.f32 %v799_v24, %v449_v62  ;;  %v391_v1 = vpop.f32.mrf.mxu0  ;;  %v411_v2 = vpop.f32.mrf.mxu1 }
  0xd1   : > { %v392_v3 = vadd.f32 %v799_v24, %v391_v1  ;;  %v412_v4 = vadd.f32 %v799_v24, %v411_v2 }
  0xd2   : > { %479 = vst [vmem:[%s804_s14 + $0xa0] sm:$0xff] %v430_v63 }
  0xd3   : > { %487 = vst [vmem:[%s804_s14 + $0xe0] sm:$0xff] %v450_v0 }
  0xd4   : > { %464 = vst [vmem:[%s804_s14 + $0x28] sm:$0xff] %v392_v3 }
  0xd5   : > { %472 = vst [vmem:[%s804_s14 + $0x68] sm:$0xff] %v412_v4 }
  0xd7   : > { %v431_v5 = vpop.f32.mrf.mxu2  ;;  %v451_v6 = vpop.f32.mrf.mxu3 }
  0xd8   : > { %v432_v7 = vadd.f32 %v799_v24, %v431_v5  ;;  %v452_v8 = vadd.f32 %v799_v24, %v451_v6  ;;  %v394_v9 = vpop.f32.mrf.mxu0  ;;  %v414_v10 = vpop.f32.mrf.mxu1 }
  0xd9   : > { %v395_v11 = vadd.f32 %v799_v24, %v394_v9  ;;  %v415_v12 = vadd.f32 %v799_v24, %v414_v10 }
  0xda   : > { %480 = vst [vmem:[%s804_s14 + $0xa8] sm:$0xff] %v432_v7 }
  0xdb   : > { %488 = vst [vmem:[%s804_s14 + $0xe8] sm:$0xff] %v452_v8 }
  0xdc   : > { %465 = vst [vmem:[%s804_s14 + $0x30] sm:$0xff] %v395_v11 }
  0xdd   : > { %473 = vst [vmem:[%s804_s14 + $0x70] sm:$0xff] %v415_v12 }
  0xdf   : > { %v434_v13 = vpop.f32.mrf.mxu2  ;;  %v454_v14 = vpop.f32.mrf.mxu3 }
  0xe0   : > { %v435_v15 = vadd.f32 %v799_v24, %v434_v13  ;;  %v455_v16 = vadd.f32 %v799_v24, %v454_v14  ;;  %v396_v17 = vpop.f32.mrf.mxu0  ;;  %v416_v18 = vpop.f32.mrf.mxu1 }
  0xe1   : > { %v397_v19 = vadd.f32 %v799_v24, %v396_v17  ;;  %v417_v20 = vadd.f32 %v799_v24, %v416_v18 }
  0xe2   : > { %481 = vst [vmem:[%s804_s14 + $0xb0] sm:$0xff] %v435_v15 }
  0xe3   : > { %489 = vst [vmem:[%s804_s14 + $0xf0] sm:$0xff] %v455_v16 }
  0xe4   : > { %466 = vst [vmem:[%s804_s14 + $0x38] sm:$0xff] %v397_v19 }
  0xe5   : > { %474 = vst [vmem:[%s804_s14 + $0x78] sm:$0xff] %v417_v20 }
  0xe7   : > { %v436_v21 = vpop.f32.mrf.mxu2  ;;  %v456_v22 = vpop.f32.mrf.mxu3 }
  0xe8   : > { %v437_v23 = vadd.f32 %v799_v24, %v436_v21  ;;  %v457_v25 = vadd.f32 %v799_v24, %v456_v22 }
  0xea   : > { %482 = vst [vmem:[%s804_s14 + $0xb8] sm:$0xff] %v437_v23 }
  0xeb   : > { %490 = vst [vmem:[%s804_s14 + $0xf8] sm:$0xff] %v457_v25 }
  0xec PF: > { %s13_s12 = sadd.s32 1, %s717_s12  }
  0xed   : > { %p10_p4 = scmp.ge.s32.totalorder %s13_s12, 4  }
  0xef   :  { %12 = sbr.rel (!%p10_p4) target bundleno = 1 (0x1), region = 62 }

// kernel: generalized_rcnn_forward.11
= control target key start
LH: loop header
LB: loop body
LE: loop exit
PB: predicated region body
PF: predicated region fallthrough
CT: control target
= control target key end

     0   :  { %s1175_s1 = inlined_call_operand.vmem [shape: bf16[384,128], index: 1, kind: input, shape index: {}]   ;;  %s1176_s2 = inlined_call_operand.vmem [shape: f32[1,128], index: 2, kind: input, shape index: {}]   ;;  %s1177_s0 = inlined_call_operand.vmem [shape: bf16[128,384], index: 0, kind: input, shape index: {}]   ;;  %s1178_s3 = inlined_call_operand.vmem [shape: f32[128,128], index: 3, kind: output, shape index: {}]  }
   0x1   :  { %v776_v0 = vld [vmem:[%s1175_s1 + $0x38] sm:$0xff]  ;;  %v775_v3 = vld [vmem:[%s1175_s1 + $0x30] sm:$0xff]  ;;  %v774_v6 = vld [vmem:[%s1175_s1 + $0x28] sm:$0xff] }
   0x2   :  { %v844_v1 = vld [vmem:[%s1175_s1 + $0x78] sm:$0xff]  ;;  %370 = vmatpush.bf16.msra.mxu0 %v776_v0  ;;  %793 = vmatpush.bf16.msra.mxu3 %v776_v0  ;;  %v859_v4 = vld [vmem:[%s1175_s1 + $0x70] sm:$0xff]  ;;  %v782_v7 = vld [vmem:[%s1175_s1 + $0x68] sm:$0xff] }
   0x3   :  { %v849_v2 = vld [vmem:[%s1175_s1 + $0xb8] sm:$0xff]  ;;  %419 = vmatpush.bf16.msra.mxu1 %v844_v1  ;;  %v864_v5 = vld [vmem:[%s1175_s1 + $0xb0] sm:$0xff]  ;;  %v877_v8 = vld [vmem:[%s1175_s1 + $0xa8] sm:$0xff] }
   0x4   :  { %468 = vmatpush.bf16.msra.mxu2 %v849_v2  ;;  %v773_v9 = vld [vmem:[%s1175_s1 + $0x20] sm:$0xff]  ;;  %v772_v12 = vld [vmem:[%s1175_s1 + $0x18] sm:$0xff]  ;;  %v771_v15 = vld [vmem:[%s1175_s1 + $0x10] sm:$0xff] }
   0x5   :  { %v781_v10 = vld [vmem:[%s1175_s1 + $0x60] sm:$0xff]  ;;  %v780_v13 = vld [vmem:[%s1175_s1 + $0x58] sm:$0xff]  ;;  %v779_v16 = vld [vmem:[%s1175_s1 + $0x50] sm:$0xff] }
   0x6   :  { %371 = vmatpush.bf16.msra.mxu0 %v775_v3  ;;  %794 = vmatpush.bf16.msra.mxu3 %v775_v3  ;;  %v889_v11 = vld [vmem:[%s1175_s1 + $0xa0] sm:$0xff]  ;;  %v901_v14 = vld [vmem:[%s1175_s1 + $0x98] sm:$0xff]  ;;  %v913_v17 = vld [vmem:[%s1175_s1 + $0x90] sm:$0xff] }
   0x7   :  { %420 = vmatpush.bf16.msra.mxu1 %v859_v4  ;;  %v770_v18 = vld [vmem:[%s1175_s1 + $0x8] sm:$0xff]  ;;  %v769_v21 = vld [vmem:[%s1175_s1] sm:$0xff]  ;;  %v627_v26 = vld [vmem:[%s1177_s0 + $0x90] sm:$0xf] }
   0x8   :  { %469 = vmatpush.bf16.msra.mxu2 %v864_v5  ;;  %v778_v19 = vld [vmem:[%s1175_s1 + $0x48] sm:$0xff]  ;;  %v777_v22 = vld [vmem:[%s1175_s1 + $0x40] sm:$0xff]  ;;  %v764_v27 = vld [vmem:[%s1177_s0 + $0x98] sm:$0xf0] }
   0x9   :  { %v925_v20 = vld [vmem:[%s1175_s1 + $0x88] sm:$0xff]  ;;  %v936_v23 = vld [vmem:[%s1175_s1 + $0x80] sm:$0xff]  ;;  %v557_v29 = vld [vmem:[%s1177_s0 + $0xc] sm:$0xf0]  ;;  %v628_v33 = vor.u32 %v764_v27, %v627_v26 }
   0xa   :  { %372 = vmatpush.bf16.msra.mxu0 %v774_v6  ;;  %795 = vmatpush.bf16.msra.mxu3 %v774_v6  ;;  %v555_v24 = vld [vmem:[%s1177_s0] sm:$0xf]  ;;  %v746_v25 = vld [vmem:[%s1177_s0 + $0x8] sm:$0xf0]  ;;  %v745_v28 = vld [vmem:[%s1177_s0 + $0x4] sm:$0xf] }
   0xb   :  { %421 = vmatpush.bf16.msra.mxu1 %v782_v7  ;;  %v563_v30 = vld [vmem:[%s1177_s0 + $0x8] sm:$0xf]  ;;  %v747_v31 = vld [vmem:[%s1177_s0 + $0x10] sm:$0xf0]  ;;  %v556_v32 = vor.u32 %v746_v25, %v555_v24  ;;  %v560_v34 = vor.u32 %v745_v28, %v557_v29  ;;  %v567_v36 = vld [vmem:[%s1177_s0 + $0x18] sm:$0xf] }
   0xc   :  { %470 = vmatpush.bf16.msra.mxu2 %v877_v8  ;;  %v564_v35 = vor.u32 %v747_v31, %v563_v30  ;;  %v749_v37 = vld [vmem:[%s1177_s0 + $0x20] sm:$0xf0]  ;;  %v639_v38 = vld [vmem:[%s1177_s0 + $0xa8] sm:$0xf]  ;;  %v767_v39 = vld [vmem:[%s1177_s0 + $0xb0] sm:$0xf0] }
   0xd   :  { %v748_v40 = vld [vmem:[%s1177_s0 + $0x1c] sm:$0xf]  ;;  %v569_v41 = vld [vmem:[%s1177_s0 + $0x24] sm:$0xf0]  ;;  %v575_v42 = vld [vmem:[%s1177_s0 + $0x20] sm:$0xf]  ;;  %v568_v44 = vor.u32 %v749_v37, %v567_v36  ;;  %v640_v45 = vor.u32 %v767_v39, %v639_v38 }
   0xe   :  { %373 = vmatpush.bf16.msra.mxu0 %v773_v9  ;;  %796 = vmatpush.bf16.msra.mxu3 %v773_v9  ;;  %v750_v43 = vld [vmem:[%s1177_s0 + $0x28] sm:$0xf0]  ;;  %v572_v46 = vor.u32 %v748_v40, %v569_v41  ;;  %v579_v48 = vld [vmem:[%s1177_s0 + $0x30] sm:$0xf]  ;;  %v752_v49 = vld [vmem:[%s1177_s0 + $0x38] sm:$0xf0] }
   0xf   :  { %422 = vmatpush.bf16.msra.mxu1 %v781_v10  ;;  %v576_v47 = vor.u32 %v750_v43, %v575_v42  ;;  %v751_v50 = vld [vmem:[%s1177_s0 + $0x34] sm:$0xf]  ;;  %v629_v52 = vld [vmem:[%s1177_s0 + $0x9c] sm:$0xf0]  ;;  %v587_v54 = vld [vmem:[%s1177_s0 + $0x38] sm:$0xf]  ;;  %v580_v56 = vor.u32 %v752_v49, %v579_v48 }
  0x10   :  { %471 = vmatpush.bf16.msra.mxu2 %v889_v11  ;;  %v763_v51 = vld [vmem:[%s1177_s0 + $0x94] sm:$0xf]  ;;  %v581_v53 = vld [vmem:[%s1177_s0 + $0x3c] sm:$0xf0]  ;;  %v753_v55 = vld [vmem:[%s1177_s0 + $0x40] sm:$0xf0] }
  0x11   :  { %v632_v57 = vor.u32 %v763_v51, %v629_v52  ;;  %v584_v58 = vor.u32 %v751_v50, %v581_v53  ;;  %v588_v59 = vor.u32 %v753_v55, %v587_v54  ;;  %v591_v60 = vld [vmem:[%s1177_s0 + $0x48] sm:$0xf]  ;;  %v755_v61 = vld [vmem:[%s1177_s0 + $0x50] sm:$0xf0]  ;;  %v754_v62 = vld [vmem:[%s1177_s0 + $0x4c] sm:$0xf] }
  0x12   :  { %374 = vmatpush.bf16.msra.mxu0 %v772_v12  ;;  %797 = vmatpush.bf16.msra.mxu3 %v772_v12  ;;  %v766_v63 = vld [vmem:[%s1177_s0 + $0xac] sm:$0xf]  ;;  %v641_v0 = vld [vmem:[%s1177_s0 + $0xb4] sm:$0xf0]  ;;  %v756_v3 = vld [vmem:[%s1177_s0 + $0x58] sm:$0xf0] }
  0x13   :  { %423 = vmatpush.bf16.msra.mxu1 %v780_v13  ;;  %v758_v9 = vld [vmem:[%s1177_s0 + $0x68] sm:$0xf0]  ;;  %v765_v12 = vld [vmem:[%s1177_s0 + $0xa0] sm:$0xf0]  ;;  %v768_v24 = vld [vmem:[%s1177_s0 + $0xb8] sm:$0xf0] }
  0x14   :  { %472 = vmatpush.bf16.msra.mxu2 %v901_v14  ;;  %v617_v25 = vld [vmem:[%s1177_s0 + $0x84] sm:$0xf0]  ;;  %v623_v26 = vld [vmem:[%s1177_s0 + $0x80] sm:$0xf]  ;;  %v762_v27 = vld [vmem:[%s1177_s0 + $0x88] sm:$0xf0] }
  0x15   :  { %v624_v31 = vor.u32 %v762_v27, %v623_v26 }
  0x16   :  { %375 = vmatpush.bf16.msra.mxu0 %v771_v15  ;;  %798 = vmatpush.bf16.msra.mxu3 %v771_v15  ;;  %v759_v15 = vld [vmem:[%s1177_s0 + $0x70] sm:$0xf0] }
  0x17   :  { %424 = vmatpush.bf16.msra.mxu1 %v779_v16 }
  0x18   :  { %473 = vmatpush.bf16.msra.mxu2 %v913_v17 }
  0x1a   :  { %376 = vmatpush.bf16.msra.mxu0 %v770_v18  ;;  %799 = vmatpush.bf16.msra.mxu3 %v770_v18 }
  0x1b   :  { %425 = vmatpush.bf16.msra.mxu1 %v778_v19 }
  0x1c   :  { %474 = vmatpush.bf16.msra.mxu2 %v925_v20 }
  0x1e   :  { %377 = vmatpush.bf16.msra.mxu0 %v769_v21  ;;  %800 = vmatpush.bf16.msra.mxu3 %v769_v21  ;;  %v761_v21 = vld [vmem:[%s1177_s0 + $0x80] sm:$0xf0] }
  0x1f   :  { %426 = vmatpush.bf16.msra.mxu1 %v777_v22 }
  0x20   :  { %475 = vmatpush.bf16.msra.mxu2 %v936_v23 }
  0x21   :  { %378 = vmatmul.bf16.vlgmr.msra.gmra.mxu0 %v556_v32  ;;  %408 = vmatmul.bf16.vlgmr.msra.gmra.mxu3 %v628_v33  ;;  %v1097_v32 = vld [vmem:[%s1176_s2] ss:$0 sm:$0xff] }
  0x22   :  { %801 = vmatpush.bf16.msrb.mxu3 %v844_v1  ;;  %427 = vmatmul.bf16.vlgmr.msra.gmra.mxu1 %v560_v34  ;;  %v593_v1 = vld [vmem:[%s1177_s0 + $0x54] sm:$0xf0] }
  0x23   :  { %476 = vmatmul.bf16.vlgmr.msra.gmra.mxu2 %v564_v35  ;;  %v596_v6 = vor.u32 %v754_v62, %v593_v1 }
  0x26   :  { %802 = vmatpush.bf16.msrb.mxu3 %v859_v4  ;;  %v592_v4 = vor.u32 %v755_v61, %v591_v60 }
  0x2a   :  { %803 = vmatpush.bf16.msrb.mxu3 %v782_v7 }
  0x2e   :  { %804 = vmatpush.bf16.msrb.mxu3 %v781_v10  ;;  %v757_v10 = vld [vmem:[%s1177_s0 + $0x64] sm:$0xf] }
  0x31   :  { %383 = vmatmul.bf16.gmra.mxu0 %v568_v44  ;;  %413 = vmatmul.bf16.gmra.mxu3 %v640_v45 }
  0x32   :  { %805 = vmatpush.bf16.msrb.mxu3 %v780_v13  ;;  %432 = vmatmul.bf16.gmra.mxu1 %v572_v46  ;;  %v605_v13 = vld [vmem:[%s1177_s0 + $0x6c] sm:$0xf0] }
  0x33   :  { %481 = vmatmul.bf16.gmra.mxu2 %v576_v47  ;;  %v608_v18 = vor.u32 %v757_v10, %v605_v13 }
  0x36   :  { %806 = vmatpush.bf16.msrb.mxu3 %v779_v16 }
  0x3a   :  { %807 = vmatpush.bf16.msrb.mxu3 %v778_v19 }
  0x3e   :  { %808 = vmatpush.bf16.msrb.mxu3 %v777_v22  ;;  %v760_v22 = vld [vmem:[%s1177_s0 + $0x7c] sm:$0xf] }
  0x3f   :  { %v620_v30 = vor.u32 %v760_v22, %v617_v25 }
  0x41   :  { %388 = vmatmul.bf16.gmra.mxu0 %v580_v56  ;;  %457 = vmatmul.bf16.vlgmr.msrb.gmra.mxu3 %v632_v57 }
  0x42   :  { %809 = vmatpush.bf16.msra.mxu3 %v849_v2  ;;  %437 = vmatmul.bf16.gmra.mxu1 %v584_v58  ;;  %v599_v2 = vld [vmem:[%s1177_s0 + $0x50] sm:$0xf] }
  0x43   :  { %486 = vmatmul.bf16.gmra.mxu2 %v588_v59  ;;  %v600_v7 = vor.u32 %v756_v3, %v599_v2 }
  0x46   :  { %810 = vmatpush.bf16.msra.mxu3 %v864_v5  ;;  %v644_v5 = vor.u32 %v766_v63, %v641_v0 }
  0x4a   :  { %811 = vmatpush.bf16.msra.mxu3 %v877_v8  ;;  %v603_v8 = vld [vmem:[%s1177_s0 + $0x60] sm:$0xf] }
  0x4b   :  { %v604_v16 = vor.u32 %v758_v9, %v603_v8 }
  0x4e   :  { %812 = vmatpush.bf16.msra.mxu3 %v889_v11  ;;  %v635_v11 = vld [vmem:[%s1177_s0 + $0x98] sm:$0xf] }
  0x51   :  { %393 = vmatmul.bf16.gmra.mxu0 %v592_v4  ;;  %462 = vmatmul.bf16.gmra.mxu3 %v644_v5 }
  0x52   :  { %813 = vmatpush.bf16.msra.mxu3 %v901_v14  ;;  %442 = vmatmul.bf16.gmra.mxu1 %v596_v6  ;;  %v611_v14 = vld [vmem:[%s1177_s0 + $0x68] sm:$0xf] }
  0x53   :  { %491 = vmatmul.bf16.gmra.mxu2 %v600_v7  ;;  %v612_v19 = vor.u32 %v759_v15, %v611_v14 }
  0x56   :  { %814 = vmatpush.bf16.msra.mxu3 %v913_v17  ;;  %v636_v17 = vor.u32 %v765_v12, %v635_v11 }
  0x5a   :  { %815 = vmatpush.bf16.msra.mxu3 %v925_v20  ;;  %v615_v20 = vld [vmem:[%s1177_s0 + $0x78] sm:$0xf] }
  0x5b   :  { %v616_v28 = vor.u32 %v761_v21, %v615_v20 }
  0x5e   :  { %816 = vmatpush.bf16.msra.mxu3 %v936_v23  ;;  %v647_v23 = vld [vmem:[%s1177_s0 + $0xb0] sm:$0xf] }
  0x5f   :  { %v648_v29 = vor.u32 %v768_v24, %v647_v23 }
  0x61   :  { %398 = vmatmul.bf16.gmra.mxu0 %v604_v16  ;;  %506 = vmatmul.bf16.vlgmr.msra.gmra.mxu3 %v636_v17 }
  0x62   :  { %447 = vmatmul.bf16.gmra.mxu1 %v608_v18 }
  0x63   :  { %496 = vmatmul.bf16.gmra.mxu2 %v612_v19 }
  0x71   :  { %403 = vmatmul.bf16.gmra.mxu0 %v616_v28  ;;  %511 = vmatmul.bf16.gmra.mxu3 %v648_v29 }
  0x72   :  { %452 = vmatmul.bf16.gmra.mxu1 %v620_v30 }
  0x73   :  { %501 = vmatmul.bf16.gmra.mxu2 %v624_v31 }
  0x9e   :  { %v379_v33 = vpop.f32.mrf.mxu0 }
  0x9f   :  { %v380_v34 = vadd.f32 %v1097_v32, %v379_v33  ;;  %v428_v35 = vpop.f32.mrf.mxu1 }
  0xa1   :  { %v429_v36 = vadd.f32 %v428_v35, %v380_v34 }
  0xa4   :  { %v1100_v37 = vpop.f32.mrf.mxu3 }
  0xa6   :  { %v477_v38 = vpop.f32.mrf.mxu2  ;;  %v381_v40 = vpop.f32.mrf.mxu0 }
  0xa7   :  { %v478_v39 = vadd.f32 %v477_v38, %v429_v36  ;;  %v430_v41 = vpop.f32.mrf.mxu1  ;;  %v382_v43 = vadd.f32 %v1097_v32, %v381_v40  ;;  %v410_v38 = vadd.f32 %v1097_v32, %v1100_v37 }
  0xa9   :  { %v517_v42 = vmax.f32 %v478_v39, 0.0  ;;  %v431_v44 = vadd.f32 %v430_v41, %v382_v43 }
  0xab   :  { %533 = vst [vmem:[%s1178_s3] sm:$0xff] %v517_v42 }
  0xac   :  { %v1106_v45 = vpop.f32.mrf.mxu3 }
  0xae   :  { %v479_v46 = vpop.f32.mrf.mxu2  ;;  %v384_v48 = vpop.f32.mrf.mxu0 }
  0xaf   :  { %v480_v47 = vadd.f32 %v479_v46, %v431_v44  ;;  %v385_v49 = vadd.f32 %v1097_v32, %v384_v48  ;;  %v433_v50 = vpop.f32.mrf.mxu1 }
  0xb1   :  { %v518_v51 = vmax.f32 %v480_v47, 0.0  ;;  %v434_v52 = vadd.f32 %v433_v50, %v385_v49 }
  0xb3   :  { %534 = vst [vmem:[%s1178_s3 + $0x8] sm:$0xff] %v518_v51  ;;  %v412_v51 = vadd.f32 %v1097_v32, %v1106_v45 }
  0xb4   :  { %v1112_v53 = vpop.f32.mrf.mxu3 }
  0xb5   :  { %v415_v45 = vadd.f32 %v1097_v32, %v1112_v53 }
  0xb6   :  { %v482_v54 = vpop.f32.mrf.mxu2  ;;  %v386_v56 = vpop.f32.mrf.mxu0 }
  0xb7   :  { %v483_v55 = vadd.f32 %v482_v54, %v434_v52  ;;  %v435_v57 = vpop.f32.mrf.mxu1  ;;  %v387_v59 = vadd.f32 %v1097_v32, %v386_v56 }
  0xb9   :  { %v519_v58 = vmax.f32 %v483_v55, 0.0  ;;  %v436_v60 = vadd.f32 %v435_v57, %v387_v59 }
  0xbb   :  { %535 = vst [vmem:[%s1178_s3 + $0x10] sm:$0xff] %v519_v58 }
  0xbc   :  { %v1118_v61 = vpop.f32.mrf.mxu3 }
  0xbe   :  { %v484_v62 = vpop.f32.mrf.mxu2  ;;  %v389_v0 = vpop.f32.mrf.mxu0 }
  0xbf   :  { %v485_v63 = vadd.f32 %v484_v62, %v436_v60  ;;  %v390_v1 = vadd.f32 %v1097_v32, %v389_v0  ;;  %v438_v2 = vpop.f32.mrf.mxu1 }
  0xc1   :  { %v520_v3 = vmax.f32 %v485_v63, 0.0  ;;  %v439_v4 = vadd.f32 %v438_v2, %v390_v1 }
  0xc3   :  { %536 = vst [vmem:[%s1178_s3 + $0x18] sm:$0xff] %v520_v3 }
  0xc4   :  { %v458_v5 = vpop.f32.mrf.mxu3 }
  0xc5   :  { %v459_v40 = vadd.f32 %v458_v5, %v410_v38 }
  0xc6   :  { %v487_v6 = vpop.f32.mrf.mxu2  ;;  %v391_v8 = vpop.f32.mrf.mxu0 }
  0xc7   :  { %v488_v7 = vadd.f32 %v487_v6, %v439_v4  ;;  %v440_v9 = vpop.f32.mrf.mxu1  ;;  %v392_v11 = vadd.f32 %v1097_v32, %v391_v8 }
  0xc9   :  { %v521_v10 = vmax.f32 %v488_v7, 0.0  ;;  %v441_v12 = vadd.f32 %v440_v9, %v392_v11  ;;  %v417_v9 = vadd.f32 %v1097_v32, %v1118_v61 }
  0xcb   :  { %537 = vst [vmem:[%s1178_s3 + $0x20] sm:$0xff] %v521_v10 }
  0xcc   :  { %v460_v13 = vpop.f32.mrf.mxu3 }
  0xcd   :  { %v461_v37 = vadd.f32 %v460_v13, %v412_v51 }
  0xce   :  { %v489_v14 = vpop.f32.mrf.mxu2  ;;  %v394_v16 = vpop.f32.mrf.mxu0 }
  0xcf   :  { %v490_v15 = vadd.f32 %v489_v14, %v441_v12  ;;  %v395_v17 = vadd.f32 %v1097_v32, %v394_v16  ;;  %v443_v18 = vpop.f32.mrf.mxu1 }
  0xd1   :  { %v522_v19 = vmax.f32 %v490_v15, 0.0  ;;  %v444_v20 = vadd.f32 %v443_v18, %v395_v17 }
  0xd3   :  { %538 = vst [vmem:[%s1178_s3 + $0x28] sm:$0xff] %v522_v19 }
  0xd4   :  { %v463_v21 = vpop.f32.mrf.mxu3 }
  0xd5   :  { %v464_v1 = vadd.f32 %v463_v21, %v415_v45 }
  0xd6   :  { %v492_v22 = vpop.f32.mrf.mxu2  ;;  %v396_v24 = vpop.f32.mrf.mxu0 }
  0xd7   :  { %v493_v23 = vadd.f32 %v492_v22, %v444_v20  ;;  %v445_v25 = vpop.f32.mrf.mxu1  ;;  %v397_v27 = vadd.f32 %v1097_v32, %v396_v24 }
  0xd9   :  { %v523_v26 = vmax.f32 %v493_v23, 0.0  ;;  %v446_v28 = vadd.f32 %v445_v25, %v397_v27 }
  0xdb   :  { %539 = vst [vmem:[%s1178_s3 + $0x30] sm:$0xff] %v523_v26 }
  0xdc   :  { %v465_v29 = vpop.f32.mrf.mxu3 }
  0xdd   :  { %v466_v10 = vadd.f32 %v465_v29, %v417_v9 }
  0xde   :  { %v494_v30 = vpop.f32.mrf.mxu2  ;;  %v399_v33 = vpop.f32.mrf.mxu0 }
  0xdf   :  { %v495_v31 = vadd.f32 %v494_v30, %v446_v28  ;;  %v400_v34 = vadd.f32 %v1097_v32, %v399_v33  ;;  %v448_v35 = vpop.f32.mrf.mxu1 }
  0xe1   :  { %v524_v36 = vmax.f32 %v495_v31, 0.0  ;;  %v449_v39 = vadd.f32 %v448_v35, %v400_v34 }
  0xe3   :  { %540 = vst [vmem:[%s1178_s3 + $0x38] sm:$0xff] %v524_v36 }
  0xe4   :  { %v507_v41 = vpop.f32.mrf.mxu3 }
  0xe5   :  { %v508_v43 = vadd.f32 %v507_v41, %v459_v40 }
  0xe6   :  { %v497_v42 = vpop.f32.mrf.mxu2  ;;  %v401_v46 = vpop.f32.mrf.mxu0 }
  0xe7   :  { %v498_v44 = vadd.f32 %v497_v42, %v449_v39  ;;  %v529_v47 = vmax.f32 %v508_v43, 0.0  ;;  %v450_v48 = vpop.f32.mrf.mxu1  ;;  %v402_v50 = vadd.f32 %v1097_v32, %v401_v46 }
  0xe9   :  { %v525_v49 = vmax.f32 %v498_v44, 0.0  ;;  %545 = vst [vmem:[%s1178_s3 + $0x60] sm:$0xff] %v529_v47  ;;  %v451_v52 = vadd.f32 %v450_v48, %v402_v50 }
  0xeb   :  { %541 = vst [vmem:[%s1178_s3 + $0x40] sm:$0xff] %v525_v49 }
  0xec   :  { %v509_v54 = vpop.f32.mrf.mxu3 }
  0xed   :  { %v510_v56 = vadd.f32 %v509_v54, %v461_v37 }
  0xee   :  { %v499_v55 = vpop.f32.mrf.mxu2  ;;  %v404_v58 = vpop.f32.mrf.mxu0 }
  0xef   :  { %v500_v57 = vadd.f32 %v499_v55, %v451_v52  ;;  %v530_v59 = vmax.f32 %v510_v56, 0.0  ;;  %v405_v60 = vadd.f32 %v1097_v32, %v404_v58  ;;  %v453_v63 = vpop.f32.mrf.mxu1 }
  0xf1   :  { %v526_v62 = vmax.f32 %v500_v57, 0.0  ;;  %546 = vst [vmem:[%s1178_s3 + $0x68] sm:$0xff] %v530_v59  ;;  %v454_v0 = vadd.f32 %v453_v63, %v405_v60 }
  0xf3   :  { %542 = vst [vmem:[%s1178_s3 + $0x48] sm:$0xff] %v526_v62 }
  0xf4   :  { %v512_v2 = vpop.f32.mrf.mxu3 }
  0xf5   :  { %v513_v4 = vadd.f32 %v512_v2, %v464_v1 }
  0xf6   :  { %v502_v3 = vpop.f32.mrf.mxu2  ;;  %v406_v6 = vpop.f32.mrf.mxu0 }
  0xf7   :  { %v503_v5 = vadd.f32 %v502_v3, %v454_v0  ;;  %v531_v7 = vmax.f32 %v513_v4, 0.0  ;;  %v407_v53 = vadd.f32 %v1097_v32, %v406_v6  ;;  %v455_v11 = vpop.f32.mrf.mxu1 }
  0xf9   :  { %v527_v8 = vmax.f32 %v503_v5, 0.0  ;;  %547 = vst [vmem:[%s1178_s3 + $0x70] sm:$0xff] %v531_v7  ;;  %v456_v12 = vadd.f32 %v455_v11, %v407_v53 }
  0xfb   :  { %543 = vst [vmem:[%s1178_s3 + $0x50] sm:$0xff] %v527_v8 }
  0xfc   :  { %v514_v13 = vpop.f32.mrf.mxu3 }
  0xfd   :  { %v515_v15 = vadd.f32 %v514_v13, %v466_v10 }
  0xfe   :  { %v504_v14 = vpop.f32.mrf.mxu2 }
  0xff   :  { %v505_v16 = vadd.f32 %v504_v14, %v456_v12  ;;  %v532_v17 = vmax.f32 %v515_v15, 0.0 }
 0x101   :  { %v528_v18 = vmax.f32 %v505_v16, 0.0  ;;  %548 = vst [vmem:[%s1178_s3 + $0x78] sm:$0xff] %v532_v17 }
 0x103   :  { %544 = vst [vmem:[%s1178_s3 + $0x58] sm:$0xff] %v528_v18 }

// kernel: generalized_rcnn_forward.16
= control target key start
LH: loop header
LB: loop body
LE: loop exit
PB: predicated region body
PF: predicated region fallthrough
CT: control target
= control target key end

     0   :  { %s1159_s1 = inlined_call_operand.vmem [shape: bf16[384,128], index: 1, kind: input, shape index: {}]   ;;  %s1160_s2 = inlined_call_operand.vmem [shape: f32[1,128], index: 2, kind: input, shape index: {}]   ;;  %s1161_s0 = inlined_call_operand.vmem [shape: bf16[128,384], index: 0, kind: input, shape index: {}]   ;;  %s1162_s3 = inlined_call_operand.vmem [shape: f32[128,128], index: 3, kind: output, shape index: {}]  }
   0x1   :  { %v760_v0 = vld [vmem:[%s1159_s1 + $0x38] sm:$0xff]  ;;  %v759_v3 = vld [vmem:[%s1159_s1 + $0x30] sm:$0xff]  ;;  %v758_v6 = vld [vmem:[%s1159_s1 + $0x28] sm:$0xff] }
   0x2   :  { %v828_v1 = vld [vmem:[%s1159_s1 + $0x78] sm:$0xff]  ;;  %370 = vmatpush.bf16.msra.mxu0 %v760_v0  ;;  %777 = vmatpush.bf16.msra.mxu3 %v760_v0  ;;  %v843_v4 = vld [vmem:[%s1159_s1 + $0x70] sm:$0xff]  ;;  %v766_v7 = vld [vmem:[%s1159_s1 + $0x68] sm:$0xff] }
   0x3   :  { %v833_v2 = vld [vmem:[%s1159_s1 + $0xb8] sm:$0xff]  ;;  %419 = vmatpush.bf16.msra.mxu1 %v828_v1  ;;  %v848_v5 = vld [vmem:[%s1159_s1 + $0xb0] sm:$0xff]  ;;  %v861_v8 = vld [vmem:[%s1159_s1 + $0xa8] sm:$0xff] }
   0x4   :  { %468 = vmatpush.bf16.msra.mxu2 %v833_v2  ;;  %v757_v9 = vld [vmem:[%s1159_s1 + $0x20] sm:$0xff]  ;;  %v756_v12 = vld [vmem:[%s1159_s1 + $0x18] sm:$0xff]  ;;  %v755_v15 = vld [vmem:[%s1159_s1 + $0x10] sm:$0xff] }
   0x5   :  { %v765_v10 = vld [vmem:[%s1159_s1 + $0x60] sm:$0xff]  ;;  %v764_v13 = vld [vmem:[%s1159_s1 + $0x58] sm:$0xff]  ;;  %v763_v16 = vld [vmem:[%s1159_s1 + $0x50] sm:$0xff] }
   0x6   :  { %371 = vmatpush.bf16.msra.mxu0 %v759_v3  ;;  %778 = vmatpush.bf16.msra.mxu3 %v759_v3  ;;  %v873_v11 = vld [vmem:[%s1159_s1 + $0xa0] sm:$0xff]  ;;  %v885_v14 = vld [vmem:[%s1159_s1 + $0x98] sm:$0xff]  ;;  %v897_v17 = vld [vmem:[%s1159_s1 + $0x90] sm:$0xff] }
   0x7   :  { %420 = vmatpush.bf16.msra.mxu1 %v843_v4  ;;  %v754_v18 = vld [vmem:[%s1159_s1 + $0x8] sm:$0xff]  ;;  %v753_v21 = vld [vmem:[%s1159_s1] sm:$0xff]  ;;  %v611_v26 = vld [vmem:[%s1161_s0 + $0x90] sm:$0xf] }
   0x8   :  { %469 = vmatpush.bf16.msra.mxu2 %v848_v5  ;;  %v762_v19 = vld [vmem:[%s1159_s1 + $0x48] sm:$0xff]  ;;  %v761_v22 = vld [vmem:[%s1159_s1 + $0x40] sm:$0xff]  ;;  %v748_v27 = vld [vmem:[%s1161_s0 + $0x98] sm:$0xf0] }
   0x9   :  { %v909_v20 = vld [vmem:[%s1159_s1 + $0x88] sm:$0xff]  ;;  %v920_v23 = vld [vmem:[%s1159_s1 + $0x80] sm:$0xff]  ;;  %v541_v29 = vld [vmem:[%s1161_s0 + $0xc] sm:$0xf0]  ;;  %v612_v33 = vor.u32 %v748_v27, %v611_v26 }
   0xa   :  { %372 = vmatpush.bf16.msra.mxu0 %v758_v6  ;;  %779 = vmatpush.bf16.msra.mxu3 %v758_v6  ;;  %v539_v24 = vld [vmem:[%s1161_s0] sm:$0xf]  ;;  %v730_v25 = vld [vmem:[%s1161_s0 + $0x8] sm:$0xf0]  ;;  %v729_v28 = vld [vmem:[%s1161_s0 + $0x4] sm:$0xf] }
   0xb   :  { %421 = vmatpush.bf16.msra.mxu1 %v766_v7  ;;  %v547_v30 = vld [vmem:[%s1161_s0 + $0x8] sm:$0xf]  ;;  %v731_v31 = vld [vmem:[%s1161_s0 + $0x10] sm:$0xf0]  ;;  %v540_v32 = vor.u32 %v730_v25, %v539_v24  ;;  %v544_v34 = vor.u32 %v729_v28, %v541_v29  ;;  %v551_v36 = vld [vmem:[%s1161_s0 + $0x18] sm:$0xf] }
   0xc   :  { %470 = vmatpush.bf16.msra.mxu2 %v861_v8  ;;  %v548_v35 = vor.u32 %v731_v31, %v547_v30  ;;  %v733_v37 = vld [vmem:[%s1161_s0 + $0x20] sm:$0xf0]  ;;  %v623_v38 = vld [vmem:[%s1161_s0 + $0xa8] sm:$0xf]  ;;  %v751_v39 = vld [vmem:[%s1161_s0 + $0xb0] sm:$0xf0] }
   0xd   :  { %v732_v40 = vld [vmem:[%s1161_s0 + $0x1c] sm:$0xf]  ;;  %v553_v41 = vld [vmem:[%s1161_s0 + $0x24] sm:$0xf0]  ;;  %v559_v42 = vld [vmem:[%s1161_s0 + $0x20] sm:$0xf]  ;;  %v552_v44 = vor.u32 %v733_v37, %v551_v36  ;;  %v624_v45 = vor.u32 %v751_v39, %v623_v38 }
   0xe   :  { %373 = vmatpush.bf16.msra.mxu0 %v757_v9  ;;  %780 = vmatpush.bf16.msra.mxu3 %v757_v9  ;;  %v734_v43 = vld [vmem:[%s1161_s0 + $0x28] sm:$0xf0]  ;;  %v556_v46 = vor.u32 %v732_v40, %v553_v41  ;;  %v563_v48 = vld [vmem:[%s1161_s0 + $0x30] sm:$0xf]  ;;  %v736_v49 = vld [vmem:[%s1161_s0 + $0x38] sm:$0xf0] }
   0xf   :  { %422 = vmatpush.bf16.msra.mxu1 %v765_v10  ;;  %v560_v47 = vor.u32 %v734_v43, %v559_v42  ;;  %v735_v50 = vld [vmem:[%s1161_s0 + $0x34] sm:$0xf]  ;;  %v613_v52 = vld [vmem:[%s1161_s0 + $0x9c] sm:$0xf0]  ;;  %v571_v54 = vld [vmem:[%s1161_s0 + $0x38] sm:$0xf]  ;;  %v564_v56 = vor.u32 %v736_v49, %v563_v48 }
  0x10   :  { %471 = vmatpush.bf16.msra.mxu2 %v873_v11  ;;  %v747_v51 = vld [vmem:[%s1161_s0 + $0x94] sm:$0xf]  ;;  %v565_v53 = vld [vmem:[%s1161_s0 + $0x3c] sm:$0xf0]  ;;  %v737_v55 = vld [vmem:[%s1161_s0 + $0x40] sm:$0xf0] }
  0x11   :  { %v616_v57 = vor.u32 %v747_v51, %v613_v52  ;;  %v568_v58 = vor.u32 %v735_v50, %v565_v53  ;;  %v572_v59 = vor.u32 %v737_v55, %v571_v54  ;;  %v575_v60 = vld [vmem:[%s1161_s0 + $0x48] sm:$0xf]  ;;  %v739_v61 = vld [vmem:[%s1161_s0 + $0x50] sm:$0xf0]  ;;  %v738_v62 = vld [vmem:[%s1161_s0 + $0x4c] sm:$0xf] }
  0x12   :  { %374 = vmatpush.bf16.msra.mxu0 %v756_v12  ;;  %781 = vmatpush.bf16.msra.mxu3 %v756_v12  ;;  %v750_v63 = vld [vmem:[%s1161_s0 + $0xac] sm:$0xf]  ;;  %v625_v0 = vld [vmem:[%s1161_s0 + $0xb4] sm:$0xf0]  ;;  %v740_v3 = vld [vmem:[%s1161_s0 + $0x58] sm:$0xf0] }
  0x13   :  { %423 = vmatpush.bf16.msra.mxu1 %v764_v13  ;;  %v742_v9 = vld [vmem:[%s1161_s0 + $0x68] sm:$0xf0]  ;;  %v749_v12 = vld [vmem:[%s1161_s0 + $0xa0] sm:$0xf0]  ;;  %v752_v24 = vld [vmem:[%s1161_s0 + $0xb8] sm:$0xf0] }
  0x14   :  { %472 = vmatpush.bf16.msra.mxu2 %v885_v14  ;;  %v601_v25 = vld [vmem:[%s1161_s0 + $0x84] sm:$0xf0]  ;;  %v607_v26 = vld [vmem:[%s1161_s0 + $0x80] sm:$0xf]  ;;  %v746_v27 = vld [vmem:[%s1161_s0 + $0x88] sm:$0xf0] }
  0x15   :  { %v608_v31 = vor.u32 %v746_v27, %v607_v26 }
  0x16   :  { %375 = vmatpush.bf16.msra.mxu0 %v755_v15  ;;  %782 = vmatpush.bf16.msra.mxu3 %v755_v15  ;;  %v743_v15 = vld [vmem:[%s1161_s0 + $0x70] sm:$0xf0] }
  0x17   :  { %424 = vmatpush.bf16.msra.mxu1 %v763_v16 }
  0x18   :  { %473 = vmatpush.bf16.msra.mxu2 %v897_v17 }
  0x1a   :  { %376 = vmatpush.bf16.msra.mxu0 %v754_v18  ;;  %783 = vmatpush.bf16.msra.mxu3 %v754_v18 }
  0x1b   :  { %425 = vmatpush.bf16.msra.mxu1 %v762_v19 }
  0x1c   :  { %474 = vmatpush.bf16.msra.mxu2 %v909_v20 }
  0x1e   :  { %377 = vmatpush.bf16.msra.mxu0 %v753_v21  ;;  %784 = vmatpush.bf16.msra.mxu3 %v753_v21  ;;  %v745_v21 = vld [vmem:[%s1161_s0 + $0x80] sm:$0xf0] }
  0x1f   :  { %426 = vmatpush.bf16.msra.mxu1 %v761_v22 }
  0x20   :  { %475 = vmatpush.bf16.msra.mxu2 %v920_v23 }
  0x21   :  { %378 = vmatmul.bf16.vlgmr.msra.gmra.mxu0 %v540_v32  ;;  %408 = vmatmul.bf16.vlgmr.msra.gmra.mxu3 %v612_v33  ;;  %v1081_v32 = vld [vmem:[%s1160_s2] ss:$0 sm:$0xff] }
  0x22   :  { %785 = vmatpush.bf16.msrb.mxu3 %v828_v1  ;;  %427 = vmatmul.bf16.vlgmr.msra.gmra.mxu1 %v544_v34  ;;  %v577_v1 = vld [vmem:[%s1161_s0 + $0x54] sm:$0xf0] }
  0x23   :  { %476 = vmatmul.bf16.vlgmr.msra.gmra.mxu2 %v548_v35  ;;  %v580_v6 = vor.u32 %v738_v62, %v577_v1 }
  0x26   :  { %786 = vmatpush.bf16.msrb.mxu3 %v843_v4  ;;  %v576_v4 = vor.u32 %v739_v61, %v575_v60 }
  0x2a   :  { %787 = vmatpush.bf16.msrb.mxu3 %v766_v7 }
  0x2e   :  { %788 = vmatpush.bf16.msrb.mxu3 %v765_v10  ;;  %v741_v10 = vld [vmem:[%s1161_s0 + $0x64] sm:$0xf] }
  0x31   :  { %383 = vmatmul.bf16.gmra.mxu0 %v552_v44  ;;  %413 = vmatmul.bf16.gmra.mxu3 %v624_v45 }
  0x32   :  { %789 = vmatpush.bf16.msrb.mxu3 %v764_v13  ;;  %432 = vmatmul.bf16.gmra.mxu1 %v556_v46  ;;  %v589_v13 = vld [vmem:[%s1161_s0 + $0x6c] sm:$0xf0] }
  0x33   :  { %481 = vmatmul.bf16.gmra.mxu2 %v560_v47  ;;  %v592_v18 = vor.u32 %v741_v10, %v589_v13 }
  0x36   :  { %790 = vmatpush.bf16.msrb.mxu3 %v763_v16 }
  0x3a   :  { %791 = vmatpush.bf16.msrb.mxu3 %v762_v19 }
  0x3e   :  { %792 = vmatpush.bf16.msrb.mxu3 %v761_v22  ;;  %v744_v22 = vld [vmem:[%s1161_s0 + $0x7c] sm:$0xf] }
  0x3f   :  { %v604_v30 = vor.u32 %v744_v22, %v601_v25 }
  0x41   :  { %388 = vmatmul.bf16.gmra.mxu0 %v564_v56  ;;  %457 = vmatmul.bf16.vlgmr.msrb.gmra.mxu3 %v616_v57 }
  0x42   :  { %793 = vmatpush.bf16.msra.mxu3 %v833_v2  ;;  %437 = vmatmul.bf16.gmra.mxu1 %v568_v58  ;;  %v583_v2 = vld [vmem:[%s1161_s0 + $0x50] sm:$0xf] }
  0x43   :  { %486 = vmatmul.bf16.gmra.mxu2 %v572_v59  ;;  %v584_v7 = vor.u32 %v740_v3, %v583_v2 }
  0x46   :  { %794 = vmatpush.bf16.msra.mxu3 %v848_v5  ;;  %v628_v5 = vor.u32 %v750_v63, %v625_v0 }
  0x4a   :  { %795 = vmatpush.bf16.msra.mxu3 %v861_v8  ;;  %v587_v8 = vld [vmem:[%s1161_s0 + $0x60] sm:$0xf] }
  0x4b   :  { %v588_v16 = vor.u32 %v742_v9, %v587_v8 }
  0x4e   :  { %796 = vmatpush.bf16.msra.mxu3 %v873_v11  ;;  %v619_v11 = vld [vmem:[%s1161_s0 + $0x98] sm:$0xf] }
  0x51   :  { %393 = vmatmul.bf16.gmra.mxu0 %v576_v4  ;;  %462 = vmatmul.bf16.gmra.mxu3 %v628_v5 }
  0x52   :  { %797 = vmatpush.bf16.msra.mxu3 %v885_v14  ;;  %442 = vmatmul.bf16.gmra.mxu1 %v580_v6  ;;  %v595_v14 = vld [vmem:[%s1161_s0 + $0x68] sm:$0xf] }
  0x53   :  { %491 = vmatmul.bf16.gmra.mxu2 %v584_v7  ;;  %v596_v19 = vor.u32 %v743_v15, %v595_v14 }
  0x56   :  { %798 = vmatpush.bf16.msra.mxu3 %v897_v17  ;;  %v620_v17 = vor.u32 %v749_v12, %v619_v11 }
  0x5a   :  { %799 = vmatpush.bf16.msra.mxu3 %v909_v20  ;;  %v599_v20 = vld [vmem:[%s1161_s0 + $0x78] sm:$0xf] }
  0x5b   :  { %v600_v28 = vor.u32 %v745_v21, %v599_v20 }
  0x5e   :  { %800 = vmatpush.bf16.msra.mxu3 %v920_v23  ;;  %v631_v23 = vld [vmem:[%s1161_s0 + $0xb0] sm:$0xf] }
  0x5f   :  { %v632_v29 = vor.u32 %v752_v24, %v631_v23 }
  0x61   :  { %398 = vmatmul.bf16.gmra.mxu0 %v588_v16  ;;  %506 = vmatmul.bf16.vlgmr.msra.gmra.mxu3 %v620_v17 }
  0x62   :  { %447 = vmatmul.bf16.gmra.mxu1 %v592_v18 }
  0x63   :  { %496 = vmatmul.bf16.gmra.mxu2 %v596_v19 }
  0x71   :  { %403 = vmatmul.bf16.gmra.mxu0 %v600_v28  ;;  %511 = vmatmul.bf16.gmra.mxu3 %v632_v29 }
  0x72   :  { %452 = vmatmul.bf16.gmra.mxu1 %v604_v30 }
  0x73   :  { %501 = vmatmul.bf16.gmra.mxu2 %v608_v31 }
  0x9e   :  { %v379_v33 = vpop.f32.mrf.mxu0 }
  0x9f   :  { %v380_v34 = vadd.f32 %v1081_v32, %v379_v33  ;;  %v428_v35 = vpop.f32.mrf.mxu1 }
  0xa1   :  { %v429_v36 = vadd.f32 %v428_v35, %v380_v34 }
  0xa4   :  { %v1084_v37 = vpop.f32.mrf.mxu3 }
  0xa5   :  { %v410_v28 = vadd.f32 %v1081_v32, %v1084_v37 }
  0xa6   :  { %v477_v38 = vpop.f32.mrf.mxu2  ;;  %v381_v40 = vpop.f32.mrf.mxu0 }
  0xa7   :  { %v478_v39 = vadd.f32 %v477_v38, %v429_v36  ;;  %v430_v41 = vpop.f32.mrf.mxu1  ;;  %v382_v42 = vadd.f32 %v1081_v32, %v381_v40 }
  0xa9   :  { %517 = vst [vmem:[%s1162_s3] sm:$0xff] %v478_v39  ;;  %v431_v43 = vadd.f32 %v430_v41, %v382_v42 }
  0xac   :  { %v1090_v44 = vpop.f32.mrf.mxu3 }
  0xad   :  { %v412_v37 = vadd.f32 %v1081_v32, %v1090_v44 }
  0xae   :  { %v479_v45 = vpop.f32.mrf.mxu2  ;;  %v384_v47 = vpop.f32.mrf.mxu0 }
  0xaf   :  { %v480_v46 = vadd.f32 %v479_v45, %v431_v43  ;;  %v385_v48 = vadd.f32 %v1081_v32, %v384_v47  ;;  %v433_v49 = vpop.f32.mrf.mxu1 }
  0xb1   :  { %518 = vst [vmem:[%s1162_s3 + $0x8] sm:$0xff] %v480_v46  ;;  %v434_v50 = vadd.f32 %v433_v49, %v385_v48 }
  0xb4   :  { %v1096_v51 = vpop.f32.mrf.mxu3 }
  0xb5   :  { %v415_v44 = vadd.f32 %v1081_v32, %v1096_v51 }
  0xb6   :  { %v482_v52 = vpop.f32.mrf.mxu2  ;;  %v386_v54 = vpop.f32.mrf.mxu0 }
  0xb7   :  { %v483_v53 = vadd.f32 %v482_v52, %v434_v50  ;;  %v435_v55 = vpop.f32.mrf.mxu1  ;;  %v387_v56 = vadd.f32 %v1081_v32, %v386_v54 }
  0xb9   :  { %519 = vst [vmem:[%s1162_s3 + $0x10] sm:$0xff] %v483_v53  ;;  %v436_v57 = vadd.f32 %v435_v55, %v387_v56 }
  0xbc   :  { %v1102_v58 = vpop.f32.mrf.mxu3 }
  0xbd   :  { %v417_v51 = vadd.f32 %v1081_v32, %v1102_v58 }
  0xbe   :  { %v484_v59 = vpop.f32.mrf.mxu2  ;;  %v389_v61 = vpop.f32.mrf.mxu0 }
  0xbf   :  { %v485_v60 = vadd.f32 %v484_v59, %v436_v57  ;;  %v390_v62 = vadd.f32 %v1081_v32, %v389_v61  ;;  %v438_v63 = vpop.f32.mrf.mxu1 }
  0xc1   :  { %520 = vst [vmem:[%s1162_s3 + $0x18] sm:$0xff] %v485_v60  ;;  %v439_v0 = vadd.f32 %v438_v63, %v390_v62 }
  0xc4   :  { %v458_v1 = vpop.f32.mrf.mxu3 }
  0xc5   :  { %v459_v30 = vadd.f32 %v458_v1, %v410_v28 }
  0xc6   :  { %v487_v2 = vpop.f32.mrf.mxu2  ;;  %v391_v4 = vpop.f32.mrf.mxu0 }
  0xc7   :  { %v488_v3 = vadd.f32 %v487_v2, %v439_v0  ;;  %v440_v5 = vpop.f32.mrf.mxu1  ;;  %v392_v6 = vadd.f32 %v1081_v32, %v391_v4 }
  0xc9   :  { %521 = vst [vmem:[%s1162_s3 + $0x20] sm:$0xff] %v488_v3  ;;  %v441_v7 = vadd.f32 %v440_v5, %v392_v6 }
  0xcc   :  { %v460_v8 = vpop.f32.mrf.mxu3 }
  0xcd   :  { %v461_v40 = vadd.f32 %v460_v8, %v412_v37 }
  0xce   :  { %v489_v9 = vpop.f32.mrf.mxu2  ;;  %v394_v11 = vpop.f32.mrf.mxu0 }
  0xcf   :  { %v490_v10 = vadd.f32 %v489_v9, %v441_v7  ;;  %v395_v12 = vadd.f32 %v1081_v32, %v394_v11  ;;  %v443_v13 = vpop.f32.mrf.mxu1 }
  0xd1   :  { %522 = vst [vmem:[%s1162_s3 + $0x28] sm:$0xff] %v490_v10  ;;  %v444_v14 = vadd.f32 %v443_v13, %v395_v12 }
  0xd4   :  { %v463_v15 = vpop.f32.mrf.mxu3 }
  0xd5   :  { %v464_v52 = vadd.f32 %v463_v15, %v415_v44 }
  0xd6   :  { %v492_v16 = vpop.f32.mrf.mxu2  ;;  %v396_v18 = vpop.f32.mrf.mxu0 }
  0xd7   :  { %v493_v17 = vadd.f32 %v492_v16, %v444_v14  ;;  %v445_v19 = vpop.f32.mrf.mxu1  ;;  %v397_v20 = vadd.f32 %v1081_v32, %v396_v18 }
  0xd9   :  { %523 = vst [vmem:[%s1162_s3 + $0x30] sm:$0xff] %v493_v17  ;;  %v446_v21 = vadd.f32 %v445_v19, %v397_v20 }
  0xdc   :  { %v465_v22 = vpop.f32.mrf.mxu3 }
  0xdd   :  { %v466_v60 = vadd.f32 %v465_v22, %v417_v51 }
  0xde   :  { %v494_v23 = vpop.f32.mrf.mxu2  ;;  %v399_v25 = vpop.f32.mrf.mxu0 }
  0xdf   :  { %v495_v24 = vadd.f32 %v494_v23, %v446_v21  ;;  %v400_v26 = vadd.f32 %v1081_v32, %v399_v25  ;;  %v448_v27 = vpop.f32.mrf.mxu1 }
  0xe1   :  { %524 = vst [vmem:[%s1162_s3 + $0x38] sm:$0xff] %v495_v24  ;;  %v449_v29 = vadd.f32 %v448_v27, %v400_v26 }
  0xe4   :  { %v507_v31 = vpop.f32.mrf.mxu3 }
  0xe5   :  { %v508_v34 = vadd.f32 %v507_v31, %v459_v30 }
  0xe6   :  { %v497_v33 = vpop.f32.mrf.mxu2  ;;  %v401_v36 = vpop.f32.mrf.mxu0 }
  0xe7   :  { %v498_v35 = vadd.f32 %v497_v33, %v449_v29  ;;  %529 = vst [vmem:[%s1162_s3 + $0x60] sm:$0xff] %v508_v34  ;;  %v450_v38 = vpop.f32.mrf.mxu1  ;;  %v402_v39 = vadd.f32 %v1081_v32, %v401_v36 }
  0xe9   :  { %525 = vst [vmem:[%s1162_s3 + $0x40] sm:$0xff] %v498_v35  ;;  %v451_v41 = vadd.f32 %v450_v38, %v402_v39 }
  0xec   :  { %v509_v42 = vpop.f32.mrf.mxu3 }
  0xed   :  { %v510_v45 = vadd.f32 %v509_v42, %v461_v40 }
  0xee   :  { %v499_v43 = vpop.f32.mrf.mxu2  ;;  %v404_v47 = vpop.f32.mrf.mxu0 }
  0xef   :  { %v500_v46 = vadd.f32 %v499_v43, %v451_v41  ;;  %530 = vst [vmem:[%s1162_s3 + $0x68] sm:$0xff] %v510_v45  ;;  %v405_v48 = vadd.f32 %v1081_v32, %v404_v47  ;;  %v453_v49 = vpop.f32.mrf.mxu1 }
  0xf1   :  { %526 = vst [vmem:[%s1162_s3 + $0x48] sm:$0xff] %v500_v46  ;;  %v454_v50 = vadd.f32 %v453_v49, %v405_v48 }
  0xf4   :  { %v512_v53 = vpop.f32.mrf.mxu3 }
  0xf5   :  { %v513_v55 = vadd.f32 %v512_v53, %v464_v52 }
  0xf6   :  { %v502_v54 = vpop.f32.mrf.mxu2  ;;  %v406_v57 = vpop.f32.mrf.mxu0 }
  0xf7   :  { %v503_v56 = vadd.f32 %v502_v54, %v454_v50  ;;  %531 = vst [vmem:[%s1162_s3 + $0x70] sm:$0xff] %v513_v55  ;;  %v407_v59 = vadd.f32 %v1081_v32, %v406_v57  ;;  %v455_v61 = vpop.f32.mrf.mxu1 }
  0xf9   :  { %527 = vst [vmem:[%s1162_s3 + $0x50] sm:$0xff] %v503_v56  ;;  %v456_v62 = vadd.f32 %v455_v61, %v407_v59 }
  0xfc   :  { %v514_v63 = vpop.f32.mrf.mxu3 }
  0xfd   :  { %v515_v1 = vadd.f32 %v514_v63, %v466_v60 }
  0xfe   :  { %v504_v0 = vpop.f32.mrf.mxu2 }
  0xff   :  { %v505_v2 = vadd.f32 %v504_v0, %v456_v62  ;;  %532 = vst [vmem:[%s1162_s3 + $0x78] sm:$0xff] %v515_v1 }
 0x101   :  { %528 = vst [vmem:[%s1162_s3 + $0x58] sm:$0xff] %v505_v2 }

</bundles_post_ra>
